<compile_context>
chip_gen: v6e
topology: v6e:2x2x1
jax: 0.10.0
libtpu: 0.0.40
codegen_flags: <defaults>
</compile_context>

<pallas_src>
import functools

import jax
import jax.numpy as jnp
from jax.experimental import pallas as pl
from jax.experimental.pallas import tpu as pltpu

EPS = 1e-5


def _layernorm(x, gamma, beta):
    mu = jnp.mean(x, axis=-1, keepdims=True)
    xc = x - mu
    var = jnp.mean(xc * xc, axis=-1, keepdims=True)
    return xc * jax.lax.rsqrt(var + EPS) * gamma + beta


def _encoder_stack_kernel(x_ref, vecd_ref, vecf_ref, wa_ref, wb_ref, fn_ref,
                          o_ref, carry_ref, lnx_ref, acc_ref, *,
                          compute_dtype, gelu_approximate, has_final_norm):
    """Grid = (row_tiles, layers, sub_blocks=2, F_chunks).

    carry_ref : (tm, D) f32  running activation for the current row tile
    lnx_ref   : (tm, D)      LayerNorm(carry) in compute dtype, reused per chunk
    acc_ref   : (tm, D) f32  accumulator of the chunked hidden->out matmul
    """
    l = pl.program_id(1)
    s = pl.program_id(2)
    f = pl.program_id(3)
    nl = pl.num_programs(1)
    nf = pl.num_programs(3)

    @pl.when((l == 0) & (s == 0) & (f == 0))
    def _load_row_tile():
        carry_ref[...] = x_ref[...].astype(jnp.float32)

    @pl.when(f == 0)
    def _start_sub_block():
        v = vecd_ref[0]                               # (3, D): gamma, beta, b_out
        ln = _layernorm(carry_ref[...], v[0:1], v[1:2])
        lnx_ref[...] = ln.astype(compute_dtype)
        acc_ref[...] = jnp.zeros_like(acc_ref)

    # One hidden-dim chunk:  gelu(ln_x @ wA_chunk + bA_chunk) @ wB_chunk.
    h = jnp.dot(lnx_ref[...], wa_ref[0],
                preferred_element_type=jnp.float32) + vecf_ref[0]
    h = jax.nn.gelu(h, approximate=gelu_approximate)
    acc_ref[...] += jnp.dot(h.astype(compute_dtype), wb_ref[0],
                            preferred_element_type=jnp.float32)

    @pl.when(f == nf - 1)
    def _finish_sub_block():
        b_out = vecd_ref[0][2:3]                      # (1, D)
        carry_ref[...] = carry_ref[...] + acc_ref[...] + b_out

    @pl.when((f == nf - 1) & (s == 1) & (l == nl - 1))
    def _epilogue():
        out = carry_ref[...]
        if has_final_norm:                            # static Python flag
            fn = fn_ref[...]                          # (2, D)
            out = _layernorm(out, fn[0:1], fn[1:2])
        o_ref[...] = out.astype(o_ref.dtype)


def _vmem_capacity_bytes():
    """Physical VMEM of the local TPU (128 MiB v5e/v6e, 64 MiB v7x)."""
    try:
        info = pltpu.get_tpu_info()
        cap = getattr(info, "vmem_capacity_bytes", None)
        if cap:
            return int(cap)
    except Exception:
        pass
    return 128 << 20


def mlp_encoder(x, layer_params, norm_params=None, *, tm=256, tf=512,
                compute_dtype=jnp.bfloat16, gelu_approximate=True):
    """Forward of MLP_encoder.

    x:            [B, S, d_model] float32
    layer_params: list (len num_layers) of dicts with
                  gamma1, beta1, w1, b1, w2, b2, gamma2, beta2, w3, b3, w4, b4
                  (nn.Linear weights stored transposed, i.e. [in, out]).
    norm_params:  optional (gamma, beta) for MLP_encoder's final norm.
    compute_dtype: matmul operand dtype (bf16 for MXU; pass jnp.float32 for a
                  full-precision parity check against an fp32 reference).
    """
    B, S, D = x.shape
    N = B * S
    L = len(layer_params)
    F = layer_params[0]["w1"].shape[1]

    # Row tiling: multiple of 8, divides N, and >= 2 tiles when possible so the
    # "parallel" row axis can feed both TensorCores on v7x.
    tm = min(tm, N)
    while N // tm < 2 and tm % 16 == 0:
        tm //= 2
    # TODO(synk): pad/mask ragged N instead of asserting.
    assert tm % 8 == 0 and N % tm == 0, (N, tm)
    n_row_tiles = N // tm

    # Hidden-dim chunking keeps only a (D, tf) + (tf, D) weight slice resident.
    tf = min(tf, F)
    assert F % tf == 0, (F, tf)
    nF = F // tf
    if nF > 1:
        assert tf % 128 == 0 and D % 128 == 0, (D, tf)

    xf = x.reshape(N, D)
    f32 = jnp.float32

    def vec(name, li):
        return jnp.asarray(layer_params[li][name], f32).reshape(-1)

    # Pack per-(layer, sub-block) params on one leading axis of size 2L.
    vecd_rows, vecf_rows, wa_rows, wb_rows = [], [], [], []
    for li in range(L):
        p = layer_params[li]
        vecd_rows += [
            jnp.stack([vec("gamma1", li), vec("beta1", li), vec("b2", li)]),
            jnp.stack([vec("gamma2", li), vec("beta2", li), vec("b4", li)]),
        ]
        vecf_rows += [vec("b1", li)[None, :], vec("b3", li)[None, :]]
        wa_rows += [jnp.asarray(p["w1"], f32), jnp.asarray(p["w3"], f32)]
        wb_rows += [jnp.asarray(p["w2"], f32), jnp.asarray(p["w4"], f32)]
    vecd = jnp.stack(vecd_rows)                        # (2L, 3, D)  f32
    vecf = jnp.stack(vecf_rows)                        # (2L, 1, F)  f32
    wa = jnp.stack(wa_rows).astype(compute_dtype)      # (2L, D, F)
    wb = jnp.stack(wb_rows).astype(compute_dtype)      # (2L, F, D)

    has_final_norm = norm_params is not None
    if has_final_norm:
        fn = jnp.stack([jnp.asarray(norm_params[0], f32).reshape(-1),
                        jnp.asarray(norm_params[1], f32).reshape(-1)])
    else:
        fn = jnp.zeros((2, D), f32)                    # unused (static flag)

    row_spec = pl.BlockSpec((tm, D), lambda i, l, s, f: (i, 0))
    in_specs = [
        row_spec,                                                        # x
        pl.BlockSpec((1, 3, D), lambda i, l, s, f: (2 * l + s, 0, 0)),   # vecd
        pl.BlockSpec((1, 1, tf), lambda i, l, s, f: (2 * l + s, 0, f)),  # vecf
        pl.BlockSpec((1, D, tf), lambda i, l, s, f: (2 * l + s, 0, f)),  # wa
        pl.BlockSpec((1, tf, D), lambda i, l, s, f: (2 * l + s, f, 0)),  # wb
        pl.BlockSpec((2, D), lambda i, l, s, f: (0, 0)),                 # fn
    ]

    cbytes = jnp.dtype(compute_dtype).itemsize
    obytes = jnp.dtype(x.dtype).itemsize
    resident = (2 * tm * D * 4                        # input row tile (dbl buf)
                + 2 * tm * D * obytes                 # output row tile
                + 2 * tm * D * 4 + tm * D * cbytes    # carry/acc f32 + ln(x)
                + 2 * 2 * D * tf * cbytes             # wA + wB chunks (dbl buf)
                + 2 * (3 * D + tf) * 4 + 2 * D * 4    # packed vectors + final LN
                + 4 * tm * tf * 4 + 2 * tm * D * 4)   # GELU / LN temporaries
    phys = _vmem_capacity_bytes()
    vmem_limit = int(min(max(2 * resident, 32 << 20), phys - (16 << 20)))

    cost = pl.CostEstimate(
        flops=8 * N * D * F * L,                       # 4 matmuls per layer
        transcendentals=2 * N * F * L,                 # 2 GELUs per layer
        bytes_accessed=int(2 * N * D * 4
                           + n_row_tiles * L * 2 * (D * F + F * D) * cbytes
                           + n_row_tiles * L * 2 * (4 * D + F) * 4),
    )

    kernel = functools.partial(_encoder_stack_kernel,
                               compute_dtype=compute_dtype,
                               gelu_approximate=gelu_approximate,
                               has_final_norm=has_final_norm)

    out = pl.pallas_call(
        kernel,
        out_shape=jax.ShapeDtypeStruct((N, D), x.dtype),
        grid_spec=pltpu.PrefetchScalarGridSpec(
            num_scalar_prefetch=0,
            grid=(n_row_tiles, L, 2, nF),
            in_specs=in_specs,
            out_specs=row_spec,
            scratch_shapes=[pltpu.VMEM((tm, D), jnp.float32),    # carry
                            pltpu.VMEM((tm, D), compute_dtype),  # ln(x)
                            pltpu.VMEM((tm, D), jnp.float32)],   # F-chunk acc
        ),
        compiler_params=pltpu.CompilerParams(
            dimension_semantics=("parallel", "arbitrary", "arbitrary",
                                 "arbitrary"),
            vmem_limit_bytes=vmem_limit,
        ),
        cost_estimate=cost,
    )(xf, vecd, vecf, wa, wb, fn)

    return out.reshape(B, S, D)


def init_layer_params(key, d_model, dim_forward):
    """Parameter shapes matching one PyTorch pre-norm MLP encoder layer.
    nn.Linear weights stored transposed ([in, out]) for row-major matmul."""
    ks = jax.random.split(key, 8)

    def lin(kw, kb, fan_in, fan_out):
        bound = 1.0 / jnp.sqrt(fan_in)
        w = jax.random.uniform(kw, (fan_in, fan_out), jnp.float32, -bound, bound)
        b = jax.random.uniform(kb, (1, fan_out), jnp.float32, -bound, bound)
        return w, b

    w1, b1 = lin(ks[0], ks[1], d_model, dim_forward)
    w2, b2 = lin(ks[2], ks[3], dim_forward, d_model)
    w3, b3 = lin(ks[4], ks[5], d_model, dim_forward)
    w4, b4 = lin(ks[6], ks[7], dim_forward, d_model)
    return dict(
        gamma1=jnp.ones((1, d_model), jnp.float32),
        beta1=jnp.zeros((1, d_model), jnp.float32),
        w1=w1, b1=b1, w2=w2, b2=b2,
        gamma2=jnp.ones((1, d_model), jnp.float32),
        beta2=jnp.zeros((1, d_model), jnp.float32),
        w3=w3, b3=b3, w4=w4, b4=b4,
    )


def reference(x, layer_params, norm_params, compute_dtype, gelu_approximate):
    """Pure-JAX MLP_encoder.forward mirroring the kernel's mixed precision
    (compute_dtype matmul operands, f32 accumulation / residuals / LayerNorm)."""
    out = x.astype(jnp.float32)
    for p in layer_params:
        h = _layernorm(out, p["gamma1"], p["beta1"])
        h = jnp.dot(h.astype(compute_dtype), p["w1"].astype(compute_dtype),
                    preferred_element_type=jnp.float32) + p["b1"]
        h = jax.nn.gelu(h, approximate=gelu_approximate)
        h = jnp.dot(h.astype(compute_dtype), p["w2"].astype(compute_dtype),
                    preferred_element_type=jnp.float32) + p["b2"]
        out = out + h
        h = _layernorm(out, p["gamma2"], p["beta2"])
        h = jnp.dot(h.astype(compute_dtype), p["w3"].astype(compute_dtype),
                    preferred_element_type=jnp.float32) + p["b3"]
        h = jax.nn.gelu(h, approximate=gelu_approximate)
        h = jnp.dot(h.astype(compute_dtype), p["w4"].astype(compute_dtype),
                    preferred_element_type=jnp.float32) + p["b4"]
        out = out + h
    if norm_params is not None:
        out = _layernorm(out, norm_params[0], norm_params[1])
    return out


if __name__ == "__main__":
    d_model, dim_forward = 32, 64
    num_layers = 2
    batch, seq = 2, 256          # N = 512 rows -> 2 row tiles of tm=256

    key = jax.random.PRNGKey(0)
    kx, kp = jax.random.split(key)
    x = jax.random.normal(kx, (batch, seq, d_model), jnp.float32)

    # _get_clones deep-copies the layer (identical init); distinct per-layer
    # params here exercise the per-layer weight streaming (post-training case).
    layer_params = [init_layer_params(k, d_model, dim_forward)
                    for k in jax.random.split(kp, num_layers)]
    norm_params = (jnp.ones((1, d_model), jnp.float32),
                   jnp.zeros((1, d_model), jnp.float32))

    out = jax.block_until_ready(
        mlp_encoder(x, layer_params, norm_params, tm=256, tf=512,
                    compute_dtype=jnp.bfloat16, gelu_approximate=True))

    ref = reference(x, layer_params, norm_params, jnp.bfloat16,
                    gelu_approximate=True)
    assert out.shape == (batch, seq, d_model)
    max_err = float(jnp.max(jnp.abs(out - ref)))
    assert jnp.allclose(out, ref, atol=2e-2, rtol=2e-2), max_err

    print("KERNEL_OK")
</pallas_src>

<mosaic_0001>
module attributes {stable_mosaic.version = 11 : i64} {
  func.func @_encoder_stack_kernel(%arg0: i32, %arg1: i32, %arg2: i32, %arg3: i32, %arg4: memref<256x32xf32, #tpu.memory_space<vmem>>, %arg5: memref<1x3x32xf32, #tpu.memory_space<vmem>>, %arg6: memref<1x1x64xf32, #tpu.memory_space<vmem>>, %arg7: memref<1x32x64xbf16, #tpu.memory_space<vmem>>, %arg8: memref<1x64x32xbf16, #tpu.memory_space<vmem>>, %arg9: memref<2x32xf32, #tpu.memory_space<vmem>>, %arg10: memref<256x32xf32, #tpu.memory_space<vmem>>, %arg11: memref<256x32xf32, #tpu.memory_space<vmem>>, %arg12: memref<256x32xbf16, #tpu.memory_space<vmem>>, %arg13: memref<256x32xf32, #tpu.memory_space<vmem>>) attributes {dimension_semantics = [#tpu.dimension_semantics<parallel>, #tpu.dimension_semantics<arbitrary>, #tpu.dimension_semantics<arbitrary>, #tpu.dimension_semantics<arbitrary>], iteration_bounds = array<i64: 2, 2, 2, 1>, scalar_prefetch = 0 : i64, scratch_operands = 3 : i64, tpu.core_type = #tpu.core_type<tc>, window_params = [{transform_indices = @transform_0, window_bounds = array<i64: 256, 32>}, {transform_indices = @transform_1, window_bounds = array<i64: 1, 3, 32>}, {transform_indices = @transform_2, window_bounds = array<i64: 1, 1, 64>}, {transform_indices = @transform_3, window_bounds = array<i64: 1, 32, 64>}, {transform_indices = @transform_4, window_bounds = array<i64: 1, 64, 32>}, {pipeline_mode = #tpu.pipeline_mode<synchronous>, transform_indices = @transform_5, window_bounds = array<i64: 2, 32>}, {transform_indices = @transform_6, window_bounds = array<i64: 256, 32>}]} {
    %c0_i32 = arith.constant 0 : i32
    %0 = arith.cmpi eq, %arg1, %c0_i32 : i32
    %c0_i32_0 = arith.constant 0 : i32
    %1 = arith.cmpi eq, %arg2, %c0_i32_0 : i32
    %2 = arith.andi %0, %1 : i1
    %c0_i32_1 = arith.constant 0 : i32
    %3 = arith.cmpi eq, %arg3, %c0_i32_1 : i32
    %4 = arith.andi %2, %3 : i1
    %5 = arith.extui %4 : i1 to i32
    %c0_i32_2 = arith.constant 0 : i32
    %6 = arith.cmpi ne, %5, %c0_i32_2 : i32
    scf.if %6 {
      %c0_29 = arith.constant 0 : index
      %c0_30 = arith.constant 0 : index
      %48 = vector.load %arg4[%c0_29, %c0_30] : memref<256x32xf32, #tpu.memory_space<vmem>>, vector<256x32xf32>
      %c0_31 = arith.constant 0 : index
      %c0_32 = arith.constant 0 : index
      %49 = vector.load %arg11[%c0_31, %c0_32] : memref<256x32xf32, #tpu.memory_space<vmem>>, vector<256x32xf32>
      tpu.vector_store %arg11[%c0_31, %c0_32], %48 {strides = array<i32>} : memref<256x32xf32, #tpu.memory_space<vmem>>, vector<256x32xf32>,
    } else {
    }
    %c0_i32_3 = arith.constant 0 : i32
    %7 = arith.cmpi eq, %arg3, %c0_i32_3 : i32
    %8 = arith.extui %7 : i1 to i32
    %c0_i32_4 = arith.constant 0 : i32
    %9 = arith.cmpi ne, %8, %c0_i32_4 : i32
    scf.if %9 {
      %c0_29 = arith.constant 0 : index
      %c0_30 = arith.constant 0 : index
      %c0_31 = arith.constant 0 : index
      %48 = vector.load %arg5[%c0_29, %c0_30, %c0_31] : memref<1x3x32xf32, #tpu.memory_space<vmem>>, vector<1x3x32xf32>
      %49 = vector.shape_cast %48 : vector<1x3x32xf32> to vector<3x32xf32>
      %c0_32 = arith.constant 0 : index
      %c0_33 = arith.constant 0 : index
      %50 = vector.load %arg11[%c0_32, %c0_33] : memref<256x32xf32, #tpu.memory_space<vmem>>, vector<256x32xf32>
      %51 = vector.extract_strided_slice %49 {offsets = [0, 0], sizes = [1, 32], strides = [1, 1]} : vector<3x32xf32> to vector<1x32xf32>
      %52 = vector.extract_strided_slice %49 {offsets = [1, 0], sizes = [1, 32], strides = [1, 1]} : vector<3x32xf32> to vector<1x32xf32>
      %cst_34 = arith.constant dense<0.000000e+00> : vector<256xf32>
      %53 = vector.multi_reduction <add>, %50, %cst_34 [1] : vector<256x32xf32> to vector<256xf32>
      %54 = vector.shape_cast %53 : vector<256xf32> to vector<256x1xf32>
      %cst_35 = arith.constant 3.200000e+01 : f32
      %55 = vector.broadcast %cst_35 : f32 to vector<256x1xf32>
      %56 = arith.divf %54, %55 : vector<256x1xf32>
      %57 = vector.broadcast %56 : vector<256x1xf32> to vector<256x32xf32>
      %58 = arith.subf %50, %57 : vector<256x32xf32>
      %59 = arith.mulf %58, %58 : vector<256x32xf32>
      %cst_36 = arith.constant dense<0.000000e+00> : vector<256xf32>
      %60 = vector.multi_reduction <add>, %59, %cst_36 [1] : vector<256x32xf32> to vector<256xf32>
      %61 = vector.shape_cast %60 : vector<256xf32> to vector<256x1xf32>
      %cst_37 = arith.constant 3.200000e+01 : f32
      %62 = vector.broadcast %cst_37 : f32 to vector<256x1xf32>
      %63 = arith.divf %61, %62 : vector<256x1xf32>
      %cst_38 = arith.constant 9.99999974E-6 : f32
      %64 = vector.broadcast %cst_38 : f32 to vector<256x1xf32>
      %65 = arith.addf %63, %64 : vector<256x1xf32>
      %66 = math.rsqrt %65 : vector<256x1xf32>
      %67 = vector.broadcast %66 : vector<256x1xf32> to vector<256x32xf32>
      %68 = arith.mulf %58, %67 : vector<256x32xf32>
      %69 = vector.broadcast %51 : vector<1x32xf32> to vector<256x32xf32>
      %70 = arith.mulf %68, %69 : vector<256x32xf32>
      %71 = vector.broadcast %52 : vector<1x32xf32> to vector<256x32xf32>
      %72 = arith.addf %70, %71 : vector<256x32xf32>
      %73 = arith.truncf %72 : vector<256x32xf32> to vector<256x32xbf16>
      %c0_39 = arith.constant 0 : index
      %c0_40 = arith.constant 0 : index
      %74 = vector.load %arg12[%c0_39, %c0_40] : memref<256x32xbf16, #tpu.memory_space<vmem>>, vector<256x32xbf16>
      tpu.vector_store %arg12[%c0_39, %c0_40], %73 {strides = array<i32>} : memref<256x32xbf16, #tpu.memory_space<vmem>>, vector<256x32xbf16>,
      %cst_41 = arith.constant 0.000000e+00 : f32
      %75 = vector.broadcast %cst_41 : f32 to vector<256x32xf32>
      %c0_42 = arith.constant 0 : index
      %c0_43 = arith.constant 0 : index
      %76 = vector.load %arg13[%c0_42, %c0_43] : memref<256x32xf32, #tpu.memory_space<vmem>>, vector<256x32xf32>
      tpu.vector_store %arg13[%c0_42, %c0_43], %75 {strides = array<i32>} : memref<256x32xf32, #tpu.memory_space<vmem>>, vector<256x32xf32>,
    } else {
    }
    %c0 = arith.constant 0 : index
    %c0_5 = arith.constant 0 : index
    %10 = vector.load %arg12[%c0, %c0_5] : memref<256x32xbf16, #tpu.memory_space<vmem>>, vector<256x32xbf16>
    %c0_6 = arith.constant 0 : index
    %c0_7 = arith.constant 0 : index
    %c0_8 = arith.constant 0 : index
    %11 = vector.load %arg7[%c0_6, %c0_7, %c0_8] : memref<1x32x64xbf16, #tpu.memory_space<vmem>>, vector<1x32x64xbf16>
    %12 = vector.shape_cast %11 : vector<1x32x64xbf16> to vector<32x64xbf16>
    %cst = arith.constant dense<0.000000e+00> : vector<256x64xf32>
    %13 = tpu.matmul %10, %12, %cst {dimension_numbers = #tpu.dot_dimension_numbers<[1], [0], [0], [1], [0, 0, 1, 1], [], []>} : vector<256x32xbf16>, vector<32x64xbf16>, vector<256x64xf32> -> vector<256x64xf32>
    %c0_9 = arith.constant 0 : index
    %c0_10 = arith.constant 0 : index
    %c0_11 = arith.constant 0 : index
    %14 = vector.load %arg6[%c0_9, %c0_10, %c0_11] : memref<1x1x64xf32, #tpu.memory_space<vmem>>, vector<1x1x64xf32>
    %15 = vector.shape_cast %14 : vector<1x1x64xf32> to vector<1x64xf32>
    %16 = vector.broadcast %15 : vector<1x64xf32> to vector<256x64xf32>
    %17 = arith.addf %13, %16 : vector<256x64xf32>
    %18 = arith.mulf %17, %17 : vector<256x64xf32>
    %19 = arith.mulf %17, %18 : vector<256x64xf32>
    %cst_12 = arith.constant 4.471500e-02 : f32
    %20 = vector.broadcast %cst_12 : f32 to vector<256x64xf32>
    %21 = arith.mulf %20, %19 : vector<256x64xf32>
    %22 = arith.addf %17, %21 : vector<256x64xf32>
    %cst_13 = arith.constant 0.797884583 : f32
    %23 = vector.broadcast %cst_13 : f32 to vector<256x64xf32>
    %24 = arith.mulf %23, %22 : vector<256x64xf32>
    %25 = math.tanh %24 : vector<256x64xf32>
    %cst_14 = arith.constant 1.000000e+00 : f32
    %26 = vector.broadcast %cst_14 : f32 to vector<256x64xf32>
    %27 = arith.addf %26, %25 : vector<256x64xf32>
    %cst_15 = arith.constant 5.000000e-01 : f32
    %28 = vector.broadcast %cst_15 : f32 to vector<256x64xf32>
    %29 = arith.mulf %28, %27 : vector<256x64xf32>
    %30 = arith.mulf %17, %29 : vector<256x64xf32>
    %c0_16 = arith.constant 0 : index
    %c0_17 = arith.constant 0 : index
    %31 = vector.load %arg13[%c0_16, %c0_17] : memref<256x32xf32, #tpu.memory_space<vmem>>, vector<256x32xf32>
    %32 = arith.truncf %30 : vector<256x64xf32> to vector<256x64xbf16>
    %c0_18 = arith.constant 0 : index
    %c0_19 = arith.constant 0 : index
    %c0_20 = arith.constant 0 : index
    %33 = vector.load %arg8[%c0_18, %c0_19, %c0_20] : memref<1x64x32xbf16, #tpu.memory_space<vmem>>, vector<1x64x32xbf16>
    %34 = vector.shape_cast %33 : vector<1x64x32xbf16> to vector<64x32xbf16>
    %cst_21 = arith.constant dense<0.000000e+00> : vector<256x32xf32>
    %35 = tpu.matmul %32, %34, %cst_21 {dimension_numbers = #tpu.dot_dimension_numbers<[1], [0], [0], [1], [0, 0, 1, 1], [], []>} : vector<256x64xbf16>, vector<64x32xbf16>, vector<256x32xf32> -> vector<256x32xf32>
    %36 = arith.addf %31, %35 : vector<256x32xf32>
    %c0_22 = arith.constant 0 : index
    %c0_23 = arith.constant 0 : index
    %37 = vector.load %arg13[%c0_22, %c0_23] : memref<256x32xf32, #tpu.memory_space<vmem>>, vector<256x32xf32>
    tpu.vector_store %arg13[%c0_22, %c0_23], %36 {strides = array<i32>} : memref<256x32xf32, #tpu.memory_space<vmem>>, vector<256x32xf32>,
    %c0_i32_24 = arith.constant 0 : i32
    %38 = arith.cmpi eq, %arg3, %c0_i32_24 : i32
    %39 = arith.extui %38 : i1 to i32
    %c0_i32_25 = arith.constant 0 : i32
    %40 = arith.cmpi ne, %39, %c0_i32_25 : i32
    scf.if %40 {
      %c0_29 = arith.constant 0 : index
      %c0_30 = arith.constant 0 : index
      %c0_31 = arith.constant 0 : index
      %48 = vector.load %arg5[%c0_29, %c0_30, %c0_31] : memref<1x3x32xf32, #tpu.memory_space<vmem>>, vector<1x3x32xf32>
      %49 = vector.shape_cast %48 : vector<1x3x32xf32> to vector<3x32xf32>
      %50 = vector.extract_strided_slice %49 {offsets = [2, 0], sizes = [1, 32], strides = [1, 1]} : vector<3x32xf32> to vector<1x32xf32>
      %c0_32 = arith.constant 0 : index
      %c0_33 = arith.constant 0 : index
      %51 = vector.load %arg11[%c0_32, %c0_33] : memref<256x32xf32, #tpu.memory_space<vmem>>, vector<256x32xf32>
      %c0_34 = arith.constant 0 : index
      %c0_35 = arith.constant 0 : index
      %52 = vector.load %arg13[%c0_34, %c0_35] : memref<256x32xf32, #tpu.memory_space<vmem>>, vector<256x32xf32>
      %53 = arith.addf %51, %52 : vector<256x32xf32>
      %54 = vector.broadcast %50 : vector<1x32xf32> to vector<256x32xf32>
      %55 = arith.addf %53, %54 : vector<256x32xf32>
      %c0_36 = arith.constant 0 : index
      %c0_37 = arith.constant 0 : index
      %56 = vector.load %arg11[%c0_36, %c0_37] : memref<256x32xf32, #tpu.memory_space<vmem>>, vector<256x32xf32>
      tpu.vector_store %arg11[%c0_36, %c0_37], %55 {strides = array<i32>} : memref<256x32xf32, #tpu.memory_space<vmem>>, vector<256x32xf32>,
    } else {
    }
    %c0_i32_26 = arith.constant 0 : i32
    %41 = arith.cmpi eq, %arg3, %c0_i32_26 : i32
    %c1_i32 = arith.constant 1 : i32
    %42 = arith.cmpi eq, %arg2, %c1_i32 : i32
    %43 = arith.andi %41, %42 : i1
    %c1_i32_27 = arith.constant 1 : i32
    %44 = arith.cmpi eq, %arg1, %c1_i32_27 : i32
    %45 = arith.andi %43, %44 : i1
    %46 = arith.extui %45 : i1 to i32
    %c0_i32_28 = arith.constant 0 : i32
    %47 = arith.cmpi ne, %46, %c0_i32_28 : i32
    scf.if %47 {
      %c0_29 = arith.constant 0 : index
      %c0_30 = arith.constant 0 : index
      %48 = vector.load %arg11[%c0_29, %c0_30] : memref<256x32xf32, #tpu.memory_space<vmem>>, vector<256x32xf32>
      %c0_31 = arith.constant 0 : index
      %c0_32 = arith.constant 0 : index
      %49 = vector.load %arg9[%c0_31, %c0_32] : memref<2x32xf32, #tpu.memory_space<vmem>>, vector<2x32xf32>
      %50 = vector.extract_strided_slice %49 {offsets = [0, 0], sizes = [1, 32], strides = [1, 1]} : vector<2x32xf32> to vector<1x32xf32>
      %51 = vector.extract_strided_slice %49 {offsets = [1, 0], sizes = [1, 32], strides = [1, 1]} : vector<2x32xf32> to vector<1x32xf32>
      %cst_33 = arith.constant dense<0.000000e+00> : vector<256xf32>
      %52 = vector.multi_reduction <add>, %48, %cst_33 [1] : vector<256x32xf32> to vector<256xf32>
      %53 = vector.shape_cast %52 : vector<256xf32> to vector<256x1xf32>
      %cst_34 = arith.constant 3.200000e+01 : f32
      %54 = vector.broadcast %cst_34 : f32 to vector<256x1xf32>
      %55 = arith.divf %53, %54 : vector<256x1xf32>
      %56 = vector.broadcast %55 : vector<256x1xf32> to vector<256x32xf32>
      %57 = arith.subf %48, %56 : vector<256x32xf32>
      %58 = arith.mulf %57, %57 : vector<256x32xf32>
      %cst_35 = arith.constant dense<0.000000e+00> : vector<256xf32>
      %59 = vector.multi_reduction <add>, %58, %cst_35 [1] : vector<256x32xf32> to vector<256xf32>
      %60 = vector.shape_cast %59 : vector<256xf32> to vector<256x1xf32>
      %cst_36 = arith.constant 3.200000e+01 : f32
      %61 = vector.broadcast %cst_36 : f32 to vector<256x1xf32>
      %62 = arith.divf %60, %61 : vector<256x1xf32>
      %cst_37 = arith.constant 9.99999974E-6 : f32
      %63 = vector.broadcast %cst_37 : f32 to vector<256x1xf32>
      %64 = arith.addf %62, %63 : vector<256x1xf32>
      %65 = math.rsqrt %64 : vector<256x1xf32>
      %66 = vector.broadcast %65 : vector<256x1xf32> to vector<256x32xf32>
      %67 = arith.mulf %57, %66 : vector<256x32xf32>
      %68 = vector.broadcast %50 : vector<1x32xf32> to vector<256x32xf32>
      %69 = arith.mulf %67, %68 : vector<256x32xf32>
      %70 = vector.broadcast %51 : vector<1x32xf32> to vector<256x32xf32>
      %71 = arith.addf %69, %70 : vector<256x32xf32>
      %c0_38 = arith.constant 0 : index
      %c0_39 = arith.constant 0 : index
      %72 = vector.load %arg10[%c0_38, %c0_39] : memref<256x32xf32, #tpu.memory_space<vmem>>, vector<256x32xf32>
      tpu.vector_store %arg10[%c0_38, %c0_39], %71 {strides = array<i32>} : memref<256x32xf32, #tpu.memory_space<vmem>>, vector<256x32xf32>,
    } else {
    }
    return
  }
  func.func @transform_0(%arg0: i32, %arg1: i32, %arg2: i32, %arg3: i32) -> (i32, i32) {
    %c0_i32 = arith.constant 0 : i32
    %c0_i32_0 = arith.constant 0 : i32
    return %arg0, %c0_i32 : i32, i32
  }
  func.func @transform_1(%arg0: i32, %arg1: i32, %arg2: i32, %arg3: i32) -> (i32, i32, i32) {
    %c2_i32 = arith.constant 2 : i32
    %0 = arith.muli %c2_i32, %arg1 : i32
    %1 = arith.addi %0, %arg2 : i32
    %c0_i32 = arith.constant 0 : i32
    %c0_i32_0 = arith.constant 0 : i32
    %c0_i32_1 = arith.constant 0 : i32
    return %1, %c0_i32, %c0_i32_0 : i32, i32, i32
  }
  func.func @transform_2(%arg0: i32, %arg1: i32, %arg2: i32, %arg3: i32) -> (i32, i32, i32) {
    %c2_i32 = arith.constant 2 : i32
    %0 = arith.muli %c2_i32, %arg1 : i32
    %1 = arith.addi %0, %arg2 : i32
    %c0_i32 = arith.constant 0 : i32
    %c0_i32_0 = arith.constant 0 : i32
    return %1, %c0_i32, %arg3 : i32, i32, i32
  }
  func.func @transform_3(%arg0: i32, %arg1: i32, %arg2: i32, %arg3: i32) -> (i32, i32, i32) {
    %c2_i32 = arith.constant 2 : i32
    %0 = arith.muli %c2_i32, %arg1 : i32
    %1 = arith.addi %0, %arg2 : i32
    %c0_i32 = arith.constant 0 : i32
    %c0_i32_0 = arith.constant 0 : i32
    return %1, %c0_i32, %arg3 : i32, i32, i32
  }
  func.func @transform_4(%arg0: i32, %arg1: i32, %arg2: i32, %arg3: i32) -> (i32, i32, i32) {
    %c2_i32 = arith.constant 2 : i32
    %0 = arith.muli %c2_i32, %arg1 : i32
    %1 = arith.addi %0, %arg2 : i32
    %c0_i32 = arith.constant 0 : i32
    %c0_i32_0 = arith.constant 0 : i32
    return %1, %arg3, %c0_i32 : i32, i32, i32
  }
  func.func @transform_5(%arg0: i32, %arg1: i32, %arg2: i32, %arg3: i32) -> (i32, i32) {
    %c0_i32 = arith.constant 0 : i32
    %c0_i32_0 = arith.constant 0 : i32
    %c0_i32_1 = arith.constant 0 : i32
    return %c0_i32, %c0_i32_0 : i32, i32
  }
  func.func @transform_6(%arg0: i32, %arg1: i32, %arg2: i32, %arg3: i32) -> (i32, i32) {
    %c0_i32 = arith.constant 0 : i32
    %c0_i32_0 = arith.constant 0 : i32
    return %arg0, %c0_i32 : i32, i32
  }
}

</mosaic_0001>

<bundles_post_ra>
// kernel: tpu_custom_call.1
= control target key start
LH: loop header
LB: loop body
LE: loop exit
PB: predicated region body
PF: predicated region fallthrough
CT: control target
= control target key end

     0   :  { %s3723_s21 = smov 0   ;;  %s3725_s22 = smov 0   ;;  %s5326_s0 = inlined_call_operand.vmem [shape: f32[512,32], index: 0, kind: input, shape index: {}]   ;;  %s5327_s1 = inlined_call_operand.vmem [shape: f32[4,3,32], index: 1, kind: input, shape index: {}]   ;;  %s5328_s2 = inlined_call_operand.vmem [shape: f32[4,1,64], index: 2, kind: input, shape index: {}]   ;;  %s5329_s3 = inlined_call_operand.vmem [shape: bf16[4,32,64], index: 3, kind: input, shape index: {}]   ;;  %s5330_s4 = inlined_call_operand.vmem [shape: bf16[4,64,32], index: 4, kind: input, shape index: {}]   ;;  %s5331_s5 = inlined_call_operand.vmem [shape: f32[2,32], index: 5, kind: input, shape index: {}]   ;;  %s5332_s6 = inlined_call_operand.vmem [shape: f32[512,32], index: 6, kind: output, shape index: {}]  }
   0x1   :  { %5333 = sst [smem:[#allocation8_spill]] %s5326_s0  ;;  %s3727_s23 = smov 0  }
   0x2   :  { %s3729_s24 = smov 0   ;;  %s3731_s25 = smov 0  }
   0x3   :  { %s3733_s26 = smov 0   ;;  %s3735_s27 = smov 0  }
   0x4 LB: > { %s34_s28 = sadd.s32 1, %s3673_s24  ;;  %s38_s29 = sadd.s32 1, %s3677_s25  ;;  %s3685_s27 = sphi %s3735_s27, %s16_s27   ;;  %s3681_s26 = sphi %s3733_s26, %s5347_s26   ;;  %s3677_s25 = sphi %s3731_s25, %s5346_s25   ;;  %s3673_s24 = sphi %s3729_s24, %s5345_s24   ;;  %s3669_s23 = sphi %s3727_s23, %s5344_s23   ;;  %s3665_s22 = sphi %s3725_s22, %s5343_s22   ;;  %s3661_s21 = sphi %s3723_s21, %s5342_s21  }
   0x5   : > { %p36_p0 = scmp.ge.s32.totalorder %s34_s28, 2  ;;  %p3106_p1 = scmp.ge.s32.totalorder %s3685_s27, 1 }
   0x6   : > { %p325_p2 = scmp.lt.s32.totalorder %s3685_s27, 9  ;;  %s42_s30 = sadd.s32 1, %s3681_s26 }
   0x7   : > { %s5349_s28 = smov (%p36_p0, %s34_s28), 0  ;;  %s5351_s29 = smov (!%p36_p0, %s38_s29), %s3677_s25 }
   0x8   : > { %5334 = sst [smem:[#allocation5_spill]] %s5349_s28  ;;  %p326_p3 = pnand %p3106_p1, %p325_p2 }
   0x9   : > { %p40_p4 = scmp.ge.s32.totalorder %s5351_s29, 2  ;;  %s3107_s7 = sshll.u32 (!%p326_p3), %s3669_s23, 5 }
   0xa   : > { %s3109_s8 = sshll.u32 (!%p326_p3), %s3665_s22, 1  ;;  %p391_p6 = scmp.lt.s32.totalorder (!%p326_p3), %s3107_s7, 63 }
   0xb   : > { %s5353_s29 = smov (%p40_p4, %s5351_s29), 0  ;;  %s5355_s30 = smov (!%p40_p4, %s42_s30), %s3681_s26 }
   0xc   : > { %5335 = sst [smem:[#allocation6_spill]] %s5353_s29  ;;  %p44_p5 = scmp.ge.s32.totalorder %s5355_s30, 2 }
   0xd   : > { %329 = sbr.rel (%p326_p3) target bundleno = 1269 (0x4f5), region = 44  ;;  %s397_s9 = sadd.s32 (!%p326_p3), %s3661_s21, %s3109_s8 }
   0xe   : > { %s5357_s30 = smov (%p44_p5, %s5355_s30), 0  ;;  %p398_p7 = scmp.lt.s32.totalorder (!%p326_p3), %s397_s9, 3 }
   0xf   : > { %5336 = sst [smem:[#allocation7_spill]] %s5357_s30  ;;  %p447_p8 = scmp.eq.s32.totalorder (!%p326_p3), %s3665_s22, 0 }
  0x10   : > { %p448_p9 = scmp.eq.s32.totalorder (!%p326_p3), %s3661_s21, 0  ;;  %s5337_s0 = sld [smem:[#allocation8_spill]] (!%p326_p3) }
  0x12   : > { %s5359_s7 = smov (!%p391_p6, %s3107_s7), 63  ;;  %s5361_s9 = smov (!%p398_p7, %s397_s9), 3 }
  0x13   : > { %s3108_s10 = sshll.u32 %s5359_s7, 3  ;;  %s3110_s14 = sshll.u32 %s5361_s9, 2 }
  0x14   : > { %s3784_s17 = scalar_lea.vmem %s5327_s1, %s3110_s14  ;;  %s411_s20 = scalar_lea.vmem %s5328_s2, %s5361_s9 }
  0x15   : > { %s3211_s23 = sshll.u32 %s5361_s9, 4  ;;  %s3212_s8 = sshll.u32 %s5361_s9, 5 }
  0x16   : > { %s3778_s13 = scalar_lea.vmem %s5337_s0, %s3108_s10  ;;  %s3795_s29 = scalar_lea.vmem %s5329_s3, %s3211_s23 }
  0x17   : > { %s3800_s0 = scalar_lea.vmem %s5330_s4, %s3212_s8  ;;  %s3805_s14 = scalar_lea.vmem %s5332_s6, %s3108_s10 }
  0x18   : > { %p449_p10 = pnand %p448_p9, %p447_p8 }
  0x1a   : > { %455 = sbr.rel (%p449_p10) target bundleno = 48 (0x30), region = 48 }
  0x1f   : > { %v456_v0 = vld [vmem:[%s3778_s13] sm:$0xff]  ;;  %vm488_vm0 = vcmask 261120   ;;  %v457_v1 = vld [vmem:[%s3778_s13 + $0x8] sm:$0xff]  ;;  %v458_v2 = vld [vmem:[%s3778_s13 + $0x10] sm:$0xff] }
  0x20   : > { %489 = vst.msk [vmem:[#allocation2] sm:$0xff] %vm488_vm0, %v456_v0  ;;  %490 = vst.msk [vmem:[#allocation2 + $0x8] sm:$0xff] %vm488_vm0, %v457_v1  ;;  %v459_v3 = vld [vmem:[%s3778_s13 + $0x18] sm:$0xff]  ;;  %v460_v4 = vld [vmem:[%s3778_s13 + $0x20] sm:$0xff] }
  0x21   : > { %491 = vst.msk [vmem:[#allocation2 + $0x10] sm:$0xff] %vm488_vm0, %v458_v2  ;;  %v461_v5 = vld [vmem:[%s3778_s13 + $0x28] sm:$0xff]  ;;  %492 = vst.msk [vmem:[#allocation2 + $0x18] sm:$0xff] %vm488_vm0, %v459_v3  ;;  %v462_v6 = vld [vmem:[%s3778_s13 + $0x30] sm:$0xff] }
  0x22   : > { %493 = vst.msk [vmem:[#allocation2 + $0x20] sm:$0xff] %vm488_vm0, %v460_v4  ;;  %494 = vst.msk [vmem:[#allocation2 + $0x28] sm:$0xff] %vm488_vm0, %v461_v5  ;;  %v463_v7 = vld [vmem:[%s3778_s13 + $0x38] sm:$0xff]  ;;  %v464_v8 = vld [vmem:[%s3778_s13 + $0x40] sm:$0xff] }
  0x23   : > { %495 = vst.msk [vmem:[#allocation2 + $0x30] sm:$0xff] %vm488_vm0, %v462_v6  ;;  %496 = vst.msk [vmem:[#allocation2 + $0x38] sm:$0xff] %vm488_vm0, %v463_v7  ;;  %v465_v9 = vld [vmem:[%s3778_s13 + $0x48] sm:$0xff]  ;;  %v466_v10 = vld [vmem:[%s3778_s13 + $0x50] sm:$0xff] }
  0x24   : > { %497 = vst.msk [vmem:[#allocation2 + $0x40] sm:$0xff] %vm488_vm0, %v464_v8  ;;  %v467_v11 = vld [vmem:[%s3778_s13 + $0x58] sm:$0xff]  ;;  %498 = vst.msk [vmem:[#allocation2 + $0x48] sm:$0xff] %vm488_vm0, %v465_v9  ;;  %v468_v12 = vld [vmem:[%s3778_s13 + $0x60] sm:$0xff] }
  0x25   : > { %499 = vst.msk [vmem:[#allocation2 + $0x50] sm:$0xff] %vm488_vm0, %v466_v10  ;;  %500 = vst.msk [vmem:[#allocation2 + $0x58] sm:$0xff] %vm488_vm0, %v467_v11  ;;  %v469_v13 = vld [vmem:[%s3778_s13 + $0x68] sm:$0xff]  ;;  %v470_v14 = vld [vmem:[%s3778_s13 + $0x70] sm:$0xff] }
  0x26   : > { %501 = vst.msk [vmem:[#allocation2 + $0x60] sm:$0xff] %vm488_vm0, %v468_v12  ;;  %502 = vst.msk [vmem:[#allocation2 + $0x68] sm:$0xff] %vm488_vm0, %v469_v13  ;;  %v471_v15 = vld [vmem:[%s3778_s13 + $0x78] sm:$0xff]  ;;  %v472_v16 = vld [vmem:[%s3778_s13 + $0x80] sm:$0xff] }
  0x27   : > { %503 = vst.msk [vmem:[#allocation2 + $0x70] sm:$0xff] %vm488_vm0, %v470_v14  ;;  %v473_v17 = vld [vmem:[%s3778_s13 + $0x88] sm:$0xff]  ;;  %504 = vst.msk [vmem:[#allocation2 + $0x78] sm:$0xff] %vm488_vm0, %v471_v15  ;;  %v474_v18 = vld [vmem:[%s3778_s13 + $0x90] sm:$0xff] }
  0x28   : > { %505 = vst.msk [vmem:[#allocation2 + $0x80] sm:$0xff] %vm488_vm0, %v472_v16  ;;  %506 = vst.msk [vmem:[#allocation2 + $0x88] sm:$0xff] %vm488_vm0, %v473_v17  ;;  %v475_v19 = vld [vmem:[%s3778_s13 + $0x98] sm:$0xff]  ;;  %v476_v20 = vld [vmem:[%s3778_s13 + $0xa0] sm:$0xff] }
  0x29   : > { %507 = vst.msk [vmem:[#allocation2 + $0x90] sm:$0xff] %vm488_vm0, %v474_v18  ;;  %508 = vst.msk [vmem:[#allocation2 + $0x98] sm:$0xff] %vm488_vm0, %v475_v19  ;;  %v477_v21 = vld [vmem:[%s3778_s13 + $0xa8] sm:$0xff]  ;;  %v478_v22 = vld [vmem:[%s3778_s13 + $0xb0] sm:$0xff] }
  0x2a   : > { %509 = vst.msk [vmem:[#allocation2 + $0xa0] sm:$0xff] %vm488_vm0, %v476_v20  ;;  %v479_v23 = vld [vmem:[%s3778_s13 + $0xb8] sm:$0xff]  ;;  %510 = vst.msk [vmem:[#allocation2 + $0xa8] sm:$0xff] %vm488_vm0, %v477_v21  ;;  %v480_v24 = vld [vmem:[%s3778_s13 + $0xc0] sm:$0xff] }
  0x2b   : > { %511 = vst.msk [vmem:[#allocation2 + $0xb0] sm:$0xff] %vm488_vm0, %v478_v22  ;;  %512 = vst.msk [vmem:[#allocation2 + $0xb8] sm:$0xff] %vm488_vm0, %v479_v23  ;;  %v481_v25 = vld [vmem:[%s3778_s13 + $0xc8] sm:$0xff]  ;;  %v482_v26 = vld [vmem:[%s3778_s13 + $0xd0] sm:$0xff] }
  0x2c   : > { %513 = vst.msk [vmem:[#allocation2 + $0xc0] sm:$0xff] %vm488_vm0, %v480_v24  ;;  %514 = vst.msk [vmem:[#allocation2 + $0xc8] sm:$0xff] %vm488_vm0, %v481_v25  ;;  %v483_v27 = vld [vmem:[%s3778_s13 + $0xd8] sm:$0xff]  ;;  %v484_v28 = vld [vmem:[%s3778_s13 + $0xe0] sm:$0xff] }
  0x2d   : > { %515 = vst.msk [vmem:[#allocation2 + $0xd0] sm:$0xff] %vm488_vm0, %v482_v26  ;;  %v485_v29 = vld [vmem:[%s3778_s13 + $0xe8] sm:$0xff]  ;;  %516 = vst.msk [vmem:[#allocation2 + $0xd8] sm:$0xff] %vm488_vm0, %v483_v27  ;;  %v486_v30 = vld [vmem:[%s3778_s13 + $0xf0] sm:$0xff] }
  0x2e   : > { %517 = vst.msk [vmem:[#allocation2 + $0xe0] sm:$0xff] %vm488_vm0, %v484_v28  ;;  %518 = vst.msk [vmem:[#allocation2 + $0xe8] sm:$0xff] %vm488_vm0, %v485_v29  ;;  %v487_v31 = vld [vmem:[%s3778_s13 + $0xf8] sm:$0xff] }
  0x2f   : > { %519 = vst.msk [vmem:[#allocation2 + $0xf0] sm:$0xff] %vm488_vm0, %v486_v30  ;;  %520 = vst.msk [vmem:[#allocation2 + $0xf8] sm:$0xff] %vm488_vm0, %v487_v31 }
  0x30 PF: > { %v3873_v32 = vld [vmem:[#allocation2] sm:$0xff]  ;;  %vm557_vm1 = vcmask 261120   ;;  %v3875_v33 = vld [vmem:[#allocation2 + $0x10] sm:$0xff]  ;;  %v3877_v34 = vld [vmem:[#allocation2 + $0x8] sm:$0xff]  ;;  %vm1175_vm2 = vcmask 257024   ;;  %vm1953_vm3 = vcmask 523264  }
  0x31   : > { %v558_v35 = vsel %vm557_vm1, %v3873_v32, 0.0  ;;  %v564_v36 = vsel %vm557_vm1, %v3875_v33, 0.0  ;;  %v3883_v37 = vld [vmem:[#allocation2 + $0x18] sm:$0xff]  ;;  %v561_v38 = vsel %vm557_vm1, %v3877_v34, 0.0  ;;  %v3889_v40 = vld [vmem:[#allocation2 + $0x20] sm:$0xff]  ;;  %v3891_v41 = vld [vmem:[#allocation2 + $0x28] sm:$0xff] }
  0x32   : > { %559 = vadd.xlane.f32.xlu0 %v558_v35  ;;  %565 = vadd.xlane.f32.xlu1 %v564_v36  ;;  %v567_v39 = vsel %vm557_vm1, %v3883_v37, 0.0  ;;  %v570_v42 = vsel %vm557_vm1, %v3889_v40, 0.0  ;;  %v573_v43 = vsel %vm557_vm1, %v3891_v41, 0.0  ;;  %v3897_v44 = vld [vmem:[#allocation2 + $0x30] sm:$0xff]  ;;  %v3899_v45 = vld [vmem:[#allocation2 + $0x38] sm:$0xff]  ;;  %v3903_v47 = vld [vmem:[#allocation2 + $0x40] sm:$0xff] }
  0x33   : > { %v576_v46 = vsel %vm557_vm1, %v3897_v44, 0.0  ;;  %v579_v48 = vsel %vm557_vm1, %v3899_v45, 0.0  ;;  %v3907_v49 = vld [vmem:[#allocation2 + $0x48] sm:$0xff]  ;;  %v582_v50 = vsel %vm557_vm1, %v3903_v47, 0.0  ;;  %v3913_v52 = vld [vmem:[#allocation2 + $0x50] sm:$0xff]  ;;  %v3915_v53 = vld [vmem:[#allocation2 + $0x58] sm:$0xff] }
  0x34   : > { %v585_v51 = vsel %vm557_vm1, %v3907_v49, 0.0  ;;  %v588_v54 = vsel %vm557_vm1, %v3913_v52, 0.0  ;;  %v591_v55 = vsel %vm557_vm1, %v3915_v53, 0.0  ;;  %v3921_v56 = vld [vmem:[#allocation2 + $0x60] sm:$0xff]  ;;  %v3923_v57 = vld [vmem:[#allocation2 + $0x68] sm:$0xff]  ;;  %v3929_v60 = vld [vmem:[#allocation2 + $0x70] sm:$0xff] }
  0x35   : > { %v594_v58 = vsel %vm557_vm1, %v3921_v56, 0.0  ;;  %v597_v59 = vsel %vm557_vm1, %v3923_v57, 0.0  ;;  %v3931_v61 = vld [vmem:[#allocation2 + $0x78] sm:$0xff]  ;;  %v600_v62 = vsel %vm557_vm1, %v3929_v60, 0.0  ;;  %v3937_v0 = vld [vmem:[#allocation2 + $0x80] sm:$0xff]  ;;  %v3939_v1 = vld [vmem:[#allocation2 + $0x88] sm:$0xff] }
  0x36   : > { %562 = vadd.xlane.f32.xlu0 %v561_v38  ;;  %568 = vadd.xlane.f32.xlu1 %v567_v39  ;;  %v603_v63 = vsel %vm557_vm1, %v3931_v61, 0.0  ;;  %v606_v2 = vsel %vm557_vm1, %v3937_v0, 0.0  ;;  %v609_v3 = vsel %vm557_vm1, %v3939_v1, 0.0  ;;  %v3945_v4 = vld [vmem:[#allocation2 + $0x90] sm:$0xff]  ;;  %v3947_v5 = vld [vmem:[#allocation2 + $0x98] sm:$0xff]  ;;  %v3953_v8 = vld [vmem:[#allocation2 + $0xa0] sm:$0xff] }
  0x37   : > { %v612_v6 = vsel %vm557_vm1, %v3945_v4, 0.0  ;;  %v615_v7 = vsel %vm557_vm1, %v3947_v5, 0.0  ;;  %v3955_v9 = vld [vmem:[#allocation2 + $0xa8] sm:$0xff]  ;;  %v618_v10 = vsel %vm557_vm1, %v3953_v8, 0.0  ;;  %v3961_v12 = vld [vmem:[#allocation2 + $0xb0] sm:$0xff]  ;;  %v3963_v13 = vld [vmem:[#allocation2 + $0xb8] sm:$0xff] }
  0x38   : > { %v621_v11 = vsel %vm557_vm1, %v3955_v9, 0.0  ;;  %v624_v14 = vsel %vm557_vm1, %v3961_v12, 0.0  ;;  %v627_v15 = vsel %vm557_vm1, %v3963_v13, 0.0  ;;  %v3969_v16 = vld [vmem:[#allocation2 + $0xc0] sm:$0xff]  ;;  %v3971_v17 = vld [vmem:[#allocation2 + $0xc8] sm:$0xff]  ;;  %v3977_v20 = vld [vmem:[#allocation2 + $0xd0] sm:$0xff] }
  0x39   : > { %v630_v18 = vsel %vm557_vm1, %v3969_v16, 0.0  ;;  %v633_v19 = vsel %vm557_vm1, %v3971_v17, 0.0  ;;  %v3979_v21 = vld [vmem:[#allocation2 + $0xd8] sm:$0xff]  ;;  %v636_v22 = vsel %vm557_vm1, %v3977_v20, 0.0  ;;  %v3985_v24 = vld [vmem:[#allocation2 + $0xe0] sm:$0xff]  ;;  %v3987_v25 = vld [vmem:[#allocation2 + $0xe8] sm:$0xff] }
  0x3a   : > { %571 = vadd.xlane.f32.xlu0 %v570_v42  ;;  %574 = vadd.xlane.f32.xlu1 %v573_v43  ;;  %v639_v23 = vsel %vm557_vm1, %v3979_v21, 0.0  ;;  %v642_v26 = vsel %vm557_vm1, %v3985_v24, 0.0  ;;  %v645_v27 = vsel %vm557_vm1, %v3987_v25, 0.0  ;;  %v3993_v28 = vld [vmem:[#allocation2 + $0xf0] sm:$0xff]  ;;  %v3995_v29 = vld [vmem:[#allocation2 + $0xf8] sm:$0xff]  ;;  %p2395_p11 = scmp.eq.s32.totalorder %s3661_s21, 1 }
  0x3b   : > { %v648_v30 = vsel %vm557_vm1, %v3993_v28, 0.0  ;;  %v651_v31 = vsel %vm557_vm1, %v3995_v29, 0.0  ;;  %p2398_p12 = scmp.eq.s32.totalorder %s3665_s22, 1 }
  0x3d   : > { %p4708_p13 = pnand %p2398_p12, %p2395_p11 }
  0x3e   : > { %577 = vadd.xlane.f32.xlu0 %v576_v46  ;;  %580 = vadd.xlane.f32.xlu1 %v579_v48 }
  0x42   : > { %583 = vadd.xlane.f32.xlu0 %v582_v50  ;;  %586 = vadd.xlane.f32.xlu1 %v585_v51 }
  0x46   : > { %589 = vadd.xlane.f32.xlu0 %v588_v54  ;;  %592 = vadd.xlane.f32.xlu1 %v591_v55 }
  0x4a   : > { %595 = vadd.xlane.f32.xlu0 %v594_v58  ;;  %598 = vadd.xlane.f32.xlu1 %v597_v59 }
  0x4e   : > { %601 = vadd.xlane.f32.xlu0 %v600_v62  ;;  %604 = vadd.xlane.f32.xlu1 %v603_v63 }
  0x52   : > { %607 = vadd.xlane.f32.xlu0 %v606_v2  ;;  %610 = vadd.xlane.f32.xlu1 %v609_v3 }
  0x56   : > { %613 = vadd.xlane.f32.xlu0 %v612_v6  ;;  %616 = vadd.xlane.f32.xlu1 %v615_v7 }
  0x5a   : > { %619 = vadd.xlane.f32.xlu0 %v618_v10  ;;  %622 = vadd.xlane.f32.xlu1 %v621_v11 }
  0x5e   : > { %625 = vadd.xlane.f32.xlu0 %v624_v14  ;;  %628 = vadd.xlane.f32.xlu1 %v627_v15 }
  0x62   : > { %631 = vadd.xlane.f32.xlu0 %v630_v18  ;;  %634 = vadd.xlane.f32.xlu1 %v633_v19 }
  0x66   : > { %637 = vadd.xlane.f32.xlu0 %v636_v22  ;;  %640 = vadd.xlane.f32.xlu1 %v639_v23 }
  0x6a   : > { %643 = vadd.xlane.f32.xlu0 %v642_v26  ;;  %646 = vadd.xlane.f32.xlu1 %v645_v27 }
  0x6e   : > { %649 = vadd.xlane.f32.xlu0 %v648_v30  ;;  %652 = vadd.xlane.f32.xlu1 %v651_v31 }
  0xbb   : > { %v560_v35 = vpop.xlane.xlu0 %559  ;;  %v566_v36 = vpop.xlane.xlu1 %565 }
  0xbc   : > { %v655_v38 = vmul.f32 0.03125, %v560_v35  ;;  %v657_v39 = vmul.f32 0.03125, %v566_v36 }
  0xbe   : > { %v4002_v42 = vsub.f32 %v3873_v32, %v655_v38  ;;  %v4005_v43 = vsub.f32 %v3875_v33, %v657_v39 }
  0xbf   : > { %v563_v46 = vpop.xlane.xlu0 %562  ;;  %v569_v48 = vpop.xlane.xlu1 %568 }
  0xc0   : > { %v656_v50 = vmul.f32 0.03125, %v563_v46  ;;  %v658_v51 = vmul.f32 0.03125, %v569_v48  ;;  %v719_v54 = vmul.f32 %v4002_v42, %v4002_v42  ;;  %v721_v55 = vmul.f32 %v4005_v43, %v4005_v43 }
  0xc2   : > { %v4012_v58 = vsub.f32 %v3877_v34, %v656_v50  ;;  %v4015_v59 = vsub.f32 %v3883_v37, %v658_v51  ;;  %v751_v32 = vsel %vm557_vm1, %v719_v54, 0.0  ;;  %v757_v63 = vsel %vm557_vm1, %v721_v55, 0.0 }
  0xc3   : > { %752 = vadd.xlane.f32.xlu0 %v751_v32  ;;  %v572_v33 = vpop.xlane.xlu0 %571  ;;  %v575_v62 = vpop.xlane.xlu1 %574 }
  0xc4   : > { %v659_v2 = vmul.f32 0.03125, %v572_v33  ;;  %v660_v3 = vmul.f32 0.03125, %v575_v62  ;;  %v720_v6 = vmul.f32 %v4012_v58, %v4012_v58  ;;  %v722_v7 = vmul.f32 %v4015_v59, %v4015_v59 }
  0xc6   : > { %v4024_v34 = vsub.f32 %v3889_v40, %v659_v2  ;;  %v4027_v37 = vsub.f32 %v3891_v41, %v660_v3  ;;  %v754_v10 = vsel %vm557_vm1, %v720_v6, 0.0  ;;  %v760_v15 = vsel %vm557_vm1, %v722_v7, 0.0 }
  0xc7   : > { %758 = vadd.xlane.f32.xlu0 %v757_v63  ;;  %755 = vadd.xlane.f32.xlu1 %v754_v10  ;;  %v578_v11 = vpop.xlane.xlu0 %577  ;;  %v581_v14 = vpop.xlane.xlu1 %580 }
  0xc8   : > { %v661_v18 = vmul.f32 0.03125, %v578_v11  ;;  %v662_v19 = vmul.f32 0.03125, %v581_v14  ;;  %v723_v22 = vmul.f32 %v4024_v34, %v4024_v34  ;;  %v724_v40 = vmul.f32 %v4027_v37, %v4027_v37 }
  0xca   : > { %v4036_v23 = vsub.f32 %v3897_v44, %v661_v18  ;;  %v4039_v41 = vsub.f32 %v3899_v45, %v662_v19  ;;  %v763_v26 = vsel %vm557_vm1, %v723_v22, 0.0  ;;  %v766_v31 = vsel %vm557_vm1, %v724_v40, 0.0 }
  0xcb   : > { %761 = vadd.xlane.f32.xlu1 %v760_v15  ;;  %764 = vadd.xlane.f32.xlu0 %v763_v26  ;;  %v584_v27 = vpop.xlane.xlu0 %583  ;;  %v587_v30 = vpop.xlane.xlu1 %586 }
  0xcc   : > { %v663_v35 = vmul.f32 0.03125, %v584_v27  ;;  %v664_v36 = vmul.f32 0.03125, %v587_v30  ;;  %v725_v38 = vmul.f32 %v4036_v23, %v4036_v23  ;;  %v726_v44 = vmul.f32 %v4039_v41, %v4039_v41 }
  0xce   : > { %v4048_v39 = vsub.f32 %v3903_v47, %v663_v35  ;;  %v4051_v45 = vsub.f32 %v3907_v49, %v664_v36  ;;  %v769_v46 = vsel %vm557_vm1, %v725_v38, 0.0  ;;  %v772_v51 = vsel %vm557_vm1, %v726_v44, 0.0 }
  0xcf   : > { %767 = vadd.xlane.f32.xlu1 %v766_v31  ;;  %770 = vadd.xlane.f32.xlu0 %v769_v46  ;;  %v590_v48 = vpop.xlane.xlu0 %589  ;;  %v593_v50 = vpop.xlane.xlu1 %592 }
  0xd0   : > { %v665_v54 = vmul.f32 0.03125, %v590_v48  ;;  %v666_v55 = vmul.f32 0.03125, %v593_v50  ;;  %v727_v32 = vmul.f32 %v4048_v39, %v4048_v39  ;;  %v728_v47 = vmul.f32 %v4051_v45, %v4051_v45 }
  0xd2   : > { %v4060_v33 = vsub.f32 %v3913_v52, %v665_v54  ;;  %v4063_v49 = vsub.f32 %v3915_v53, %v666_v55  ;;  %v775_v62 = vsel %vm557_vm1, %v727_v32, 0.0  ;;  %v778_v3 = vsel %vm557_vm1, %v728_v47, 0.0 }
  0xd3   : > { %773 = vadd.xlane.f32.xlu1 %v772_v51  ;;  %776 = vadd.xlane.f32.xlu0 %v775_v62  ;;  %v596_v63 = vpop.xlane.xlu0 %595  ;;  %v599_v2 = vpop.xlane.xlu1 %598 }
  0xd4   : > { %v667_v6 = vmul.f32 0.03125, %v596_v63  ;;  %v668_v7 = vmul.f32 0.03125, %v599_v2  ;;  %v729_v10 = vmul.f32 %v4060_v33, %v4060_v33  ;;  %v730_v52 = vmul.f32 %v4063_v49, %v4063_v49 }
  0xd6   : > { %v4072_v11 = vsub.f32 %v3921_v56, %v667_v6  ;;  %v4075_v53 = vsub.f32 %v3923_v57, %v668_v7  ;;  %v781_v14 = vsel %vm557_vm1, %v729_v10, 0.0  ;;  %v784_v19 = vsel %vm557_vm1, %v730_v52, 0.0 }
  0xd7   : > { %779 = vadd.xlane.f32.xlu1 %v778_v3  ;;  %782 = vadd.xlane.f32.xlu0 %v781_v14  ;;  %v602_v15 = vpop.xlane.xlu0 %601  ;;  %v605_v18 = vpop.xlane.xlu1 %604 }
  0xd8   : > { %v669_v22 = vmul.f32 0.03125, %v602_v15  ;;  %v670_v40 = vmul.f32 0.03125, %v605_v18  ;;  %v731_v26 = vmul.f32 %v4072_v11, %v4072_v11  ;;  %v732_v56 = vmul.f32 %v4075_v53, %v4075_v53 }
  0xda   : > { %v4084_v27 = vsub.f32 %v3929_v60, %v669_v22  ;;  %v4087_v57 = vsub.f32 %v3931_v61, %v670_v40  ;;  %v787_v30 = vsel %vm557_vm1, %v731_v26, 0.0  ;;  %v790_v36 = vsel %vm557_vm1, %v732_v56, 0.0 }
  0xdb   : > { %785 = vadd.xlane.f32.xlu1 %v784_v19  ;;  %788 = vadd.xlane.f32.xlu0 %v787_v30  ;;  %v608_v31 = vpop.xlane.xlu0 %607  ;;  %v611_v35 = vpop.xlane.xlu1 %610 }
  0xdc   : > { %v671_v38 = vmul.f32 0.03125, %v608_v31  ;;  %v672_v44 = vmul.f32 0.03125, %v611_v35  ;;  %v733_v46 = vmul.f32 %v4084_v27, %v4084_v27  ;;  %v734_v60 = vmul.f32 %v4087_v57, %v4087_v57 }
  0xde   : > { %v4096_v48 = vsub.f32 %v3937_v0, %v671_v38  ;;  %v4099_v61 = vsub.f32 %v3939_v1, %v672_v44  ;;  %v793_v50 = vsel %vm557_vm1, %v733_v46, 0.0  ;;  %v796_v55 = vsel %vm557_vm1, %v734_v60, 0.0 }
  0xdf   : > { %791 = vadd.xlane.f32.xlu1 %v790_v36  ;;  %794 = vadd.xlane.f32.xlu0 %v793_v50  ;;  %v614_v51 = vpop.xlane.xlu0 %613  ;;  %v617_v54 = vpop.xlane.xlu1 %616 }
  0xe0   : > { %v673_v32 = vmul.f32 0.03125, %v614_v51  ;;  %v674_v47 = vmul.f32 0.03125, %v617_v54  ;;  %v735_v62 = vmul.f32 %v4096_v48, %v4096_v48  ;;  %v736_v0 = vmul.f32 %v4099_v61, %v4099_v61 }
  0xe2   : > { %v4108_v63 = vsub.f32 %v3945_v4, %v673_v32  ;;  %v4111_v1 = vsub.f32 %v3947_v5, %v674_v47  ;;  %v799_v2 = vsel %vm557_vm1, %v735_v62, 0.0  ;;  %v802_v7 = vsel %vm557_vm1, %v736_v0, 0.0  ;;  %v3417_v62 = vld [vmem:[%s3795_s29 + $0x8] sm:$0xff]  }
  0xe3   : > { %797 = vadd.xlane.f32.xlu1 %v796_v55  ;;  %800 = vadd.xlane.f32.xlu0 %v799_v2  ;;  %v620_v3 = vpop.xlane.xlu0 %619  ;;  %v623_v6 = vpop.xlane.xlu1 %622 }
  0xe4   : > { %v675_v10 = vmul.f32 0.03125, %v620_v3  ;;  %v676_v52 = vmul.f32 0.03125, %v623_v6  ;;  %v737_v14 = vmul.f32 %v4108_v63, %v4108_v63  ;;  %v738_v4 = vmul.f32 %v4111_v1, %v4111_v1  ;;  %3284 = vmatprep.subr.bf16.mxu0 %v3417_v62 }
  0xe5   : > { %3285 = vmatpush3.bf16.msra.mxu0 %v3417_v62 }
  0xe6   : > { %v4120_v15 = vsub.f32 %v3953_v8, %v675_v10  ;;  %v4123_v5 = vsub.f32 %v3955_v9, %v676_v52  ;;  %v805_v18 = vsel %vm557_vm1, %v737_v14, 0.0  ;;  %v808_v40 = vsel %vm557_vm1, %v738_v4, 0.0  ;;  %v3418_v4 = vld [vmem:[%s3795_s29] sm:$0xff]  }
  0xe7   : > { %803 = vadd.xlane.f32.xlu1 %v802_v7  ;;  %806 = vadd.xlane.f32.xlu0 %v805_v18  ;;  %v626_v19 = vpop.xlane.xlu0 %625  ;;  %v629_v22 = vpop.xlane.xlu1 %628 }
  0xe8   : > { %v677_v26 = vmul.f32 0.03125, %v626_v19  ;;  %v678_v56 = vmul.f32 0.03125, %v629_v22  ;;  %v739_v30 = vmul.f32 %v4120_v15, %v4120_v15  ;;  %v740_v8 = vmul.f32 %v4123_v5, %v4123_v5  ;;  %3286 = vmatprep.subr.bf16.mxu0 %v3418_v4 }
  0xe9   : > { %3287 = vmatpush3.bf16.msra.mxu0 %v3418_v4 }
  0xea   : > { %v4132_v31 = vsub.f32 %v3961_v12, %v677_v26  ;;  %v4135_v9 = vsub.f32 %v3963_v13, %v678_v56  ;;  %v811_v35 = vsel %vm557_vm1, %v739_v30, 0.0  ;;  %v814_v44 = vsel %vm557_vm1, %v740_v8, 0.0 }
  0xeb   : > { %809 = vadd.xlane.f32.xlu1 %v808_v40  ;;  %812 = vadd.xlane.f32.xlu0 %v811_v35  ;;  %v632_v36 = vpop.xlane.xlu0 %631  ;;  %v635_v38 = vpop.xlane.xlu1 %634 }
  0xec   : > { %v679_v46 = vmul.f32 0.03125, %v632_v36  ;;  %v680_v60 = vmul.f32 0.03125, %v635_v38  ;;  %v741_v50 = vmul.f32 %v4132_v31, %v4132_v31  ;;  %v742_v12 = vmul.f32 %v4135_v9, %v4135_v9 }
  0xee   : > { %v4144_v13 = vsub.f32 %v3969_v16, %v679_v46  ;;  %v4147_v51 = vsub.f32 %v3971_v17, %v680_v60  ;;  %v817_v54 = vsel %vm557_vm1, %v741_v50, 0.0  ;;  %v820_v47 = vsel %vm557_vm1, %v742_v12, 0.0 }
  0xef   : > { %815 = vadd.xlane.f32.xlu1 %v814_v44  ;;  %818 = vadd.xlane.f32.xlu0 %v817_v54  ;;  %v638_v55 = vpop.xlane.xlu0 %637  ;;  %v641_v32 = vpop.xlane.xlu1 %640 }
  0xf0   : > { %v681_v0 = vmul.f32 0.03125, %v638_v55  ;;  %v682_v2 = vmul.f32 0.03125, %v641_v32  ;;  %v743_v3 = vmul.f32 %v4144_v13, %v4144_v13  ;;  %v744_v16 = vmul.f32 %v4147_v51, %v4147_v51 }
  0xf2   : > { %v4157_v17 = vsub.f32 %v3977_v20, %v681_v0  ;;  %v4160_v6 = vsub.f32 %v3979_v21, %v682_v2  ;;  %v823_v7 = vsel %vm557_vm1, %v743_v3, 0.0  ;;  %v826_v14 = vsel %vm557_vm1, %v744_v16, 0.0 }
  0xf3   : > { %821 = vadd.xlane.f32.xlu1 %v820_v47  ;;  %824 = vadd.xlane.f32.xlu0 %v823_v7  ;;  %v644_v10 = vpop.xlane.xlu0 %643  ;;  %v647_v52 = vpop.xlane.xlu1 %646  ;;  %v975_v0 = vlaneseq }
  0xf4   : > { %v683_v18 = vmul.f32 0.03125, %v644_v10  ;;  %v684_v19 = vmul.f32 0.03125, %v647_v52  ;;  %v745_v22 = vmul.f32 %v4157_v17, %v4157_v17  ;;  %v746_v20 = vmul.f32 %v4160_v6, %v4160_v6 }
  0xf6   : > { %v4170_v21 = vsub.f32 %v3985_v24, %v683_v18  ;;  %v4173_v40 = vsub.f32 %v3987_v25, %v684_v19  ;;  %v829_v26 = vsel %vm557_vm1, %v745_v22, 0.0  ;;  %v832_v8 = vsel %vm557_vm1, %v746_v20, 0.0 }
  0xf7   : > { %827 = vadd.xlane.f32.xlu1 %v826_v14  ;;  %830 = vadd.xlane.f32.xlu0 %v829_v26  ;;  %v650_v56 = vpop.xlane.xlu0 %649  ;;  %v653_v30 = vpop.xlane.xlu1 %652  ;;  %v4195_v14 = vshrl.u32 %v975_v0, 7 }
  0xf8   : > { %v685_v35 = vmul.f32 0.03125, %v650_v56  ;;  %v686_v36 = vmul.f32 0.03125, %v653_v30  ;;  %v747_v38 = vmul.f32 %v4170_v21, %v4170_v21  ;;  %v748_v24 = vmul.f32 %v4173_v40, %v4173_v40 }
  0xf9   : > { %v977_v56 = vsub.s32 0, %v4195_v14 }
  0xfa   : > { %v4182_v25 = vsub.f32 %v3993_v28, %v685_v35  ;;  %v4185_v44 = vsub.f32 %v3995_v29, %v686_v36  ;;  %v835_v46 = vsel %vm557_vm1, %v747_v38, 0.0  ;;  %v838_v60 = vsel %vm557_vm1, %v748_v24, 0.0  ;;  %v524_v35 = vld [vmem:[%s3784_s17] sm:$0x7] }
  0xfb   : > { %833 = vadd.xlane.f32.xlu1 %v832_v8  ;;  %836 = vadd.xlane.f32.xlu0 %v835_v46  ;;  %v1013_v36 = vsub.s32 1, %v4195_v14 }
  0xfc   : > { %v749_v50 = vmul.f32 %v4182_v25, %v4182_v25  ;;  %v750_v12 = vmul.f32 %v4185_v44, %v4185_v44 }
  0xfe   : > { %v841_v54 = vsel %vm557_vm1, %v749_v50, 0.0  ;;  %v844_v28 = vsel %vm557_vm1, %v750_v12, 0.0  ;;  %v4202_v50 = vrot.slane %v524_v35, %v977_v56 }
  0xff   : > { %839 = vadd.xlane.f32.xlu1 %v838_v60  ;;  %842 = vadd.xlane.f32.xlu0 %v841_v54 }
 0x103   : > { %845 = vadd.xlane.f32.xlu1 %v844_v28 }
 0x14c   : > { %v753_v29 = vpop.xlane.xlu0 %752 }
 0x14d   : > { %v847_v55 = vmul.f32 0.03125, %v753_v29 }
 0x14f   : > { %v879_v32 = vadd.f32 1e-05, %v847_v55  ;;  %v4207_v55 = vrot.slane %v524_v35, %v1013_v36 }
 0x150   : > { %v756_v47 = vpop.xlane.xlu1 %755  ;;  %v759_v62 = vpop.xlane.xlu0 %758 }
 0x151   : > { %3439 = vrsqrt.f32 %v879_v32  ;;  %v848_v2 = vmul.f32 0.03125, %v756_v47  ;;  %v849_v3 = vmul.f32 0.03125, %v759_v62 }
 0x153   : > { %v880_v16 = vadd.f32 1e-05, %v848_v2  ;;  %v881_v7 = vadd.f32 1e-05, %v849_v3 }
 0x154   : > { %v762_v10 = vpop.xlane.xlu1 %761  ;;  %v765_v52 = vpop.xlane.xlu0 %764 }
 0x155   : > { %3441 = vrsqrt.f32 %v880_v16  ;;  %v850_v4 = vmul.f32 0.03125, %v762_v10  ;;  %v851_v18 = vmul.f32 0.03125, %v765_v52 }
 0x156   : > { %3443 = vrsqrt.f32 %v881_v7 }
 0x157   : > { %v882_v19 = vadd.f32 1e-05, %v850_v4  ;;  %v883_v22 = vadd.f32 1e-05, %v851_v18 }
 0x158   : > { %v768_v20 = vpop.xlane.xlu1 %767  ;;  %v771_v26 = vpop.xlane.xlu0 %770 }
 0x159   : > { %3445 = vrsqrt.f32 %v882_v19  ;;  %v852_v30 = vmul.f32 0.03125, %v768_v20  ;;  %v853_v8 = vmul.f32 0.03125, %v771_v26 }
 0x15a   : > { %3447 = vrsqrt.f32 %v883_v22 }
 0x15b   : > { %v884_v38 = vadd.f32 1e-05, %v852_v30  ;;  %v885_v24 = vadd.f32 1e-05, %v853_v8 }
 0x15c   : > { %v774_v46 = vpop.xlane.xlu1 %773  ;;  %v777_v60 = vpop.xlane.xlu0 %776 }
 0x15d   : > { %3449 = vrsqrt.f32 %v884_v38  ;;  %v854_v12 = vmul.f32 0.03125, %v774_v46  ;;  %v855_v54 = vmul.f32 0.03125, %v777_v60 }
 0x15e   : > { %v3440_v28 = vpop.eup %3439  ;;  %3451 = vrsqrt.f32 %v885_v24 }
 0x15f   : > { %v943_v29 = vmul.f32 %v3440_v28, %v4002_v42  ;;  %v886_v32 = vadd.f32 1e-05, %v854_v12  ;;  %v887_v47 = vadd.f32 1e-05, %v855_v54 }
 0x160   : > { %v780_v62 = vpop.xlane.xlu1 %779  ;;  %v783_v0 = vpop.xlane.xlu0 %782 }
 0x161   : > { %v979_v2 = vmul.f32 %v4202_v50, %v943_v29  ;;  %3453 = vrsqrt.f32 %v886_v32  ;;  %v856_v3 = vmul.f32 0.03125, %v780_v62  ;;  %v857_v16 = vmul.f32 0.03125, %v783_v0 }
 0x162   : > { %v3442_v7 = vpop.eup %3441  ;;  %3455 = vrsqrt.f32 %v887_v47 }
 0x163   : > { %v3444_v10 = vpop.eup %3443  ;;  %v1015_v52 = vadd.f32 %v4207_v55, %v979_v2  ;;  %v944_v42 = vmul.f32 %v3442_v7, %v4012_v58  ;;  %v888_v4 = vadd.f32 1e-05, %v856_v3  ;;  %v889_v18 = vadd.f32 1e-05, %v857_v16 }
 0x164   : > { %v945_v19 = vmul.f32 %v3444_v10, %v4005_v43  ;;  %v786_v22 = vpop.xlane.xlu1 %785  ;;  %v789_v20 = vpop.xlane.xlu0 %788 }
 0x165   : > { %v3213_v26 = vpack.c.bf16 %v1015_v52, %v1015_v52  ;;  %v980_v30 = vmul.f32 %v4202_v50, %v944_v42  ;;  %3457 = vrsqrt.f32 %v888_v4  ;;  %v858_v8 = vmul.f32 0.03125, %v786_v22 }
 0x166   : > { %v3446_v35 = vpop.eup %3445  ;;  %v981_v38 = vmul.f32 %v4202_v50, %v945_v19  ;;  %3459 = vrsqrt.f32 %v889_v18  ;;  %v859_v24 = vmul.f32 0.03125, %v789_v20 }
 0x167   : > { %v3448_v46 = vpop.eup %3447  ;;  %1176 = vst.msk [vmem:[#allocation3] sm:$0xf] %vm1175_vm2, %v3213_v26  ;;  %v1016_v58 = vadd.f32 %v4207_v55, %v980_v30  ;;  %v946_v60 = vmul.f32 %v3446_v35, %v4015_v59  ;;  %v890_v43 = vadd.f32 1e-05, %v858_v8 }
 0x168   : > { %v1017_v12 = vadd.f32 %v4207_v55, %v981_v38  ;;  %v947_v54 = vmul.f32 %v3448_v46, %v4024_v34  ;;  %v891_v28 = vadd.f32 1e-05, %v859_v24  ;;  %v792_v29 = vpop.xlane.xlu1 %791  ;;  %v795_v32 = vpop.xlane.xlu0 %794 }
 0x169   : > { %v3214_v47 = vpack.c.bf16 %v1016_v58, %v1016_v58  ;;  %v982_v62 = vmul.f32 %v4202_v50, %v946_v60  ;;  %3461 = vrsqrt.f32 %v890_v43  ;;  %v860_v0 = vmul.f32 0.03125, %v792_v29 }
 0x16a   : > { %v3450_v2 = vpop.eup %3449  ;;  %v3215_v3 = vpack.c.bf16 %v1017_v12, %v1017_v12  ;;  %v983_v16 = vmul.f32 %v4202_v50, %v947_v54  ;;  %3463 = vrsqrt.f32 %v891_v28  ;;  %v861_v7 = vmul.f32 0.03125, %v795_v32 }
 0x16b   : > { %v3452_v59 = vpop.eup %3451  ;;  %1177 = vst.msk [vmem:[#allocation3 + $0x4] sm:$0xf] %vm1175_vm2, %v3214_v47  ;;  %v1018_v10 = vadd.f32 %v4207_v55, %v982_v62  ;;  %v948_v34 = vmul.f32 %v3450_v2, %v4027_v37  ;;  %v892_v52 = vadd.f32 1e-05, %v860_v0 }
 0x16c   : > { %1178 = vst.msk [vmem:[#allocation3 + $0x8] sm:$0xf] %vm1175_vm2, %v3215_v3  ;;  %v1019_v42 = vadd.f32 %v4207_v55, %v983_v16  ;;  %v949_v4 = vmul.f32 %v3452_v59, %v4036_v23  ;;  %v893_v18 = vadd.f32 1e-05, %v861_v7  ;;  %v798_v19 = vpop.xlane.xlu1 %797  ;;  %v801_v22 = vpop.xlane.xlu0 %800 }
 0x16d   : > { %v3216_v20 = vpack.c.bf16 %v1018_v10, %v1018_v10  ;;  %v984_v26 = vmul.f32 %v4202_v50, %v948_v34  ;;  %3465 = vrsqrt.f32 %v892_v52  ;;  %v862_v30 = vmul.f32 0.03125, %v798_v19 }
 0x16e   : > { %v3454_v8 = vpop.eup %3453  ;;  %v3217_v35 = vpack.c.bf16 %v1019_v42, %v1019_v42  ;;  %v985_v38 = vmul.f32 %v4202_v50, %v949_v4  ;;  %3467 = vrsqrt.f32 %v893_v18  ;;  %v863_v37 = vmul.f32 0.03125, %v801_v22 }
 0x16f   : > { %v3456_v24 = vpop.eup %3455  ;;  %1179 = vst.msk [vmem:[#allocation3 + $0xc] sm:$0xf] %vm1175_vm2, %v3216_v20  ;;  %v1020_v46 = vadd.f32 %v4207_v55, %v984_v26  ;;  %v950_v23 = vmul.f32 %v3454_v8, %v4039_v41  ;;  %v894_v58 = vadd.f32 1e-05, %v862_v30 }
 0x170   : > { %1180 = vst.msk [vmem:[#allocation3 + $0x10] sm:$0xf] %vm1175_vm2, %v3217_v35  ;;  %v1021_v60 = vadd.f32 %v4207_v55, %v985_v38  ;;  %v951_v43 = vmul.f32 %v3456_v24, %v4048_v39  ;;  %v895_v12 = vadd.f32 1e-05, %v863_v37  ;;  %v804_v54 = vpop.xlane.xlu1 %803  ;;  %v807_v28 = vpop.xlane.xlu0 %806 }
 0x171   : > { %v3218_v29 = vpack.c.bf16 %v1020_v46, %v1020_v46  ;;  %v986_v32 = vmul.f32 %v4202_v50, %v950_v23  ;;  %3469 = vrsqrt.f32 %v894_v58  ;;  %v864_v47 = vmul.f32 0.03125, %v804_v54 }
 0x172   : > { %v3458_v62 = vpop.eup %3457  ;;  %v3219_v0 = vpack.c.bf16 %v1021_v60, %v1021_v60  ;;  %v987_v2 = vmul.f32 %v4202_v50, %v951_v43  ;;  %3471 = vrsqrt.f32 %v895_v12  ;;  %v865_v41 = vmul.f32 0.03125, %v807_v28  ;;  %v3419_v3 = vld [vmem:[#allocation3] sm:$0xff]  }
 0x173   : > { %v3460_v16 = vpop.eup %3459  ;;  %1181 = vst.msk [vmem:[#allocation3 + $0x14] sm:$0xf] %vm1175_vm2, %v3218_v29  ;;  %v1022_v39 = vadd.f32 %v4207_v55, %v986_v32  ;;  %v952_v7 = vmul.f32 %v3458_v62, %v4051_v45  ;;  %v896_v59 = vadd.f32 1e-05, %v864_v47  ;;  %3288 = vmatprep.mubr.msk.bf16.mxu0 %vm557_vm1, %v3419_v3 }
 0x174   : > { %1182 = vst.msk [vmem:[#allocation3 + $0x18] sm:$0xf] %vm1175_vm2, %v3219_v0  ;;  %v1023_v10 = vadd.f32 %v4207_v55, %v987_v2  ;;  %v953_v34 = vmul.f32 %v3460_v16, %v4060_v33  ;;  %v897_v52 = vadd.f32 1e-05, %v865_v41  ;;  %v810_v42 = vpop.xlane.xlu1 %809  ;;  %v813_v4 = vpop.xlane.xlu0 %812 }
 0x175   : > { %v3220_v18 = vpack.c.bf16 %v1022_v39, %v1022_v39  ;;  %v988_v19 = vmul.f32 %v4202_v50, %v952_v7  ;;  %3473 = vrsqrt.f32 %v896_v59  ;;  %v866_v22 = vmul.f32 0.03125, %v810_v42 }
 0x176   : > { %v3462_v20 = vpop.eup %3461  ;;  %v3221_v26 = vpack.c.bf16 %v1023_v10, %v1023_v10  ;;  %v989_v45 = vmul.f32 %v4202_v50, %v953_v34  ;;  %3475 = vrsqrt.f32 %v897_v52  ;;  %v867_v30 = vmul.f32 0.03125, %v813_v4  ;;  %v3420_v8 = vld [vmem:[#allocation3 + $0x8] sm:$0xff]  }
 0x177   : > { %v3464_v35 = vpop.eup %3463  ;;  %1183 = vst.msk [vmem:[#allocation3 + $0x1c] sm:$0xf] %vm1175_vm2, %v3220_v18  ;;  %v1024_v33 = vadd.f32 %v4207_v55, %v988_v19  ;;  %v954_v38 = vmul.f32 %v3462_v20, %v4063_v49  ;;  %v898_v37 = vadd.f32 1e-05, %v866_v22  ;;  %3289 = vmatmul.mubr.msk.bf16.vlgmr.msra.gmra.mxu0 %vm557_vm1, %v3420_v8 }
 0x178   : > { %1184 = vst.msk [vmem:[#allocation3 + $0x20] sm:$0xf] %vm1175_vm2, %v3221_v26  ;;  %v1025_v24 = vadd.f32 %v4207_v55, %v989_v45  ;;  %v955_v46 = vmul.f32 %v3464_v35, %v4072_v11  ;;  %v899_v23 = vadd.f32 1e-05, %v867_v30  ;;  %v816_v58 = vpop.xlane.xlu1 %815  ;;  %v819_v60 = vpop.xlane.xlu0 %818 }
 0x179   : > { %v3222_v43 = vpack.c.bf16 %v1024_v33, %v1024_v33  ;;  %v990_v12 = vmul.f32 %v4202_v50, %v954_v38  ;;  %3477 = vrsqrt.f32 %v898_v37  ;;  %v868_v54 = vmul.f32 0.03125, %v816_v58 }
 0x17a   : > { %v3466_v28 = vpop.eup %3465  ;;  %v3223_v29 = vpack.c.bf16 %v1025_v24, %v1025_v24  ;;  %v991_v49 = vmul.f32 %v4202_v50, %v955_v46  ;;  %3479 = vrsqrt.f32 %v899_v23  ;;  %v869_v32 = vmul.f32 0.03125, %v819_v60  ;;  %v3421_v47 = vld [vmem:[#allocation3 + $0x10] sm:$0xff]  }
 0x17b   : > { %v3468_v62 = vpop.eup %3467  ;;  %1185 = vst.msk [vmem:[#allocation3 + $0x24] sm:$0xf] %vm1175_vm2, %v3222_v43  ;;  %v1026_v11 = vadd.f32 %v4207_v55, %v990_v12  ;;  %v956_v0 = vmul.f32 %v3466_v28, %v4075_v53  ;;  %v900_v2 = vadd.f32 1e-05, %v868_v54  ;;  %3292 = vmatprep.mubr.msk.bf16.mxu0 %vm557_vm1, %v3421_v47 }
 0x17c   : > { %1186 = vst.msk [vmem:[#allocation3 + $0x28] sm:$0xf] %vm1175_vm2, %v3223_v29  ;;  %v1027_v41 = vadd.f32 %v4207_v55, %v991_v49  ;;  %v957_v3 = vmul.f32 %v3468_v62, %v4084_v27  ;;  %v901_v16 = vadd.f32 1e-05, %v869_v32  ;;  %v822_v39 = vpop.xlane.xlu1 %821  ;;  %v825_v7 = vpop.xlane.xlu0 %824 }
 0x17d   : > { %v3224_v59 = vpack.c.bf16 %v1026_v11, %v1026_v11  ;;  %v992_v10 = vmul.f32 %v4202_v50, %v956_v0  ;;  %3481 = vrsqrt.f32 %v900_v2  ;;  %v870_v34 = vmul.f32 0.03125, %v822_v39 }
 0x17e   : > { %v3470_v52 = vpop.eup %3469  ;;  %v3225_v42 = vpack.c.bf16 %v1027_v41, %v1027_v41  ;;  %v993_v53 = vmul.f32 %v4202_v50, %v957_v3  ;;  %3483 = vrsqrt.f32 %v901_v16  ;;  %v871_v4 = vmul.f32 0.03125, %v825_v7  ;;  %v3422_v18 = vld [vmem:[#allocation3 + $0x18] sm:$0xff]  }
 0x17f   : > { %v3472_v19 = vpop.eup %3471  ;;  %1187 = vst.msk [vmem:[#allocation3 + $0x2c] sm:$0xf] %vm1175_vm2, %v3224_v59  ;;  %v1028_v27 = vadd.f32 %v4207_v55, %v992_v10  ;;  %v958_v22 = vmul.f32 %v3470_v52, %v4087_v57  ;;  %v902_v20 = vadd.f32 1e-05, %v870_v34  ;;  %3293 = vmatmul.mubr.msk.bf16.gmra.mxu0 %vm557_vm1, %v3422_v18 }
 0x180   : > { %1188 = vst.msk [vmem:[#allocation3 + $0x30] sm:$0xf] %vm1175_vm2, %v3225_v42  ;;  %v1029_v26 = vadd.f32 %v4207_v55, %v993_v53  ;;  %v959_v45 = vmul.f32 %v3472_v19, %v4096_v48  ;;  %v903_v30 = vadd.f32 1e-05, %v871_v4  ;;  %v828_v8 = vpop.xlane.xlu1 %827  ;;  %v831_v35 = vpop.xlane.xlu0 %830 }
 0x181   : > { %v3226_v33 = vpack.c.bf16 %v1028_v27, %v1028_v27  ;;  %v994_v38 = vmul.f32 %v4202_v50, %v958_v22  ;;  %3485 = vrsqrt.f32 %v902_v20  ;;  %v872_v37 = vmul.f32 0.03125, %v828_v8 }
 0x182   : > { %v3474_v24 = vpop.eup %3473  ;;  %v3227_v46 = vpack.c.bf16 %v1029_v26, %v1029_v26  ;;  %v995_v57 = vmul.f32 %v4202_v50, %v959_v45  ;;  %3487 = vrsqrt.f32 %v903_v30  ;;  %v873_v23 = vmul.f32 0.03125, %v831_v35  ;;  %v3423_v58 = vld [vmem:[#allocation3 + $0x20] sm:$0xff]  }
 0x183   : > { %v3476_v60 = vpop.eup %3475  ;;  %1189 = vst.msk [vmem:[#allocation3 + $0x34] sm:$0xf] %vm1175_vm2, %v3226_v33  ;;  %v1030_v48 = vadd.f32 %v4207_v55, %v994_v38  ;;  %v960_v43 = vmul.f32 %v3474_v24, %v4099_v61  ;;  %v904_v12 = vadd.f32 1e-05, %v872_v37  ;;  %3296 = vmatprep.mubr.msk.bf16.mxu0 %vm557_vm1, %v3423_v58 }
 0x184   : > { %1190 = vst.msk [vmem:[#allocation3 + $0x38] sm:$0xf] %vm1175_vm2, %v3227_v46  ;;  %v1031_v54 = vadd.f32 %v4207_v55, %v995_v57  ;;  %v961_v28 = vmul.f32 %v3476_v60, %v4108_v63  ;;  %v905_v29 = vadd.f32 1e-05, %v873_v23  ;;  %v834_v49 = vpop.xlane.xlu1 %833  ;;  %v837_v32 = vpop.xlane.xlu0 %836 }
 0x185   : > { %v3228_v47 = vpack.c.bf16 %v1030_v48, %v1030_v48  ;;  %v996_v62 = vmul.f32 %v4202_v50, %v960_v43  ;;  %3489 = vrsqrt.f32 %v904_v12  ;;  %v874_v11 = vmul.f32 0.03125, %v834_v49 }
 0x186   : > { %v3478_v0 = vpop.eup %3477  ;;  %v3229_v2 = vpack.c.bf16 %v1031_v54, %v1031_v54  ;;  %v997_v61 = vmul.f32 %v4202_v50, %v961_v28  ;;  %3491 = vrsqrt.f32 %v905_v29  ;;  %v875_v41 = vmul.f32 0.03125, %v837_v32  ;;  %v3424_v3 = vld [vmem:[#allocation3 + $0x28] sm:$0xff]  }
 0x187   : > { %v3480_v16 = vpop.eup %3479  ;;  %1191 = vst.msk [vmem:[#allocation3 + $0x3c] sm:$0xf] %vm1175_vm2, %v3228_v47  ;;  %v1032_v63 = vadd.f32 %v4207_v55, %v996_v62  ;;  %v962_v39 = vmul.f32 %v3478_v0, %v4111_v1  ;;  %v906_v7 = vadd.f32 1e-05, %v874_v11  ;;  %3297 = vmatmul.mubr.msk.bf16.gmra.mxu0 %vm557_vm1, %v3424_v3 }
 0x188   : > { %1192 = vst.msk [vmem:[#allocation3 + $0x40] sm:$0xf] %vm1175_vm2, %v3229_v2  ;;  %v1033_v59 = vadd.f32 %v4207_v55, %v997_v61  ;;  %v963_v10 = vmul.f32 %v3480_v16, %v4120_v15  ;;  %v907_v34 = vadd.f32 1e-05, %v875_v41  ;;  %v840_v52 = vpop.xlane.xlu1 %839  ;;  %v843_v42 = vpop.xlane.xlu0 %842 }
 0x189   : > { %v3230_v53 = vpack.c.bf16 %v1032_v63, %v1032_v63  ;;  %v998_v4 = vmul.f32 %v4202_v50, %v962_v39  ;;  %3493 = vrsqrt.f32 %v906_v7  ;;  %v876_v18 = vmul.f32 0.03125, %v840_v52 }
 0x18a   : > { %v3482_v19 = vpop.eup %3481  ;;  %v3231_v27 = vpack.c.bf16 %v1033_v59, %v1033_v59  ;;  %v999_v1 = vmul.f32 %v4202_v50, %v963_v10  ;;  %3495 = vrsqrt.f32 %v907_v34  ;;  %v877_v22 = vmul.f32 0.03125, %v843_v42  ;;  %v3425_v20 = vld [vmem:[#allocation3 + $0x30] sm:$0xff]  }
 0x18b   : > { %v3484_v26 = vpop.eup %3483  ;;  %1193 = vst.msk [vmem:[#allocation3 + $0x44] sm:$0xf] %vm1175_vm2, %v3230_v53  ;;  %v1034_v15 = vadd.f32 %v4207_v55, %v998_v4  ;;  %v964_v45 = vmul.f32 %v3482_v19, %v4123_v5  ;;  %v908_v30 = vadd.f32 1e-05, %v876_v18  ;;  %3300 = vmatprep.mubr.msk.bf16.mxu0 %vm557_vm1, %v3425_v20 }
 0x18c   : > { %1194 = vst.msk [vmem:[#allocation3 + $0x48] sm:$0xf] %vm1175_vm2, %v3231_v27  ;;  %v1035_v8 = vadd.f32 %v4207_v55, %v999_v1  ;;  %v965_v35 = vmul.f32 %v3484_v26, %v4132_v31  ;;  %v909_v33 = vadd.f32 1e-05, %v877_v22  ;;  %v846_v38 = vpop.xlane.xlu1 %845 }
 0x18d   : > { %v3232_v37 = vpack.c.bf16 %v1034_v15, %v1034_v15  ;;  %v1000_v24 = vmul.f32 %v4202_v50, %v964_v45  ;;  %3497 = vrsqrt.f32 %v908_v30  ;;  %v878_v46 = vmul.f32 0.03125, %v846_v38 }
 0x18e   : > { %v3486_v57 = vpop.eup %3485  ;;  %v3233_v23 = vpack.c.bf16 %v1035_v8, %v1035_v8  ;;  %v1001_v5 = vmul.f32 %v4202_v50, %v965_v35  ;;  %3499 = vrsqrt.f32 %v909_v33  ;;  %v3426_v58 = vld [vmem:[#allocation3 + $0x38] sm:$0xff]  }
 0x18f   : > { %v3488_v60 = vpop.eup %3487  ;;  %1195 = vst.msk [vmem:[#allocation3 + $0x4c] sm:$0xf] %vm1175_vm2, %v3232_v37  ;;  %v1036_v31 = vadd.f32 %v4207_v55, %v1000_v24  ;;  %v966_v48 = vmul.f32 %v3486_v57, %v4135_v9  ;;  %v910_v43 = vadd.f32 1e-05, %v878_v46  ;;  %3301 = vmatmul.mubr.msk.bf16.gmra.mxu0 %vm557_vm1, %v3426_v58  ;;  %v3438_v58 = vld [vmem:[%s3800_s0] sm:$0xff]  }
 0x190   : > { %1196 = vst.msk [vmem:[#allocation3 + $0x50] sm:$0xf] %vm1175_vm2, %v3233_v23  ;;  %v1037_v12 = vadd.f32 %v4207_v55, %v1001_v5  ;;  %v967_v54 = vmul.f32 %v3488_v60, %v4144_v13  ;;  %v3435_v23 = vld [vmem:[%s3800_s0 + $0x18] sm:$0xff]   ;;  %v3437_v5 = vld [vmem:[%s3800_s0 + $0x8] sm:$0xff]   ;;  %v3687_v60 = vmov 0.0  }
 0x191   : > { %v3234_v28 = vpack.c.bf16 %v1036_v31, %v1036_v31  ;;  %v1002_v29 = vmul.f32 %v4202_v50, %v966_v48  ;;  %3501 = vrsqrt.f32 %v910_v43  ;;  %3320 = vmatprep.subr.bf16.mxu1 %v3435_v23  ;;  %1210 = vst.msk [vmem:[#allocation4 + $0x10] sm:$0xff] %vm557_vm1, %v3687_v60  ;;  %1208 = vst.msk [vmem:[#allocation4] sm:$0xff] %vm557_vm1, %v3687_v60  ;;  %v4393_v31 = vld [vmem:[%s411_s20] ss:$0 sm:$0xff] }
 0x192   : > { %v3490_v49 = vpop.eup %3489  ;;  %v3235_v32 = vpack.c.bf16 %v1037_v12, %v1037_v12  ;;  %v1003_v47 = vmul.f32 %v4202_v50, %v967_v54  ;;  %v3427_v62 = vld [vmem:[#allocation3 + $0x40] sm:$0xff]   ;;  %3321 = vmatpush3.bf16.msra.mxu1 %v3435_v23  ;;  %1209 = vst.msk [vmem:[#allocation4 + $0x8] sm:$0xff] %vm557_vm1, %v3687_v60  ;;  %1211 = vst.msk [vmem:[#allocation4 + $0x18] sm:$0xff] %vm557_vm1, %v3687_v60 }
 0x193   : > { %v3492_v11 = vpop.eup %3491  ;;  %1197 = vst.msk [vmem:[#allocation3 + $0x54] sm:$0xf] %vm1175_vm2, %v3234_v28  ;;  %v1038_v9 = vadd.f32 %v4207_v55, %v1002_v29  ;;  %v968_v0 = vmul.f32 %v3490_v49, %v4147_v51  ;;  %3304 = vmatprep.mubr.msk.bf16.mxu0 %vm557_vm1, %v3427_v62 }
 0x194   : > { %1198 = vst.msk [vmem:[#allocation3 + $0x58] sm:$0xf] %vm1175_vm2, %v3235_v32  ;;  %v1039_v13 = vadd.f32 %v4207_v55, %v1003_v47  ;;  %v969_v2 = vmul.f32 %v3492_v11, %v4157_v17 }
 0x195   : > { %v3236_v61 = vpack.c.bf16 %v1038_v9, %v1038_v9  ;;  %v1004_v41 = vmul.f32 %v4202_v50, %v968_v0  ;;  %1212 = vst.msk [vmem:[#allocation4 + $0x20] sm:$0xff] %vm557_vm1, %v3687_v60  ;;  %1213 = vst.msk [vmem:[#allocation4 + $0x28] sm:$0xff] %vm557_vm1, %v3687_v60 }
 0x196   : > { %v3494_v3 = vpop.eup %3493  ;;  %v3237_v16 = vpack.c.bf16 %v1039_v13, %v1039_v13  ;;  %v1005_v63 = vmul.f32 %v4202_v50, %v969_v2  ;;  %v3428_v39 = vld [vmem:[#allocation3 + $0x48] sm:$0xff]   ;;  %1214 = vst.msk [vmem:[#allocation4 + $0x30] sm:$0xff] %vm557_vm1, %v3687_v60  ;;  %1215 = vst.msk [vmem:[#allocation4 + $0x38] sm:$0xff] %vm557_vm1, %v3687_v60 }
 0x197   : > { %v3496_v7 = vpop.eup %3495  ;;  %1199 = vst.msk [vmem:[#allocation3 + $0x5c] sm:$0xf] %vm1175_vm2, %v3236_v61  ;;  %v1040_v51 = vadd.f32 %v4207_v55, %v1004_v41  ;;  %v970_v59 = vmul.f32 %v3494_v3, %v4160_v6  ;;  %3305 = vmatmul.mubr.msk.bf16.gmra.mxu0 %vm557_vm1, %v3428_v39 }
 0x198   : > { %1200 = vst.msk [vmem:[#allocation3 + $0x60] sm:$0xf] %vm1175_vm2, %v3237_v16  ;;  %v1041_v17 = vadd.f32 %v4207_v55, %v1005_v63  ;;  %v971_v10 = vmul.f32 %v3496_v7, %v4170_v21 }
 0x199   : > { %v3238_v34 = vpack.c.bf16 %v1040_v51, %v1040_v51  ;;  %v1006_v52 = vmul.f32 %v4202_v50, %v970_v59  ;;  %1216 = vst.msk [vmem:[#allocation4 + $0x40] sm:$0xff] %vm557_vm1, %v3687_v60  ;;  %1217 = vst.msk [vmem:[#allocation4 + $0x48] sm:$0xff] %vm557_vm1, %v3687_v60 }
 0x19a   : > { %v3498_v42 = vpop.eup %3497  ;;  %v3239_v53 = vpack.c.bf16 %v1041_v17, %v1041_v17  ;;  %v1007_v4 = vmul.f32 %v4202_v50, %v971_v10  ;;  %v3429_v18 = vld [vmem:[#allocation3 + $0x50] sm:$0xff]   ;;  %1218 = vst.msk [vmem:[#allocation4 + $0x50] sm:$0xff] %vm557_vm1, %v3687_v60  ;;  %1219 = vst.msk [vmem:[#allocation4 + $0x58] sm:$0xff] %vm557_vm1, %v3687_v60 }
 0x19b   : > { %v3500_v19 = vpop.eup %3499  ;;  %1201 = vst.msk [vmem:[#allocation3 + $0x64] sm:$0xf] %vm1175_vm2, %v3238_v34  ;;  %v1042_v6 = vadd.f32 %v4207_v55, %v1006_v52  ;;  %v972_v27 = vmul.f32 %v3498_v42, %v4173_v40  ;;  %3308 = vmatprep.mubr.msk.bf16.mxu0 %vm557_vm1, %v3429_v18 }
 0x19c   : > { %1202 = vst.msk [vmem:[#allocation3 + $0x68] sm:$0xf] %vm1175_vm2, %v3239_v53  ;;  %v1043_v21 = vadd.f32 %v4207_v55, %v1007_v4  ;;  %v973_v1 = vmul.f32 %v3500_v19, %v4182_v25 }
 0x19d   : > { %v3240_v22 = vpack.c.bf16 %v1042_v6, %v1042_v6  ;;  %v1008_v20 = vmul.f32 %v4202_v50, %v972_v27  ;;  %1220 = vst.msk [vmem:[#allocation4 + $0x60] sm:$0xff] %vm557_vm1, %v3687_v60  ;;  %1221 = vst.msk [vmem:[#allocation4 + $0x68] sm:$0xff] %vm557_vm1, %v3687_v60 }
 0x19e   : > { %v3502_v26 = vpop.eup %3501  ;;  %v3241_v15 = vpack.c.bf16 %v1043_v21, %v1043_v21  ;;  %v1009_v45 = vmul.f32 %v4202_v50, %v973_v1  ;;  %v3430_v30 = vld [vmem:[#allocation3 + $0x58] sm:$0xff]   ;;  %1222 = vst.msk [vmem:[#allocation4 + $0x70] sm:$0xff] %vm557_vm1, %v3687_v60  ;;  %1223 = vst.msk [vmem:[#allocation4 + $0x78] sm:$0xff] %vm557_vm1, %v3687_v60 }
 0x19f   : > { %1203 = vst.msk [vmem:[#allocation3 + $0x6c] sm:$0xf] %vm1175_vm2, %v3240_v22  ;;  %v1044_v40 = vadd.f32 %v4207_v55, %v1008_v20  ;;  %v974_v8 = vmul.f32 %v3502_v26, %v4185_v44  ;;  %3309 = vmatmul.mubr.msk.bf16.gmra.mxu0 %vm557_vm1, %v3430_v30 }
 0x1a0   : > { %1204 = vst.msk [vmem:[#allocation3 + $0x70] sm:$0xf] %vm1175_vm2, %v3241_v15  ;;  %v1045_v25 = vadd.f32 %v4207_v55, %v1009_v45 }
 0x1a1   : > { %v3242_v35 = vpack.c.bf16 %v1044_v40, %v1044_v40  ;;  %v1010_v33 = vmul.f32 %v4202_v50, %v974_v8  ;;  %1224 = vst.msk [vmem:[#allocation4 + $0x80] sm:$0xff] %vm557_vm1, %v3687_v60  ;;  %1225 = vst.msk [vmem:[#allocation4 + $0x88] sm:$0xff] %vm557_vm1, %v3687_v60 }
 0x1a2   : > { %v3243_v38 = vpack.c.bf16 %v1045_v25, %v1045_v25  ;;  %v3431_v37 = vld [vmem:[#allocation3 + $0x60] sm:$0xff]   ;;  %1226 = vst.msk [vmem:[#allocation4 + $0x90] sm:$0xff] %vm557_vm1, %v3687_v60  ;;  %1227 = vst.msk [vmem:[#allocation4 + $0x98] sm:$0xff] %vm557_vm1, %v3687_v60 }
 0x1a3   : > { %1205 = vst.msk [vmem:[#allocation3 + $0x74] sm:$0xf] %vm1175_vm2, %v3242_v35  ;;  %v1046_v24 = vadd.f32 %v4207_v55, %v1010_v33  ;;  %3312 = vmatprep.mubr.msk.bf16.mxu0 %vm557_vm1, %v3431_v37  ;;  %v3436_v55 = vld [vmem:[%s3800_s0 + $0x10] sm:$0xff]  }
 0x1a4   : > { %1206 = vst.msk [vmem:[#allocation3 + $0x78] sm:$0xf] %vm1175_vm2, %v3243_v38  ;;  %3322 = vmatprep.subr.bf16.mxu1 %v3436_v55 }
 0x1a5   : > { %v3244_v44 = vpack.c.bf16 %v1046_v24, %v1046_v24  ;;  %3323 = vmatpush3.bf16.msra.mxu1 %v3436_v55  ;;  %1228 = vst.msk [vmem:[#allocation4 + $0xa0] sm:$0xff] %vm557_vm1, %v3687_v60  ;;  %1229 = vst.msk [vmem:[#allocation4 + $0xa8] sm:$0xff] %vm557_vm1, %v3687_v60 }
 0x1a6   : > { %v3432_v46 = vld [vmem:[#allocation3 + $0x68] sm:$0xff]   ;;  %3324 = vmatprep.subr.bf16.mxu1 %v3437_v5  ;;  %1230 = vst.msk [vmem:[#allocation4 + $0xb0] sm:$0xff] %vm557_vm1, %v3687_v60  ;;  %1231 = vst.msk [vmem:[#allocation4 + $0xb8] sm:$0xff] %vm557_vm1, %v3687_v60 }
 0x1a7   : > { %1207 = vst.msk [vmem:[#allocation3 + $0x7c] sm:$0xf] %vm1175_vm2, %v3244_v44  ;;  %3313 = vmatmul.mubr.msk.bf16.gmra.mxu0 %vm557_vm1, %v3432_v46 }
 0x1a8   : > { %1232 = vst.msk [vmem:[#allocation4 + $0xc0] sm:$0xff] %vm557_vm1, %v3687_v60  ;;  %1233 = vst.msk [vmem:[#allocation4 + $0xc8] sm:$0xff] %vm557_vm1, %v3687_v60 }
 0x1a9   : > { %3325 = vmatpush3.bf16.msra.mxu1 %v3437_v5  ;;  %1234 = vst.msk [vmem:[#allocation4 + $0xd0] sm:$0xff] %vm557_vm1, %v3687_v60  ;;  %1235 = vst.msk [vmem:[#allocation4 + $0xd8] sm:$0xff] %vm557_vm1, %v3687_v60 }
 0x1aa   : > { %v3433_v50 = vld [vmem:[#allocation3 + $0x70] sm:$0xff]   ;;  %3326 = vmatprep.subr.bf16.mxu1 %v3438_v58  ;;  %1236 = vst.msk [vmem:[#allocation4 + $0xe0] sm:$0xff] %vm557_vm1, %v3687_v60  ;;  %1237 = vst.msk [vmem:[#allocation4 + $0xe8] sm:$0xff] %vm557_vm1, %v3687_v60 }
 0x1ab   : > { %3316 = vmatprep.mubr.msk.bf16.mxu0 %vm557_vm1, %v3433_v50  ;;  %1238 = vst.msk [vmem:[#allocation4 + $0xf0] sm:$0xff] %vm557_vm1, %v3687_v60  ;;  %1239 = vst.msk [vmem:[#allocation4 + $0xf8] sm:$0xff] %vm557_vm1, %v3687_v60 }
 0x1ad   : > { %3327 = vmatpush3.bf16.msra.mxu1 %v3438_v58 }
 0x1ae   : > { %v3434_v57 = vld [vmem:[#allocation3 + $0x78] sm:$0xff]  }
 0x1af   : > { %3317 = vmatmul.mubr.msk.bf16.gmra.mxu0 %vm557_vm1, %v3434_v57 }
 0x237   : > { %v3290_v48 = vpop.f32.mrf.mxu0 }
 0x238   : > { %v4396_v43 = vadd.f32 %v3290_v48, %v4393_v31 }
 0x239   : > { %v1458_v12 = vpop.f32.mrf.mxu0 }
 0x23a   : > { %v1587_v54 = vmul.f32 %v4396_v43, %v4396_v43  ;;  %v4401_v28 = vadd.f32 %v4393_v31, %v1458_v12 }
 0x23b   : > { %v3291_v29 = vpop.f32.mrf.mxu0 }
 0x23c   : > { %v1619_v49 = vmul.f32 %v1587_v54, %v4396_v43  ;;  %v1585_v32 = vmul.f32 %v4401_v28, %v4401_v28  ;;  %v4407_v47 = vadd.f32 %v3291_v29, %v4393_v31 }
 0x23d   : > { %v1461_v62 = vpop.f32.mrf.mxu0 }
 0x23e   : > { %v1651_v11 = vmul.f32 0.044715, %v1619_v49  ;;  %v1617_v9 = vmul.f32 %v1585_v32, %v4401_v28  ;;  %v1588_v0 = vmul.f32 %v4407_v47, %v4407_v47  ;;  %v4413_v13 = vadd.f32 %v4393_v31, %v1461_v62 }
 0x23f   : > { %v3294_v2 = vpop.f32.mrf.mxu0 }
 0x240   : > { %v1683_v61 = vadd.f32 %v1651_v11, %v4396_v43  ;;  %v1649_v41 = vmul.f32 0.044715, %v1617_v9  ;;  %v1620_v3 = vmul.f32 %v1588_v0, %v4407_v47  ;;  %v1586_v16 = vmul.f32 %v4413_v13, %v4413_v13 }
 0x241   : > { %v4420_v63 = vadd.f32 %v3294_v2, %v4393_v31  ;;  %v1474_v39 = vpop.f32.mrf.mxu0 }
 0x242   : > { %v1681_v7 = vadd.f32 %v1649_v41, %v4401_v28  ;;  %v1652_v51 = vmul.f32 0.044715, %v1620_v3  ;;  %v1618_v59 = vmul.f32 %v1586_v16, %v4413_v13  ;;  %v4427_v10 = vadd.f32 %v4393_v31, %v1474_v39 }
 0x243   : > { %v1591_v17 = vmul.f32 %v4420_v63, %v4420_v63  ;;  %v3295_v34 = vpop.f32.mrf.mxu0  ;;  %v1715_v52 = vmul.f32 0.7978846, %v1683_v61 }
 0x244   : > { %v1684_v42 = vadd.f32 %v1652_v51, %v4407_v47  ;;  %v1650_v53 = vmul.f32 0.044715, %v1618_v59  ;;  %v1713_v4 = vmul.f32 0.7978846, %v1681_v7  ;;  %v1589_v19 = vmul.f32 %v4427_v10, %v4427_v10 }
 0x245   : > { %v1623_v18 = vmul.f32 %v1591_v17, %v4420_v63  ;;  %v4434_v6 = vadd.f32 %v3295_v34, %v4393_v31  ;;  %v1477_v27 = vpop.f32.mrf.mxu0  ;;  %3503 = vtanh.f32 %v1715_v52 }
 0x246   : > { %v1716_v21 = vmul.f32 0.7978846, %v1684_v42  ;;  %v1682_v1 = vadd.f32 %v1650_v53, %v4413_v13  ;;  %v4438_v22 = vadd.f32 %v4393_v31, %v1477_v27  ;;  %v1621_v26 = vmul.f32 %v1589_v19, %v4427_v10 }
 0x247   : > { %v1655_v20 = vmul.f32 0.044715, %v1623_v18  ;;  %v1592_v15 = vmul.f32 %v4434_v6, %v4434_v6  ;;  %v3298_v45 = vpop.f32.mrf.mxu0  ;;  %3505 = vtanh.f32 %v1713_v4 }
 0x248   : > { %v1714_v30 = vmul.f32 0.7978846, %v1682_v1  ;;  %v1590_v40 = vmul.f32 %v4438_v22, %v4438_v22  ;;  %v4446_v8 = vadd.f32 %v3298_v45, %v4393_v31  ;;  %v1653_v35 = vmul.f32 0.044715, %v1621_v26 }
 0x249   : > { %v1687_v25 = vadd.f32 %v1655_v20, %v4420_v63  ;;  %v1624_v33 = vmul.f32 %v1592_v15, %v4434_v6  ;;  %v1490_v38 = vpop.f32.mrf.mxu0  ;;  %3507 = vtanh.f32 %v1716_v21 }
 0x24a   : > { %v1622_v37 = vmul.f32 %v1590_v40, %v4438_v22  ;;  %v1595_v24 = vmul.f32 %v4446_v8, %v4446_v8  ;;  %v4454_v44 = vadd.f32 %v4393_v31, %v1490_v38  ;;  %v1685_v50 = vadd.f32 %v1653_v35, %v4427_v10 }
 0x24b   : > { %v1719_v46 = vmul.f32 0.7978846, %v1687_v25  ;;  %v1656_v57 = vmul.f32 0.044715, %v1624_v33  ;;  %v3299_v23 = vpop.f32.mrf.mxu0  ;;  %3509 = vtanh.f32 %v1714_v30 }
 0x24c   : > { %v1654_v55 = vmul.f32 0.044715, %v1622_v37  ;;  %v1627_v5 = vmul.f32 %v1595_v24, %v4446_v8  ;;  %v1593_v58 = vmul.f32 %v4454_v44, %v4454_v44  ;;  %v4461_v60 = vadd.f32 %v3299_v23, %v4393_v31 }
 0x24d   : > { %3511 = vtanh.f32 %v1719_v46  ;;  %v1717_v48 = vmul.f32 0.7978846, %v1685_v50  ;;  %v1688_v12 = vadd.f32 %v1656_v57, %v4434_v6  ;;  %v1493_v54 = vpop.f32.mrf.mxu0 }
 0x24e   : > { %v1686_v29 = vadd.f32 %v1654_v55, %v4438_v22  ;;  %v1659_v49 = vmul.f32 0.044715, %v1627_v5  ;;  %v1625_v32 = vmul.f32 %v1593_v58, %v4454_v44  ;;  %v1596_v62 = vmul.f32 %v4461_v60, %v4461_v60 }
 0x24f   : > { %3513 = vtanh.f32 %v1717_v48  ;;  %v1720_v11 = vmul.f32 0.7978846, %v1688_v12  ;;  %v4469_v9 = vadd.f32 %v4393_v31, %v1493_v54  ;;  %v3302_v0 = vpop.f32.mrf.mxu0 }
 0x250   : > { %v1718_v2 = vmul.f32 0.7978846, %v1686_v29  ;;  %v1691_v61 = vadd.f32 %v1659_v49, %v4446_v8  ;;  %v1657_v41 = vmul.f32 0.044715, %v1625_v32  ;;  %v1628_v3 = vmul.f32 %v1596_v62, %v4461_v60 }
 0x251   : > { %3515 = vtanh.f32 %v1720_v11  ;;  %v1594_v16 = vmul.f32 %v4469_v9, %v4469_v9  ;;  %v4476_v39 = vadd.f32 %v3302_v0, %v4393_v31  ;;  %v1506_v7 = vpop.f32.mrf.mxu0 }
 0x252   : > { %3517 = vtanh.f32 %v1718_v2  ;;  %v1723_v51 = vmul.f32 0.7978846, %v1691_v61  ;;  %v1689_v59 = vadd.f32 %v1657_v41, %v4454_v44  ;;  %v1660_v17 = vmul.f32 0.044715, %v1628_v3  ;;  %v3504_v19 = vpop.eup %3503 }
 0x253   : > { %v1626_v34 = vmul.f32 %v1594_v16, %v4469_v9  ;;  %v1599_v52 = vmul.f32 %v4476_v39, %v4476_v39  ;;  %v4483_v42 = vadd.f32 %v4393_v31, %v1506_v7  ;;  %v3303_v53 = vpop.f32.mrf.mxu0  ;;  %v1779_v24 = vadd.f32 1.0, %v3504_v19 }
 0x254   : > { %3519 = vtanh.f32 %v1723_v51  ;;  %v1721_v4 = vmul.f32 0.7978846, %v1689_v59  ;;  %v4486_v18 = vadd.f32 %v3303_v53, %v4393_v31  ;;  %v1692_v27 = vadd.f32 %v1660_v17, %v4461_v60  ;;  %v4492_v15 = vpop.eup %3505 }
 0x255   : > { %v1658_v21 = vmul.f32 0.044715, %v1626_v34  ;;  %v1631_v1 = vmul.f32 %v1599_v52, %v4476_v39  ;;  %v1597_v20 = vmul.f32 %v4483_v42, %v4483_v42  ;;  %v1509_v26 = vpop.f32.mrf.mxu0  ;;  %v1811_v16 = vmul.f32 0.5, %v1779_v24 }
 0x256   : > { %3521 = vtanh.f32 %v1721_v4  ;;  %v1600_v45 = vmul.f32 %v4486_v18, %v4486_v18  ;;  %v3508_v30 = vpop.eup %3507  ;;  %v1724_v40 = vmul.f32 0.7978846, %v1692_v27  ;;  %v4502_v50 = vadd.f32 %v4393_v31, %v1509_v26 }
 0x257   : > { %v1690_v25 = vadd.f32 %v1658_v21, %v4469_v9  ;;  %v1663_v35 = vmul.f32 0.044715, %v1631_v1  ;;  %v1629_v33 = vmul.f32 %v1597_v20, %v4483_v42  ;;  %v3306_v38 = vpop.f32.mrf.mxu0  ;;  %v1780_v12 = vadd.f32 1.0, %v3508_v30 }
 0x258   : > { %v4498_v37 = vpop.eup %3509  ;;  %v1632_v46 = vmul.f32 %v1600_v45, %v4486_v18  ;;  %v4505_v57 = vadd.f32 %v3306_v38, %v4393_v31  ;;  %3523 = vtanh.f32 %v1724_v40  ;;  %v1598_v29 = vmul.f32 %v4502_v50, %v4502_v50 }
 0x259   : > { %v1722_v23 = vmul.f32 0.7978846, %v1690_v25  ;;  %v1695_v55 = vadd.f32 %v1663_v35, %v4476_v39  ;;  %v1661_v5 = vmul.f32 0.044715, %v1629_v33  ;;  %v1522_v58 = vpop.f32.mrf.mxu0  ;;  %v1812_v34 = vmul.f32 0.5, %v1780_v12 }
 0x25a   : > { %v3512_v48 = vpop.eup %3511  ;;  %v1664_v54 = vmul.f32 0.044715, %v1632_v46  ;;  %v1603_v49 = vmul.f32 %v4505_v57, %v4505_v57  ;;  %v1630_v41 = vmul.f32 %v1598_v29, %v4502_v50  ;;  %v4516_v3 = vadd.f32 %v4393_v31, %v1522_v58 }
 0x25b   : > { %v1783_v32 = vadd.f32 1.0, %v3512_v48  ;;  %3525 = vtanh.f32 %v1722_v23  ;;  %v1693_v62 = vadd.f32 %v1661_v5, %v4483_v42  ;;  %v3307_v11 = vpop.f32.mrf.mxu0  ;;  %v1727_v2 = vmul.f32 0.7978846, %v1695_v55 }
 0x25c   : > { %v3514_v0 = vpop.eup %3513  ;;  %v1696_v61 = vadd.f32 %v1664_v54, %v4486_v18  ;;  %v1635_v51 = vmul.f32 %v1603_v49, %v4505_v57  ;;  %v1662_v53 = vmul.f32 0.044715, %v1630_v41  ;;  %v1601_v4 = vmul.f32 %v4516_v3, %v4516_v3 }
 0x25d   : > { %v1725_v7 = vmul.f32 0.7978846, %v1693_v62  ;;  %v1525_v59 = vpop.f32.mrf.mxu0  ;;  %v1815_v52 = vmul.f32 0.5, %v1783_v32  ;;  %v1781_v21 = vadd.f32 1.0, %v3514_v0  ;;  %3527 = vtanh.f32 %v1727_v2 }
 0x25e   : > { %v3516_v17 = vpop.eup %3515  ;;  %v1728_v1 = vmul.f32 0.7978846, %v1696_v61  ;;  %v1694_v20 = vadd.f32 %v1662_v53, %v4502_v50  ;;  %v1667_v45 = vmul.f32 0.044715, %v1635_v51  ;;  %v1633_v30 = vmul.f32 %v1601_v4, %v4516_v3 }
 0x25f   : > { %v3518_v19 = vpop.eup %3517  ;;  %v3310_v27 = vpop.f32.mrf.mxu0  ;;  %3529 = vtanh.f32 %v1725_v7  ;;  %v4524_v40 = vadd.f32 %v3307_v11, %v4393_v31  ;;  %v4527_v35 = vmul.f32 %v1811_v16, %v4396_v43  ;;  %v4530_v33 = vmul.f32 %v1812_v34, %v4407_v47 }
 0x260   : > { %v4533_v38 = vmul.f32 %v1815_v52, %v4420_v63  ;;  %v1726_v46 = vmul.f32 0.7978846, %v1694_v20  ;;  %v1665_v23 = vmul.f32 0.044715, %v1633_v30  ;;  %v4538_v5 = vadd.f32 %v4393_v31, %v1525_v59 }
 0x261   : > { %v3520_v26 = vpop.eup %3519  ;;  %v1538_v25 = vpop.f32.mrf.mxu0  ;;  %v1604_v55 = vmul.f32 %v4524_v40, %v4524_v40  ;;  %v1813_v48 = vmul.f32 0.5, %v1781_v21  ;;  %v1784_v12 = vadd.f32 1.0, %v3516_v17  ;;  %v1782_v43 = vadd.f32 1.0, %v3518_v19 }
 0x262   : > { %3531 = vtanh.f32 %v1728_v1  ;;  %v1699_v47 = vadd.f32 %v1667_v45, %v4505_v57  ;;  %v1697_v54 = vadd.f32 %v1665_v23, %v4516_v3  ;;  %v1602_v29 = vmul.f32 %v4538_v5, %v4538_v5 }
 0x263   : > { %v3522_v24 = vpop.eup %3521  ;;  %v3311_v58 = vpop.f32.mrf.mxu0  ;;  %v1636_v63 = vmul.f32 %v1604_v55, %v4524_v40  ;;  %v1787_v62 = vadd.f32 1.0, %v3520_v26  ;;  %v4546_v0 = vadd.f32 %v3310_v27, %v4393_v31  ;;  %v1777_v2 = vadd.f32 1.0, %v4492_v15 }
 0x264   : > { %v1785_v11 = vadd.f32 1.0, %v3522_v24  ;;  %3533 = vtanh.f32 %v1726_v46  ;;  %v1729_v61 = vmul.f32 0.7978846, %v1697_v54  ;;  %v1634_v16 = vmul.f32 %v1602_v29, %v4538_v5 }
 0x265   : > { %v1541_v49 = vpop.f32.mrf.mxu0  ;;  %v3524_v32 = vpop.eup %3523  ;;  %v1668_v41 = vmul.f32 0.044715, %v1636_v63  ;;  %v4551_v59 = vmul.f32 %v1813_v48, %v4427_v10  ;;  %v1607_v17 = vmul.f32 %v4546_v0, %v4546_v0  ;;  %v1778_v34 = vadd.f32 1.0, %v4498_v37 }
 0x266   : > { %v1809_v52 = vmul.f32 0.5, %v1777_v2  ;;  %v1816_v53 = vmul.f32 0.5, %v1784_v12  ;;  %v1814_v4 = vmul.f32 0.5, %v1782_v43  ;;  %v1788_v19 = vadd.f32 1.0, %v3524_v32 }
 0x267   : > { %v3314_v7 = vpop.f32.mrf.mxu0  ;;  %v1731_v15 = vmul.f32 0.7978846, %v1699_v47  ;;  %v1700_v21 = vadd.f32 %v1668_v41, %v4524_v40  ;;  %v1666_v1 = vmul.f32 0.044715, %v1634_v16  ;;  %v1639_v20 = vmul.f32 %v1607_v17, %v4546_v0 }
 0x268   : > { %v3526_v51 = vpop.eup %3525  ;;  %v1810_v26 = vmul.f32 0.5, %v1778_v34  ;;  %v1819_v45 = vmul.f32 0.5, %v1787_v62  ;;  %v1817_v10 = vmul.f32 0.5, %v1785_v11  ;;  %3535 = vtanh.f32 %v1729_v61 }
 0x269   : > { %v1554_v27 = vpop.f32.mrf.mxu0  ;;  %v1786_v30 = vadd.f32 1.0, %v3526_v51  ;;  %v1698_v24 = vadd.f32 %v1666_v1, %v4538_v5  ;;  %v1841_v37 = vmul.f32 %v1809_v52, %v4401_v28  ;;  %v4562_v23 = vadd.f32 %v4393_v31, %v1538_v25 }
 0x26a   : > { %v1842_v46 = vmul.f32 %v1810_v26, %v4413_v13  ;;  %v3528_v48 = vpop.eup %3527  ;;  %v1848_v12 = vmul.f32 %v1816_v53, %v4434_v6  ;;  %v1846_v43 = vmul.f32 %v1814_v4, %v4438_v22  ;;  %v1820_v47 = vmul.f32 0.5, %v1788_v19 }
 0x26b   : > { %v3315_v55 = vpop.f32.mrf.mxu0  ;;  %3537 = vtanh.f32 %v1731_v15  ;;  %v1732_v63 = vmul.f32 0.7978846, %v1700_v21  ;;  %v1730_v29 = vmul.f32 0.7978846, %v1698_v24  ;;  %v1671_v32 = vmul.f32 0.044715, %v1639_v20 }
 0x26c   : > { %v3530_v54 = vpop.eup %3529  ;;  %v1905_v62 = vpack.c.bf16 %v1842_v46, %v1841_v37  ;;  %v4567_v28 = vmul.f32 %v1819_v45, %v4446_v8  ;;  %v1818_v13 = vmul.f32 0.5, %v1786_v30  ;;  %v1605_v25 = vmul.f32 %v4562_v23, %v4562_v23 }
 0x26d   : > { %v1906_v11 = vpack.c.bf16 %v4530_v33, %v4527_v35  ;;  %v4574_v6 = vmul.f32 %v1817_v10, %v4454_v44  ;;  %v1791_v22 = vadd.f32 1.0, %v3528_v48  ;;  %3539 = vtanh.f32 %v1730_v29  ;;  %v1557_v61 = vpop.f32.mrf.mxu0 }
 0x26e   : > { %3328 = vmatprep.mubr.msk.bf16.mxu1 %vm1953_vm3, %v1905_v62  ;;  %v4578_v2 = vadd.f32 %v3311_v58, %v4393_v31  ;;  %v1789_v41 = vadd.f32 1.0, %v3530_v54  ;;  %v1637_v16 = vmul.f32 %v1605_v25, %v4562_v23  ;;  %v4583_v51 = vadd.f32 %v4393_v31, %v1541_v49 }
 0x26f   : > { %v3532_v8 = vpop.eup %3531  ;;  %3329 = vmatmul.mubr.msk.bf16.vlgmr.msra.gmra.mxu1 %vm1953_vm3, %v1906_v11  ;;  %v4586_v44 = vadd.f32 %v3314_v7, %v4393_v31  ;;  %v4589_v35 = vmul.f32 %v1820_v47, %v4461_v60  ;;  %3541 = vtanh.f32 %v1732_v63  ;;  %v1703_v33 = vadd.f32 %v1671_v32, %v4546_v0  ;;  %v3318_v15 = vpop.f32.mrf.mxu0 }
 0x270   : > { %v1608_v58 = vmul.f32 %v4578_v2, %v4578_v2  ;;  %v4595_v17 = vmul.f32 %v1818_v13, %v4469_v9  ;;  %v1669_v34 = vmul.f32 0.044715, %v1637_v16  ;;  %v1606_v49 = vmul.f32 %v4583_v51, %v4583_v51 }
 0x271   : > { %v1611_v7 = vmul.f32 %v4586_v44, %v4586_v44  ;;  %v3534_v52 = vpop.eup %3533  ;;  %v1792_v53 = vadd.f32 1.0, %v3532_v8  ;;  %v1907_v4 = vpack.c.bf16 %v1846_v43, %v4551_v59  ;;  %v4604_v19 = vadd.f32 %v4393_v31, %v1554_v27  ;;  %v1570_v63 = vpop.f32.mrf.mxu0 }
 0x272   : > { %v1640_v60 = vmul.f32 %v1608_v58, %v4578_v2  ;;  %v4606_v21 = vmul.f32 0.5, %v1791_v22  ;;  %v1821_v9 = vmul.f32 0.5, %v1789_v41  ;;  %v1701_v1 = vadd.f32 %v1669_v34, %v4562_v23 }
 0x273   : > { %v1638_v20 = vmul.f32 %v1606_v49, %v4583_v51  ;;  %v1735_v26 = vmul.f32 0.7978846, %v1703_v33  ;;  %v1643_v10 = vmul.f32 %v1611_v7, %v4586_v44  ;;  %3332 = vmatprep.mubr.msk.bf16.mxu1 %vm1953_vm3, %v1907_v4  ;;  %v1609_v59 = vmul.f32 %v4604_v19, %v4604_v19  ;;  %v3319_v16 = vpop.f32.mrf.mxu0 }
 0x274   : > { %v1672_v45 = vmul.f32 0.044715, %v1640_v60  ;;  %v1790_v30 = vadd.f32 1.0, %v3534_v52  ;;  %v1733_v27 = vmul.f32 0.7978846, %v1701_v1  ;;  %v1908_v37 = vpack.c.bf16 %v1848_v12, %v4533_v38 }
 0x275   : > { %v1670_v24 = vmul.f32 0.044715, %v1638_v20  ;;  %v3536_v46 = vpop.eup %3535  ;;  %v1824_v48 = vmul.f32 0.5, %v1792_v53  ;;  %v1641_v47 = vmul.f32 %v1609_v59, %v4604_v19  ;;  %v4618_v54 = vadd.f32 %v3315_v55, %v4393_v31 }
 0x276   : > { %v1704_v43 = vadd.f32 %v1672_v45, %v4578_v2  ;;  %v4621_v29 = vmul.f32 %v1821_v9, %v4483_v42  ;;  %3543 = vtanh.f32 %v1733_v27  ;;  %v4626_v38 = vadd.f32 %v4393_v31, %v1557_v61 }
 0x277   : > { %v1702_v32 = vadd.f32 %v1670_v24, %v4583_v51  ;;  %3333 = vmatmul.mubr.msk.bf16.gmra.mxu1 %vm1953_vm3, %v1908_v37  ;;  %v1675_v13 = vmul.f32 0.044715, %v1643_v10  ;;  %v1673_v25 = vmul.f32 0.044715, %v1641_v47  ;;  %v1612_v55 = vmul.f32 %v4618_v54, %v4618_v54  ;;  %v1573_v10 = vpop.f32.mrf.mxu0 }
 0x278   : > { %v3538_v12 = vpop.eup %3537  ;;  %v1736_v62 = vmul.f32 0.7978846, %v1704_v43  ;;  %v1822_v11 = vmul.f32 0.5, %v1790_v30  ;;  %3545 = vtanh.f32 %v1735_v26  ;;  %v1610_v42 = vmul.f32 %v4626_v38, %v4626_v38 }
 0x279   : > { %v1734_v22 = vmul.f32 0.7978846, %v1702_v32  ;;  %v1793_v8 = vadd.f32 1.0, %v3536_v46  ;;  %v1705_v41 = vadd.f32 %v1673_v25, %v4604_v19  ;;  %v1644_v61 = vmul.f32 %v1612_v55, %v4618_v54 }
 0x27a   : > { %3547 = vtanh.f32 %v1736_v62  ;;  %v3540_v33 = vpop.eup %3539  ;;  %v4635_v58 = vmul.f32 %v1824_v48, %v4486_v18  ;;  %v1642_v34 = vmul.f32 %v1610_v42, %v4626_v38  ;;  %v4639_v49 = vadd.f32 %v3318_v15, %v4393_v31 }
 0x27b   : > { %3549 = vtanh.f32 %v1734_v22  ;;  %v1794_v7 = vadd.f32 1.0, %v3540_v33  ;;  %v1707_v52 = vadd.f32 %v1675_v13, %v4586_v44  ;;  %v1737_v53 = vmul.f32 0.7978846, %v1705_v41 }
 0x27c   : > { %v1676_v60 = vmul.f32 0.044715, %v1644_v61  ;;  %v3542_v4 = vpop.eup %3541  ;;  %v1854_v9 = vmul.f32 %v1822_v11, %v4502_v50  ;;  %v1674_v1 = vmul.f32 0.044715, %v1642_v34  ;;  %v1615_v20 = vmul.f32 %v4639_v49, %v4639_v49 }
 0x27d   : > { %v1909_v18 = vpack.c.bf16 %v4595_v17, %v4574_v6  ;;  %v1825_v26 = vmul.f32 0.5, %v1793_v8  ;;  %v1826_v45 = vmul.f32 0.5, %v1794_v7  ;;  %3551 = vtanh.f32 %v1737_v53 }
 0x27e   : > { %v1708_v15 = vadd.f32 %v1676_v60, %v4618_v54  ;;  %v1706_v59 = vadd.f32 %v1674_v1, %v4626_v38  ;;  %v1647_v30 = vmul.f32 %v1615_v20, %v4639_v49  ;;  %v4652_v50 = vadd.f32 %v4393_v31, %v1570_v63 }
 0x27f   : > { %3336 = vmatprep.mubr.msk.bf16.mxu1 %vm1953_vm3, %v1909_v18  ;;  %v1910_v27 = vpack.c.bf16 %v4589_v35, %v4567_v28  ;;  %v1796_v24 = vadd.f32 1.0, %v3542_v4  ;;  %v1739_v6 = vmul.f32 0.7978846, %v1707_v52  ;;  %v4657_v37 = vadd.f32 %v3319_v16, %v4393_v31 }
 0x280   : > { %v1740_v17 = vmul.f32 0.7978846, %v1708_v15  ;;  %v1738_v46 = vmul.f32 0.7978846, %v1706_v59  ;;  %v1679_v48 = vmul.f32 0.044715, %v1647_v30  ;;  %v1613_v43 = vmul.f32 %v4652_v50, %v4652_v50 }
 0x281   : > { %3337 = vmatmul.mubr.msk.bf16.gmra.mxu1 %vm1953_vm3, %v1910_v27  ;;  %v4663_v47 = vadd.f32 %v4393_v31, %v1573_v10  ;;  %v1858_v63 = vmul.f32 %v1826_v45, %v4538_v5  ;;  %v1616_v28 = vmul.f32 %v4657_v37, %v4657_v37  ;;  %v1911_v35 = vpack.c.bf16 %v1854_v9, %v4621_v29 }
 0x282   : > { %3553 = vtanh.f32 %v1740_v17  ;;  %v1711_v32 = vadd.f32 %v1679_v48, %v4639_v49  ;;  %v1645_v62 = vmul.f32 %v1613_v43, %v4652_v50  ;;  %v1855_v31 = vmul.f32 %v4606_v21, %v4476_v39 }
 0x283   : > { %3555 = vtanh.f32 %v1738_v46  ;;  %v1614_v13 = vmul.f32 %v4663_v47, %v4663_v47  ;;  %v3544_v25 = vpop.eup %3543  ;;  %v1795_v55 = vadd.f32 1.0, %v3538_v12  ;;  %v1857_v5 = vmul.f32 %v1825_v26, %v4516_v3  ;;  %3340 = vmatprep.mubr.msk.bf16.mxu1 %vm1953_vm3, %v1911_v35 }
 0x284   : > { %v1648_v11 = vmul.f32 %v1616_v28, %v4657_v37  ;;  %v1797_v29 = vadd.f32 1.0, %v3544_v25  ;;  %3557 = vtanh.f32 %v1739_v6  ;;  %v1677_v22 = vmul.f32 0.044715, %v1645_v62 }
 0x285   : > { %v1646_v42 = vmul.f32 %v1614_v13, %v4663_v47  ;;  %v3546_v8 = vpop.eup %3545  ;;  %v1828_v41 = vmul.f32 0.5, %v1796_v24  ;;  %v1743_v61 = vmul.f32 0.7978846, %v1711_v32  ;;  %v1913_v33 = vpack.c.bf16 %v1858_v63, %v1857_v5 }
 0x286   : > { %v1680_v16 = vmul.f32 0.044715, %v1648_v11  ;;  %v1709_v39 = vadd.f32 %v1677_v22, %v4652_v50  ;;  %v1912_v3 = vpack.c.bf16 %v4635_v58, %v1855_v31  ;;  %v1827_v7 = vmul.f32 0.5, %v1795_v55 }
 0x287   : > { %v3548_v34 = vpop.eup %3547  ;;  %v1678_v21 = vmul.f32 0.044715, %v1646_v42  ;;  %v1829_v53 = vmul.f32 0.5, %v1797_v29  ;;  %v1860_v1 = vmul.f32 %v1828_v41, %v4524_v40  ;;  %3559 = vtanh.f32 %v1743_v61 }
 0x288   : > { %v3550_v12 = vpop.eup %3549  ;;  %v1712_v52 = vadd.f32 %v1680_v16, %v4657_v37  ;;  %v1741_v4 = vmul.f32 0.7978846, %v1709_v39  ;;  %v1800_v26 = vadd.f32 1.0, %v3548_v34  ;;  %v1859_v15 = vmul.f32 %v1827_v7, %v4505_v57 }
 0x289   : > { %v1798_v60 = vadd.f32 1.0, %v3550_v12  ;;  %v1710_v9 = vadd.f32 %v1678_v21, %v4663_v47  ;;  %3341 = vmatmul.mubr.msk.bf16.gmra.mxu1 %vm1953_vm3, %v1912_v3  ;;  %v1799_v10 = vadd.f32 1.0, %v3546_v8  ;;  %v1861_v59 = vmul.f32 %v1829_v53, %v4562_v23 }
 0x28a   : > { %v1744_v20 = vmul.f32 0.7978846, %v1712_v52  ;;  %3344 = vmatprep.mubr.msk.bf16.mxu1 %vm1953_vm3, %v1913_v33  ;;  %v3552_v18 = vpop.eup %3551  ;;  %3561 = vtanh.f32 %v1741_v4  ;;  %v1832_v24 = vmul.f32 0.5, %v1800_v26  ;;  %v1914_v6 = vpack.c.bf16 %v1860_v1, %v1859_v15  ;;  %v1873_v52 = vld [vmem:[#allocation4] sm:$0xff]  ;;  %v2233_v15 = vld [vmem:[#allocation2 + $0x10] sm:$0xff] }
 0x28b   : > { %v1830_v58 = vmul.f32 0.5, %v1798_v60  ;;  %v1742_v45 = vmul.f32 0.7978846, %v1710_v9  ;;  %v1801_v27 = vadd.f32 1.0, %v3552_v18  ;;  %v1831_v48 = vmul.f32 0.5, %v1799_v10  ;;  %v1874_v9 = vld [vmem:[#allocation4 + $0x8] sm:$0xff] }
 0x28c   : > { %3563 = vtanh.f32 %v1744_v20  ;;  %v1864_v57 = vmul.f32 %v1832_v24, %v4578_v2  ;;  %v2329_v1 = vsub.s32 2, %v4195_v14  ;;  %v2230_v18 = vld [vmem:[%s3784_s17] sm:$0x7] }
 0x28d   : > { %v1862_v30 = vmul.f32 %v1830_v58, %v4583_v51  ;;  %3565 = vtanh.f32 %v1742_v45  ;;  %v1833_v43 = vmul.f32 0.5, %v1801_v27  ;;  %v1863_v51 = vmul.f32 %v1831_v48, %v4546_v0  ;;  %v1879_v58 = vld [vmem:[#allocation4 + $0x30] sm:$0xff]  ;;  %v2231_v24 = vld [vmem:[#allocation2] sm:$0xff] }
 0x28f   : > { %v3554_v40 = vpop.eup %3553  ;;  %v1915_v17 = vpack.c.bf16 %v1862_v30, %v1861_v59  ;;  %v1865_v62 = vmul.f32 %v1833_v43, %v4604_v19  ;;  %v1916_v55 = vpack.c.bf16 %v1864_v57, %v1863_v51  ;;  %v1877_v59 = vld [vmem:[#allocation4 + $0x20] sm:$0xff]  ;;  %v4717_v30 = vrot.slane %v2230_v18, %v2329_v1  ;;  %v1878_v57 = vld [vmem:[#allocation4 + $0x28] sm:$0xff] }
 0x290   : > { %v3556_v46 = vpop.eup %3555  ;;  %v1804_v23 = vadd.f32 1.0, %v3554_v40 }
 0x291   : > { %v1802_v63 = vadd.f32 1.0, %v3556_v46  ;;  %3345 = vmatmul.mubr.msk.bf16.gmra.mxu1 %vm1953_vm3, %v1914_v6  ;;  %v3558_v28 = vpop.eup %3557 }
 0x292   : > { %3348 = vmatprep.mubr.msk.bf16.mxu1 %vm1953_vm3, %v1915_v17  ;;  %v1803_v32 = vadd.f32 1.0, %v3558_v28  ;;  %v1836_v31 = vmul.f32 0.5, %v1804_v23  ;;  %v1880_v17 = vld [vmem:[#allocation4 + $0x38] sm:$0xff] }
 0x293   : > { %v1834_v35 = vmul.f32 0.5, %v1802_v63  ;;  %v2234_v63 = vld [vmem:[#allocation2 + $0x18] sm:$0xff] }
 0x294   : > { %v3560_v25 = vpop.eup %3559  ;;  %v1835_v22 = vmul.f32 0.5, %v1803_v32  ;;  %v1868_v0 = vmul.f32 %v1836_v31, %v4618_v54 }
 0x295   : > { %v1866_v13 = vmul.f32 %v1834_v35, %v4626_v38  ;;  %v1807_v61 = vadd.f32 1.0, %v3560_v25 }
 0x296   : > { %v1867_v38 = vmul.f32 %v1835_v22, %v4586_v44 }
 0x297   : > { %v1917_v5 = vpack.c.bf16 %v1866_v13, %v1865_v62  ;;  %v3562_v11 = vpop.eup %3561  ;;  %v1839_v3 = vmul.f32 0.5, %v1807_v61  ;;  %v2232_v62 = vld [vmem:[#allocation2 + $0x8] sm:$0xff] }
 0x298   : > { %v1805_v42 = vadd.f32 1.0, %v3562_v11  ;;  %v1918_v21 = vpack.c.bf16 %v1868_v0, %v1867_v38  ;;  %v2237_v11 = vld [vmem:[#allocation2 + $0x30] sm:$0xff]  ;;  %v2235_v0 = vld [vmem:[#allocation2 + $0x20] sm:$0xff] }
 0x299   : > { %v3564_v29 = vpop.eup %3563  ;;  %3349 = vmatmul.mubr.msk.bf16.gmra.mxu1 %vm1953_vm3, %v1916_v55  ;;  %v1871_v7 = vmul.f32 %v1839_v3, %v4639_v49 }
 0x29a   : > { %v3566_v2 = vpop.eup %3565  ;;  %3352 = vmatprep.mubr.msk.bf16.mxu1 %vm1953_vm3, %v1917_v5  ;;  %v1837_v8 = vmul.f32 0.5, %v1805_v42  ;;  %v1808_v41 = vadd.f32 1.0, %v3564_v29  ;;  %v1883_v29 = vld [vmem:[#allocation4 + $0x50] sm:$0xff] }
 0x29b   : > { %v1806_v19 = vadd.f32 1.0, %v3566_v2 }
 0x29c   : > { %v1869_v33 = vmul.f32 %v1837_v8, %v4652_v50  ;;  %v1840_v34 = vmul.f32 0.5, %v1808_v41  ;;  %v1875_v50 = vld [vmem:[#allocation4 + $0x10] sm:$0xff]  ;;  %v1881_v41 = vld [vmem:[#allocation4 + $0x40] sm:$0xff] }
 0x29d   : > { %v1838_v16 = vmul.f32 0.5, %v1806_v19 }
 0x29e   : > { %v1872_v54 = vmul.f32 %v1840_v34, %v4657_v37  ;;  %v1876_v37 = vld [vmem:[#allocation4 + $0x18] sm:$0xff] }
 0x29f   : > { %v1870_v39 = vmul.f32 %v1838_v16, %v4663_v47 }
 0x2a0   : > { %v1920_v44 = vpack.c.bf16 %v1872_v54, %v1871_v7  ;;  %v2236_v7 = vld [vmem:[#allocation2 + $0x28] sm:$0xff] }
 0x2a1   : > { %3353 = vmatmul.mubr.msk.bf16.gmra.mxu1 %vm1953_vm3, %v1918_v21  ;;  %v1919_v12 = vpack.c.bf16 %v1870_v39, %v1869_v33  ;;  %v2238_v33 = vld [vmem:[#allocation2 + $0x38] sm:$0xff] }
 0x2a2   : > { %v1884_v39 = vld [vmem:[#allocation4 + $0x58] sm:$0xff] }
 0x2a3   : > { %3356 = vmatprep.mubr.msk.bf16.mxu1 %vm1953_vm3, %v1919_v12 }
 0x2a9   : > { %3357 = vmatmul.mubr.msk.bf16.gmra.mxu1 %vm1953_vm3, %v1920_v44 }
 0x32f   : > { %v3330_v47 = vpop.f32.mrf.mxu1 }
 0x330   : > { %v2165_v53 = vadd.f32 %v3330_v47, %v1875_v50  ;;  %v1882_v50 = vld [vmem:[#allocation4 + $0x48] sm:$0xff] }
 0x331   : > { %v2036_v60 = vpop.f32.mrf.mxu1 }
 0x332   : > { %2197 = vst.msk [vmem:[#allocation4 + $0x10] sm:$0xff] %vm557_vm1, %v2165_v53  ;;  %v2163_v4 = vadd.f32 %v2036_v60, %v1873_v52 }
 0x333   : > { %v3331_v49 = vpop.f32.mrf.mxu1 }
 0x334   : > { %2195 = vst.msk [vmem:[#allocation4] sm:$0xff] %vm557_vm1, %v2163_v4  ;;  %v2166_v20 = vadd.f32 %v3331_v49, %v1876_v37  ;;  %v1887_v4 = vld [vmem:[#allocation4 + $0x70] sm:$0xff] }
 0x335   : > { %v2039_v26 = vpop.f32.mrf.mxu1 }
 0x336   : > { %2198 = vst.msk [vmem:[#allocation4 + $0x18] sm:$0xff] %vm557_vm1, %v2166_v20  ;;  %v2164_v45 = vadd.f32 %v2039_v26, %v1874_v9  ;;  %v2241_v20 = vld [vmem:[#allocation2 + $0x50] sm:$0xff]  ;;  %v1885_v26 = vld [vmem:[#allocation4 + $0x60] sm:$0xff] }
 0x337   : > { %v3334_v10 = vpop.f32.mrf.mxu1 }
 0x338   : > { %2196 = vst.msk [vmem:[#allocation4 + $0x8] sm:$0xff] %vm557_vm1, %v2164_v45  ;;  %v2169_v27 = vadd.f32 %v3334_v10, %v1879_v58  ;;  %v2239_v10 = vld [vmem:[#allocation2 + $0x40] sm:$0xff] }
 0x339   : > { %v2265_v40 = vld [vmem:[#allocation4 + $0x10] sm:$0xff]  ;;  %v2052_v6 = vpop.f32.mrf.mxu1 }
 0x33a   : > { %v2297_v46 = vadd.f32 %v2265_v40, %v2233_v15  ;;  %2201 = vst.msk [vmem:[#allocation4 + $0x30] sm:$0xff] %vm557_vm1, %v2169_v27  ;;  %v2167_v48 = vadd.f32 %v2052_v6, %v1877_v59  ;;  %v1888_v27 = vld [vmem:[#allocation4 + $0x78] sm:$0xff] }
 0x33b   : > { %v2263_v43 = vld [vmem:[#allocation4] sm:$0xff]  ;;  %v3335_v28 = vpop.f32.mrf.mxu1 }
 0x33c   : > { %v2333_v23 = vadd.f32 %v4717_v30, %v2297_v46  ;;  %v2295_v35 = vadd.f32 %v2263_v43, %v2231_v24  ;;  %2199 = vst.msk [vmem:[#allocation4 + $0x20] sm:$0xff] %vm557_vm1, %v2167_v48  ;;  %v2170_v51 = vadd.f32 %v3335_v28, %v1880_v17  ;;  %v2242_v17 = vld [vmem:[#allocation2 + $0x58] sm:$0xff]  ;;  %v1886_v48 = vld [vmem:[#allocation4 + $0x68] sm:$0xff] }
 0x33d   : > { %v2266_v32 = vld [vmem:[#allocation4 + $0x18] sm:$0xff]  ;;  %v2055_v13 = vpop.f32.mrf.mxu1 }
 0x33e   : > { %2365 = vst.msk [vmem:[#allocation2 + $0x10] sm:$0xff] %vm557_vm1, %v2333_v23  ;;  %v2331_v25 = vadd.f32 %v4717_v30, %v2295_v35  ;;  %v2298_v31 = vadd.f32 %v2266_v32, %v2234_v63  ;;  %2202 = vst.msk [vmem:[#allocation4 + $0x38] sm:$0xff] %vm557_vm1, %v2170_v51  ;;  %v2168_v55 = vadd.f32 %v2055_v13, %v1878_v57  ;;  %v2240_v23 = vld [vmem:[#allocation2 + $0x48] sm:$0xff]  ;;  %v1891_v51 = vld [vmem:[#allocation4 + $0x90] sm:$0xff] }
 0x33f   : > { %v2264_v5 = vld [vmem:[#allocation4 + $0x8] sm:$0xff] }
 0x340   : > { %2363 = vst.msk [vmem:[#allocation2] sm:$0xff] %vm557_vm1, %v2331_v25  ;;  %v2334_v22 = vadd.f32 %v4717_v30, %v2298_v31  ;;  %v2296_v42 = vadd.f32 %v2264_v5, %v2232_v62  ;;  %2200 = vst.msk [vmem:[#allocation4 + $0x28] sm:$0xff] %vm557_vm1, %v2168_v55  ;;  %v2245_v31 = vld [vmem:[#allocation2 + $0x70] sm:$0xff]  ;;  %v1889_v5 = vld [vmem:[#allocation4 + $0x80] sm:$0xff] }
 0x341   : > { %v2269_v2 = vld [vmem:[#allocation4 + $0x30] sm:$0xff]  ;;  %v3338_v8 = vpop.f32.mrf.mxu1 }
 0x342   : > { %2366 = vst.msk [vmem:[#allocation2 + $0x18] sm:$0xff] %vm557_vm1, %v2334_v22  ;;  %v2332_v19 = vadd.f32 %v4717_v30, %v2296_v42  ;;  %v2301_v38 = vadd.f32 %v2269_v2, %v2237_v11  ;;  %v2173_v61 = vadd.f32 %v3338_v8, %v1883_v29  ;;  %v2243_v2 = vld [vmem:[#allocation2 + $0x60] sm:$0xff]  ;;  %v1892_v8 = vld [vmem:[#allocation4 + $0x98] sm:$0xff] }
 0x343   : > { %v2267_v16 = vld [vmem:[#allocation4 + $0x20] sm:$0xff]  ;;  %v2068_v34 = vpop.f32.mrf.mxu1 }
 0x344   : > { %2364 = vst.msk [vmem:[#allocation2 + $0x8] sm:$0xff] %vm557_vm1, %v2332_v19  ;;  %v2337_v21 = vadd.f32 %v4717_v30, %v2301_v38  ;;  %v2299_v3 = vadd.f32 %v2267_v16, %v2235_v0  ;;  %2205 = vst.msk [vmem:[#allocation4 + $0x50] sm:$0xff] %vm557_vm1, %v2173_v61  ;;  %v2171_v12 = vadd.f32 %v2068_v34, %v1881_v41  ;;  %v2246_v16 = vld [vmem:[#allocation2 + $0x78] sm:$0xff]  ;;  %v1890_v34 = vld [vmem:[#allocation4 + $0x88] sm:$0xff] }
 0x345   : > { %v2270_v54 = vld [vmem:[#allocation4 + $0x38] sm:$0xff]  ;;  %v3339_v44 = vpop.f32.mrf.mxu1 }
 0x346   : > { %2369 = vst.msk [vmem:[#allocation2 + $0x30] sm:$0xff] %vm557_vm1, %v2337_v21  ;;  %v2335_v47 = vadd.f32 %v4717_v30, %v2299_v3  ;;  %v2302_v52 = vadd.f32 %v2270_v54, %v2238_v33  ;;  %2203 = vst.msk [vmem:[#allocation4 + $0x40] sm:$0xff] %vm557_vm1, %v2171_v12  ;;  %v2174_v53 = vadd.f32 %v3339_v44, %v1884_v39  ;;  %v2244_v54 = vld [vmem:[#allocation2 + $0x68] sm:$0xff]  ;;  %v1895_v44 = vld [vmem:[#allocation4 + $0xb0] sm:$0xff] }
 0x347   : > { %v2268_v60 = vld [vmem:[#allocation4 + $0x28] sm:$0xff]  ;;  %v2071_v37 = vpop.f32.mrf.mxu1 }
 0x348   : > { %2367 = vst.msk [vmem:[#allocation2 + $0x20] sm:$0xff] %vm557_vm1, %v2335_v47  ;;  %v2338_v49 = vadd.f32 %v4717_v30, %v2302_v52  ;;  %v2300_v9 = vadd.f32 %v2268_v60, %v2236_v7  ;;  %2206 = vst.msk [vmem:[#allocation4 + $0x58] sm:$0xff] %vm557_vm1, %v2174_v53  ;;  %v2172_v1 = vadd.f32 %v2071_v37, %v1882_v50  ;;  %v2249_v60 = vld [vmem:[#allocation2 + $0x90] sm:$0xff] }
 0x349   : > { %v3342_v18 = vpop.f32.mrf.mxu1 }
 0x34a   : > { %2370 = vst.msk [vmem:[#allocation2 + $0x38] sm:$0xff] %vm557_vm1, %v2338_v49  ;;  %v2336_v58 = vadd.f32 %v4717_v30, %v2300_v9  ;;  %2204 = vst.msk [vmem:[#allocation4 + $0x48] sm:$0xff] %vm557_vm1, %v2172_v1  ;;  %v2177_v45 = vadd.f32 %v3342_v18, %v1887_v4  ;;  %v1893_v4 = vld [vmem:[#allocation4 + $0xa0] sm:$0xff] }
 0x34b   : > { %v2273_v15 = vld [vmem:[#allocation4 + $0x50] sm:$0xff]  ;;  %v2084_v59 = vpop.f32.mrf.mxu1  ;;  %v2247_v18 = vld [vmem:[#allocation2 + $0x80] sm:$0xff] }
 0x34c   : > { %2368 = vst.msk [vmem:[#allocation2 + $0x28] sm:$0xff] %vm557_vm1, %v2336_v58  ;;  %v2305_v40 = vadd.f32 %v2273_v15, %v2241_v20  ;;  %2209 = vst.msk [vmem:[#allocation4 + $0x70] sm:$0xff] %vm557_vm1, %v2177_v45  ;;  %v2175_v24 = vadd.f32 %v2084_v59, %v1885_v26  ;;  %v1896_v58 = vld [vmem:[#allocation4 + $0xb8] sm:$0xff] }
 0x34d   : > { %v2271_v6 = vld [vmem:[#allocation4 + $0x40] sm:$0xff]  ;;  %v3343_v46 = vpop.f32.mrf.mxu1 }
 0x34e   : > { %v2341_v43 = vadd.f32 %v4717_v30, %v2305_v40  ;;  %v2303_v63 = vadd.f32 %v2271_v6, %v2239_v10  ;;  %2207 = vst.msk [vmem:[#allocation4 + $0x60] sm:$0xff] %vm557_vm1, %v2175_v24  ;;  %v2178_v28 = vadd.f32 %v3343_v46, %v1888_v27  ;;  %v2250_v27 = vld [vmem:[#allocation2 + $0x98] sm:$0xff]  ;;  %v1894_v24 = vld [vmem:[#allocation4 + $0xa8] sm:$0xff] }
 0x34f   : > { %v2274_v57 = vld [vmem:[#allocation4 + $0x58] sm:$0xff]  ;;  %v2087_v35 = vpop.f32.mrf.mxu1 }
 0x350   : > { %2373 = vst.msk [vmem:[#allocation2 + $0x50] sm:$0xff] %vm557_vm1, %v2341_v43  ;;  %v2339_v32 = vadd.f32 %v4717_v30, %v2303_v63  ;;  %v2306_v62 = vadd.f32 %v2274_v57, %v2242_v17  ;;  %2210 = vst.msk [vmem:[#allocation4 + $0x78] sm:$0xff] %vm557_vm1, %v2178_v28  ;;  %v2176_v13 = vadd.f32 %v2087_v35, %v1886_v48  ;;  %v2248_v43 = vld [vmem:[#allocation2 + $0x88] sm:$0xff]  ;;  %v1899_v28 = vld [vmem:[#allocation4 + $0xd0] sm:$0xff] }
 0x351   : > { %v2272_v25 = vld [vmem:[#allocation4 + $0x48] sm:$0xff]  ;;  %v3346_v55 = vpop.f32.mrf.mxu1 }
 0x352   : > { %2371 = vst.msk [vmem:[#allocation2 + $0x40] sm:$0xff] %vm557_vm1, %v2339_v32  ;;  %v2342_v11 = vadd.f32 %v4717_v30, %v2306_v62  ;;  %v2304_v29 = vadd.f32 %v2272_v25, %v2240_v23  ;;  %2208 = vst.msk [vmem:[#allocation4 + $0x68] sm:$0xff] %vm557_vm1, %v2176_v13  ;;  %v2181_v22 = vadd.f32 %v3346_v55, %v1891_v51  ;;  %v2253_v32 = vld [vmem:[#allocation2 + $0xb0] sm:$0xff]  ;;  %v1897_v13 = vld [vmem:[#allocation4 + $0xc0] sm:$0xff] }
 0x353   : > { %v2277_v42 = vld [vmem:[#allocation4 + $0x70] sm:$0xff]  ;;  %v2100_v0 = vpop.f32.mrf.mxu1 }
 0x354   : > { %2374 = vst.msk [vmem:[#allocation2 + $0x58] sm:$0xff] %vm557_vm1, %v2342_v11  ;;  %v2340_v41 = vadd.f32 %v4717_v30, %v2304_v29  ;;  %v2309_v19 = vadd.f32 %v2277_v42, %v2245_v31  ;;  %2213 = vst.msk [vmem:[#allocation4 + $0x90] sm:$0xff] %vm557_vm1, %v2181_v22  ;;  %v2179_v38 = vadd.f32 %v2100_v0, %v1889_v5  ;;  %v2251_v11 = vld [vmem:[#allocation2 + $0xa0] sm:$0xff]  ;;  %v1900_v22 = vld [vmem:[#allocation4 + $0xd8] sm:$0xff] }
 0x355   : > { %v2275_v61 = vld [vmem:[#allocation4 + $0x60] sm:$0xff]  ;;  %v3347_v33 = vpop.f32.mrf.mxu1 }
 0x356   : > { %2372 = vst.msk [vmem:[#allocation2 + $0x48] sm:$0xff] %vm557_vm1, %v2340_v41  ;;  %v2345_v39 = vadd.f32 %v4717_v30, %v2309_v19  ;;  %v2307_v21 = vadd.f32 %v2275_v61, %v2243_v2  ;;  %2211 = vst.msk [vmem:[#allocation4 + $0x80] sm:$0xff] %vm557_vm1, %v2179_v38  ;;  %v2182_v3 = vadd.f32 %v3347_v33, %v1892_v8  ;;  %v2254_v41 = vld [vmem:[#allocation2 + $0xb8] sm:$0xff]  ;;  %v1898_v38 = vld [vmem:[#allocation4 + $0xc8] sm:$0xff] }
 0x357   : > { %v2278_v12 = vld [vmem:[#allocation4 + $0x78] sm:$0xff]  ;;  %v2103_v7 = vpop.f32.mrf.mxu1 }
 0x358   : > { %2377 = vst.msk [vmem:[#allocation2 + $0x70] sm:$0xff] %vm557_vm1, %v2345_v39  ;;  %v2343_v50 = vadd.f32 %v4717_v30, %v2307_v21  ;;  %v2310_v47 = vadd.f32 %v2278_v12, %v2246_v16  ;;  %2214 = vst.msk [vmem:[#allocation4 + $0x98] sm:$0xff] %vm557_vm1, %v2182_v3  ;;  %v2180_v52 = vadd.f32 %v2103_v7, %v1890_v34  ;;  %v2252_v39 = vld [vmem:[#allocation2 + $0xa8] sm:$0xff]  ;;  %v1903_v3 = vld [vmem:[#allocation4 + $0xf0] sm:$0xff] }
 0x359   : > { %v2276_v53 = vld [vmem:[#allocation4 + $0x68] sm:$0xff]  ;;  %v3350_v37 = vpop.f32.mrf.mxu1 }
 0x35a   : > { %2375 = vst.msk [vmem:[#allocation2 + $0x60] sm:$0xff] %vm557_vm1, %v2343_v50  ;;  %v2346_v49 = vadd.f32 %v4717_v30, %v2310_v47  ;;  %v2308_v9 = vadd.f32 %v2276_v53, %v2244_v54  ;;  %2212 = vst.msk [vmem:[#allocation4 + $0x88] sm:$0xff] %vm557_vm1, %v2180_v52  ;;  %v2185_v1 = vadd.f32 %v3350_v37, %v1895_v44  ;;  %v2257_v50 = vld [vmem:[#allocation2 + $0xd0] sm:$0xff]  ;;  %v1901_v52 = vld [vmem:[#allocation4 + $0xe0] sm:$0xff] }
 0x35b   : > { %v2281_v20 = vld [vmem:[#allocation4 + $0x90] sm:$0xff]  ;;  %v2116_v26 = vpop.f32.mrf.mxu1 }
 0x35c   : > { %2378 = vst.msk [vmem:[#allocation2 + $0x78] sm:$0xff] %vm557_vm1, %v2346_v49  ;;  %v2344_v45 = vadd.f32 %v4717_v30, %v2308_v9  ;;  %v2313_v15 = vadd.f32 %v2281_v20, %v2249_v60  ;;  %2217 = vst.msk [vmem:[#allocation4 + $0xb0] sm:$0xff] %vm557_vm1, %v2185_v1  ;;  %v2183_v10 = vadd.f32 %v2116_v26, %v1893_v4  ;;  %v2255_v49 = vld [vmem:[#allocation2 + $0xc0] sm:$0xff]  ;;  %v1904_v1 = vld [vmem:[#allocation4 + $0xf8] sm:$0xff] }
 0x35d   : > { %v2279_v59 = vld [vmem:[#allocation4 + $0x80] sm:$0xff]  ;;  %v3351_v40 = vpop.f32.mrf.mxu1 }
 0x35e   : > { %2376 = vst.msk [vmem:[#allocation2 + $0x68] sm:$0xff] %vm557_vm1, %v2344_v45  ;;  %v2349_v6 = vadd.f32 %v4717_v30, %v2313_v15  ;;  %v2311_v17 = vadd.f32 %v2279_v59, %v2247_v18  ;;  %2215 = vst.msk [vmem:[#allocation4 + $0xa0] sm:$0xff] %vm557_vm1, %v2183_v10  ;;  %v2186_v46 = vadd.f32 %v3351_v40, %v1896_v58  ;;  %v2258_v45 = vld [vmem:[#allocation2 + $0xd8] sm:$0xff]  ;;  %v1902_v10 = vld [vmem:[#allocation4 + $0xe8] sm:$0xff] }
 0x35f   : > { %v2282_v48 = vld [vmem:[#allocation4 + $0x98] sm:$0xff]  ;;  %v2119_v63 = vpop.f32.mrf.mxu1 }
 0x360   : > { %2381 = vst.msk [vmem:[#allocation2 + $0x90] sm:$0xff] %vm557_vm1, %v2349_v6  ;;  %v2347_v57 = vadd.f32 %v4717_v30, %v2311_v17  ;;  %v2314_v23 = vadd.f32 %v2282_v48, %v2250_v27  ;;  %2218 = vst.msk [vmem:[#allocation4 + $0xb8] sm:$0xff] %vm557_vm1, %v2186_v46  ;;  %v2184_v35 = vadd.f32 %v2119_v63, %v1894_v24  ;;  %v2256_v6 = vld [vmem:[#allocation2 + $0xc8] sm:$0xff] }
 0x361   : > { %v2280_v51 = vld [vmem:[#allocation4 + $0x88] sm:$0xff]  ;;  %v3354_v62 = vpop.f32.mrf.mxu1 }
 0x362   : > { %2379 = vst.msk [vmem:[#allocation2 + $0x80] sm:$0xff] %vm557_vm1, %v2347_v57  ;;  %v2350_v25 = vadd.f32 %v4717_v30, %v2314_v23  ;;  %v2312_v31 = vadd.f32 %v2280_v51, %v2248_v43  ;;  %2216 = vst.msk [vmem:[#allocation4 + $0xa8] sm:$0xff] %vm557_vm1, %v2184_v35  ;;  %v2189_v55 = vadd.f32 %v3354_v62, %v1899_v28  ;;  %v2261_v28 = vld [vmem:[#allocation2 + $0xf0] sm:$0xff]  ;;  %v2259_v51 = vld [vmem:[#allocation2 + $0xe0] sm:$0xff] }
 0x363   : > { %v2285_v5 = vld [vmem:[#allocation4 + $0xb0] sm:$0xff]  ;;  %v2132_v29 = vpop.f32.mrf.mxu1 }
 0x364   : > { %2382 = vst.msk [vmem:[#allocation2 + $0x98] sm:$0xff] %vm557_vm1, %v2350_v25  ;;  %v2348_v42 = vadd.f32 %v4717_v30, %v2312_v31  ;;  %v2317_v2 = vadd.f32 %v2285_v5, %v2253_v32  ;;  %2221 = vst.msk [vmem:[#allocation4 + $0xd0] sm:$0xff] %vm557_vm1, %v2189_v55  ;;  %v2187_v0 = vadd.f32 %v2132_v29, %v1897_v13  ;;  %v2262_v25 = vld [vmem:[#allocation2 + $0xf8] sm:$0xff] }
 0x365   : > { %v2283_v8 = vld [vmem:[#allocation4 + $0xa0] sm:$0xff]  ;;  %v3355_v19 = vpop.f32.mrf.mxu1 }
 0x366   : > { %2380 = vst.msk [vmem:[#allocation2 + $0x88] sm:$0xff] %vm557_vm1, %v2348_v42  ;;  %v2353_v61 = vadd.f32 %v4717_v30, %v2317_v2  ;;  %v2315_v16 = vadd.f32 %v2283_v8, %v2251_v11  ;;  %2219 = vst.msk [vmem:[#allocation4 + $0xc0] sm:$0xff] %vm557_vm1, %v2187_v0  ;;  %v2190_v33 = vadd.f32 %v3355_v19, %v1900_v22  ;;  %v2260_v11 = vld [vmem:[#allocation2 + $0xe8] sm:$0xff] }
 0x367   : > { %v2286_v34 = vld [vmem:[#allocation4 + $0xb8] sm:$0xff]  ;;  %v2135_v21 = vpop.f32.mrf.mxu1 }
 0x368   : > { %2385 = vst.msk [vmem:[#allocation2 + $0xb0] sm:$0xff] %vm557_vm1, %v2353_v61  ;;  %v2351_v12 = vadd.f32 %v4717_v30, %v2315_v16  ;;  %v2318_v54 = vadd.f32 %v2286_v34, %v2254_v41  ;;  %2222 = vst.msk [vmem:[#allocation4 + $0xd8] sm:$0xff] %vm557_vm1, %v2190_v33  ;;  %v2188_v7 = vadd.f32 %v2135_v21, %v1898_v38 }
 0x369   : > { %v2284_v44 = vld [vmem:[#allocation4 + $0xa8] sm:$0xff]  ;;  %v3358_v47 = vpop.f32.mrf.mxu1 }
 0x36a   : > { %2383 = vst.msk [vmem:[#allocation2 + $0xa0] sm:$0xff] %vm557_vm1, %v2351_v12  ;;  %v2354_v53 = vadd.f32 %v4717_v30, %v2318_v54  ;;  %v2316_v60 = vadd.f32 %v2284_v44, %v2252_v39  ;;  %2220 = vst.msk [vmem:[#allocation4 + $0xc8] sm:$0xff] %vm557_vm1, %v2188_v7  ;;  %v2193_v37 = vadd.f32 %v3358_v47, %v1903_v3 }
 0x36b   : > { %v2289_v4 = vld [vmem:[#allocation4 + $0xd0] sm:$0xff]  ;;  %v2148_v9 = vpop.f32.mrf.mxu1 }
 0x36c   : > { %2386 = vst.msk [vmem:[#allocation2 + $0xb8] sm:$0xff] %vm557_vm1, %v2354_v53  ;;  %v2352_v20 = vadd.f32 %v4717_v30, %v2316_v60  ;;  %v2321_v18 = vadd.f32 %v2289_v4, %v2257_v50  ;;  %2225 = vst.msk [vmem:[#allocation4 + $0xf0] sm:$0xff] %vm557_vm1, %v2193_v37  ;;  %v2191_v26 = vadd.f32 %v2148_v9, %v1901_v52 }
 0x36d   : > { %v2287_v58 = vld [vmem:[#allocation4 + $0xc0] sm:$0xff]  ;;  %v3359_v15 = vpop.f32.mrf.mxu1 }
 0x36e   : > { %2384 = vst.msk [vmem:[#allocation2 + $0xa8] sm:$0xff] %vm557_vm1, %v2352_v20  ;;  %v2357_v59 = vadd.f32 %v4717_v30, %v2321_v18  ;;  %v2319_v27 = vadd.f32 %v2287_v58, %v2255_v49  ;;  %2223 = vst.msk [vmem:[#allocation4 + $0xe0] sm:$0xff] %vm557_vm1, %v2191_v26  ;;  %v2194_v40 = vadd.f32 %v3359_v15, %v1904_v1 }
 0x36f   : > { %v2290_v24 = vld [vmem:[#allocation4 + $0xd8] sm:$0xff]  ;;  %v2151_v17 = vpop.f32.mrf.mxu1 }
 0x370   : > { %2389 = vst.msk [vmem:[#allocation2 + $0xd0] sm:$0xff] %vm557_vm1, %v2357_v59  ;;  %v2355_v46 = vadd.f32 %v4717_v30, %v2319_v27  ;;  %v2322_v48 = vadd.f32 %v2290_v24, %v2258_v45  ;;  %2226 = vst.msk [vmem:[#allocation4 + $0xf8] sm:$0xff] %vm557_vm1, %v2194_v40  ;;  %v2192_v43 = vadd.f32 %v2151_v17, %v1902_v10 }
 0x371   : > { %v2288_v63 = vld [vmem:[#allocation4 + $0xc8] sm:$0xff] }
 0x372   : > { %2387 = vst.msk [vmem:[#allocation2 + $0xc0] sm:$0xff] %vm557_vm1, %v2355_v46  ;;  %v2358_v57 = vadd.f32 %v4717_v30, %v2322_v48  ;;  %v2320_v23 = vadd.f32 %v2288_v63, %v2256_v6  ;;  %2224 = vst.msk [vmem:[#allocation4 + $0xe8] sm:$0xff] %vm557_vm1, %v2192_v43 }
 0x373   : > { %v2293_v35 = vld [vmem:[#allocation4 + $0xf0] sm:$0xff] }
 0x374   : > { %2390 = vst.msk [vmem:[#allocation2 + $0xd8] sm:$0xff] %vm557_vm1, %v2358_v57  ;;  %v2356_v32 = vadd.f32 %v4717_v30, %v2320_v23  ;;  %v2325_v62 = vadd.f32 %v2293_v35, %v2261_v28 }
 0x375   : > { %v2291_v13 = vld [vmem:[#allocation4 + $0xe0] sm:$0xff] }
 0x376   : > { %2388 = vst.msk [vmem:[#allocation2 + $0xc8] sm:$0xff] %vm557_vm1, %v2356_v32  ;;  %v2361_v31 = vadd.f32 %v4717_v30, %v2325_v62  ;;  %v2323_v55 = vadd.f32 %v2291_v13, %v2259_v51 }
 0x377   : > { %v2294_v5 = vld [vmem:[#allocation4 + $0xf8] sm:$0xff] }
 0x378   : > { %2393 = vst.msk [vmem:[#allocation2 + $0xf0] sm:$0xff] %vm557_vm1, %v2361_v31  ;;  %v2359_v29 = vadd.f32 %v4717_v30, %v2323_v55  ;;  %v2326_v22 = vadd.f32 %v2294_v5, %v2262_v25 }
 0x379   : > { %v2292_v42 = vld [vmem:[#allocation4 + $0xe8] sm:$0xff] }
 0x37a   : > { %2391 = vst.msk [vmem:[#allocation2 + $0xe0] sm:$0xff] %vm557_vm1, %v2359_v29  ;;  %v2362_v2 = vadd.f32 %v4717_v30, %v2326_v22  ;;  %v2324_v0 = vadd.f32 %v2292_v42, %v2260_v11  ;;  %2402 = sbr.rel (%p4708_p13) target bundleno = 1269 (0x4f5), region = 60 }
 0x37c   : > { %2394 = vst.msk [vmem:[#allocation2 + $0xf8] sm:$0xff] %vm557_vm1, %v2362_v2  ;;  %v2360_v8 = vadd.f32 %v4717_v30, %v2324_v0 }
 0x37e   : > { %2392 = vst.msk [vmem:[#allocation2 + $0xe8] sm:$0xff] %vm557_vm1, %v2360_v8 }
 0x37f   : > { %v4814_v41 = vld [vmem:[#allocation2] sm:$0xff]  ;;  %v4816_v19 = vld [vmem:[#allocation2 + $0x10] sm:$0xff]  ;;  %v4818_v38 = vld [vmem:[#allocation2 + $0x8] sm:$0xff] }
 0x380   : > { %v2436_v61 = vsel %vm557_vm1, %v4814_v41, 0.0  ;;  %v2442_v16 = vsel %vm557_vm1, %v4816_v19, 0.0  ;;  %v4824_v33 = vld [vmem:[#allocation2 + $0x18] sm:$0xff]  ;;  %v2439_v30 = vsel %vm557_vm1, %v4818_v38, 0.0  ;;  %v4830_v39 = vld [vmem:[#allocation2 + $0x20] sm:$0xff]  ;;  %v4832_v21 = vld [vmem:[#allocation2 + $0x28] sm:$0xff] }
 0x381   : > { %2437 = vadd.xlane.f32.xlu0 %v2436_v61  ;;  %2443 = vadd.xlane.f32.xlu1 %v2442_v16  ;;  %v2445_v34 = vsel %vm557_vm1, %v4824_v33, 0.0  ;;  %v2448_v3 = vsel %vm557_vm1, %v4830_v39, 0.0  ;;  %v2451_v12 = vsel %vm557_vm1, %v4832_v21, 0.0  ;;  %v4838_v54 = vld [vmem:[#allocation2 + $0x30] sm:$0xff]  ;;  %v4840_v7 = vld [vmem:[#allocation2 + $0x38] sm:$0xff]  ;;  %v4846_v47 = vld [vmem:[#allocation2 + $0x40] sm:$0xff] }
 0x382   : > { %v2454_v44 = vsel %vm557_vm1, %v4838_v54, 0.0  ;;  %v2457_v50 = vsel %vm557_vm1, %v4840_v7, 0.0  ;;  %v4848_v52 = vld [vmem:[#allocation2 + $0x48] sm:$0xff]  ;;  %v2460_v53 = vsel %vm557_vm1, %v4846_v47, 0.0  ;;  %v4854_v37 = vld [vmem:[#allocation2 + $0x50] sm:$0xff]  ;;  %v4856_v4 = vld [vmem:[#allocation2 + $0x58] sm:$0xff] }
 0x383   : > { %v2463_v60 = vsel %vm557_vm1, %v4848_v52, 0.0  ;;  %v2466_v49 = vsel %vm557_vm1, %v4854_v37, 0.0  ;;  %v2469_v9 = vsel %vm557_vm1, %v4856_v4, 0.0  ;;  %v4862_v1 = vld [vmem:[#allocation2 + $0x60] sm:$0xff]  ;;  %v4864_v20 = vld [vmem:[#allocation2 + $0x68] sm:$0xff]  ;;  %v4870_v58 = vld [vmem:[#allocation2 + $0x70] sm:$0xff] }
 0x384   : > { %v2472_v18 = vsel %vm557_vm1, %v4862_v1, 0.0  ;;  %v2475_v26 = vsel %vm557_vm1, %v4864_v20, 0.0  ;;  %v4872_v45 = vld [vmem:[#allocation2 + $0x78] sm:$0xff]  ;;  %v2478_v15 = vsel %vm557_vm1, %v4870_v58, 0.0  ;;  %v4878_v59 = vld [vmem:[#allocation2 + $0x80] sm:$0xff]  ;;  %v4880_v27 = vld [vmem:[#allocation2 + $0x88] sm:$0xff] }
 0x385   : > { %2440 = vadd.xlane.f32.xlu0 %v2439_v30  ;;  %2446 = vadd.xlane.f32.xlu1 %v2445_v34  ;;  %v2481_v10 = vsel %vm557_vm1, %v4872_v45, 0.0  ;;  %v2484_v40 = vsel %vm557_vm1, %v4878_v59, 0.0  ;;  %v2487_v24 = vsel %vm557_vm1, %v4880_v27, 0.0  ;;  %v4886_v6 = vld [vmem:[#allocation2 + $0x90] sm:$0xff]  ;;  %v4888_v17 = vld [vmem:[#allocation2 + $0x98] sm:$0xff]  ;;  %v4894_v43 = vld [vmem:[#allocation2 + $0xa0] sm:$0xff] }
 0x386   : > { %v2490_v46 = vsel %vm557_vm1, %v4886_v6, 0.0  ;;  %v2493_v48 = vsel %vm557_vm1, %v4888_v17, 0.0  ;;  %v4896_v63 = vld [vmem:[#allocation2 + $0xa8] sm:$0xff]  ;;  %v2496_v28 = vsel %vm557_vm1, %v4894_v43, 0.0  ;;  %v4902_v23 = vld [vmem:[#allocation2 + $0xb0] sm:$0xff]  ;;  %v4904_v35 = vld [vmem:[#allocation2 + $0xb8] sm:$0xff] }
 0x387   : > { %v2499_v57 = vsel %vm557_vm1, %v4896_v63, 0.0  ;;  %v2502_v51 = vsel %vm557_vm1, %v4902_v23, 0.0  ;;  %v2505_v32 = vsel %vm557_vm1, %v4904_v35, 0.0  ;;  %v4910_v62 = vld [vmem:[#allocation2 + $0xc0] sm:$0xff]  ;;  %v4912_v13 = vld [vmem:[#allocation2 + $0xc8] sm:$0xff]  ;;  %v4918_v55 = vld [vmem:[#allocation2 + $0xd0] sm:$0xff] }
 0x388   : > { %v2508_v25 = vsel %vm557_vm1, %v4910_v62, 0.0  ;;  %v2511_v31 = vsel %vm557_vm1, %v4912_v13, 0.0  ;;  %v4920_v5 = vld [vmem:[#allocation2 + $0xd8] sm:$0xff]  ;;  %v2514_v11 = vsel %vm557_vm1, %v4918_v55, 0.0  ;;  %v4926_v22 = vld [vmem:[#allocation2 + $0xe0] sm:$0xff]  ;;  %v4928_v42 = vld [vmem:[#allocation2 + $0xe8] sm:$0xff] }
 0x389   : > { %2449 = vadd.xlane.f32.xlu0 %v2448_v3  ;;  %2452 = vadd.xlane.f32.xlu1 %v2451_v12  ;;  %v2517_v29 = vsel %vm557_vm1, %v4920_v5, 0.0  ;;  %v2520_v2 = vsel %vm557_vm1, %v4926_v22, 0.0  ;;  %v2523_v0 = vsel %vm557_vm1, %v4928_v42, 0.0  ;;  %v4934_v8 = vld [vmem:[#allocation2 + $0xf0] sm:$0xff]  ;;  %v4936_v61 = vld [vmem:[#allocation2 + $0xf8] sm:$0xff] }
 0x38a   : > { %v2526_v16 = vsel %vm557_vm1, %v4934_v8, 0.0  ;;  %v2529_v30 = vsel %vm557_vm1, %v4936_v61, 0.0 }
 0x38d   : > { %2455 = vadd.xlane.f32.xlu0 %v2454_v44  ;;  %2458 = vadd.xlane.f32.xlu1 %v2457_v50 }
 0x391   : > { %2461 = vadd.xlane.f32.xlu0 %v2460_v53  ;;  %2464 = vadd.xlane.f32.xlu1 %v2463_v60 }
 0x395   : > { %2467 = vadd.xlane.f32.xlu0 %v2466_v49  ;;  %2470 = vadd.xlane.f32.xlu1 %v2469_v9 }
 0x399   : > { %2473 = vadd.xlane.f32.xlu0 %v2472_v18  ;;  %2476 = vadd.xlane.f32.xlu1 %v2475_v26 }
 0x39d   : > { %2479 = vadd.xlane.f32.xlu0 %v2478_v15  ;;  %2482 = vadd.xlane.f32.xlu1 %v2481_v10 }
 0x3a1   : > { %2485 = vadd.xlane.f32.xlu0 %v2484_v40  ;;  %2488 = vadd.xlane.f32.xlu1 %v2487_v24 }
 0x3a5   : > { %2491 = vadd.xlane.f32.xlu0 %v2490_v46  ;;  %2494 = vadd.xlane.f32.xlu1 %v2493_v48 }
 0x3a9   : > { %2497 = vadd.xlane.f32.xlu0 %v2496_v28  ;;  %2500 = vadd.xlane.f32.xlu1 %v2499_v57 }
 0x3ad   : > { %2503 = vadd.xlane.f32.xlu0 %v2502_v51  ;;  %2506 = vadd.xlane.f32.xlu1 %v2505_v32 }
 0x3b1   : > { %2509 = vadd.xlane.f32.xlu0 %v2508_v25  ;;  %2512 = vadd.xlane.f32.xlu1 %v2511_v31 }
 0x3b5   : > { %2515 = vadd.xlane.f32.xlu0 %v2514_v11  ;;  %2518 = vadd.xlane.f32.xlu1 %v2517_v29 }
 0x3b9   : > { %2521 = vadd.xlane.f32.xlu0 %v2520_v2  ;;  %2524 = vadd.xlane.f32.xlu1 %v2523_v0 }
 0x3bd   : > { %2527 = vadd.xlane.f32.xlu0 %v2526_v16  ;;  %2530 = vadd.xlane.f32.xlu1 %v2529_v30 }
 0x40a   : > { %v2438_v34 = vpop.xlane.xlu0 %2437  ;;  %v2444_v3 = vpop.xlane.xlu1 %2443 }
 0x40b   : > { %v2533_v12 = vmul.f32 0.03125, %v2438_v34  ;;  %v2535_v44 = vmul.f32 0.03125, %v2444_v3 }
 0x40d   : > { %v4943_v50 = vsub.f32 %v4814_v41, %v2533_v12  ;;  %v4946_v53 = vsub.f32 %v4816_v19, %v2535_v44 }
 0x40e   : > { %v2441_v60 = vpop.xlane.xlu0 %2440  ;;  %v2447_v49 = vpop.xlane.xlu1 %2446 }
 0x40f   : > { %v2534_v9 = vmul.f32 0.03125, %v2441_v60  ;;  %v2536_v18 = vmul.f32 0.03125, %v2447_v49  ;;  %v2597_v26 = vmul.f32 %v4943_v50, %v4943_v50  ;;  %v2599_v15 = vmul.f32 %v4946_v53, %v4946_v53 }
 0x411   : > { %v4953_v10 = vsub.f32 %v4818_v38, %v2534_v9  ;;  %v4956_v40 = vsub.f32 %v4824_v33, %v2536_v18  ;;  %v2629_v41 = vsel %vm557_vm1, %v2597_v26, 0.0  ;;  %v2635_v46 = vsel %vm557_vm1, %v2599_v15, 0.0 }
 0x412   : > { %2630 = vadd.xlane.f32.xlu0 %v2629_v41  ;;  %v2450_v19 = vpop.xlane.xlu0 %2449  ;;  %v2453_v24 = vpop.xlane.xlu1 %2452 }
 0x413   : > { %v2537_v48 = vmul.f32 0.03125, %v2450_v19  ;;  %v2538_v28 = vmul.f32 0.03125, %v2453_v24  ;;  %v2598_v57 = vmul.f32 %v4953_v10, %v4953_v10  ;;  %v2600_v51 = vmul.f32 %v4956_v40, %v4956_v40 }
 0x415   : > { %v4965_v38 = vsub.f32 %v4830_v39, %v2537_v48  ;;  %v4968_v33 = vsub.f32 %v4832_v21, %v2538_v28  ;;  %v2632_v32 = vsel %vm557_vm1, %v2598_v57, 0.0  ;;  %v2638_v11 = vsel %vm557_vm1, %v2600_v51, 0.0 }
 0x416   : > { %2636 = vadd.xlane.f32.xlu0 %v2635_v46  ;;  %2633 = vadd.xlane.f32.xlu1 %v2632_v32  ;;  %v2456_v25 = vpop.xlane.xlu0 %2455  ;;  %v2459_v31 = vpop.xlane.xlu1 %2458 }
 0x417   : > { %v2539_v29 = vmul.f32 0.03125, %v2456_v25  ;;  %v2540_v2 = vmul.f32 0.03125, %v2459_v31  ;;  %v2601_v0 = vmul.f32 %v4965_v38, %v4965_v38  ;;  %v2602_v39 = vmul.f32 %v4968_v33, %v4968_v33 }
 0x419   : > { %v4977_v16 = vsub.f32 %v4838_v54, %v2539_v29  ;;  %v4980_v21 = vsub.f32 %v4840_v7, %v2540_v2  ;;  %v2641_v30 = vsel %vm557_vm1, %v2601_v0, 0.0  ;;  %v2644_v12 = vsel %vm557_vm1, %v2602_v39, 0.0 }
 0x41a   : > { %2639 = vadd.xlane.f32.xlu1 %v2638_v11  ;;  %2642 = vadd.xlane.f32.xlu0 %v2641_v30  ;;  %v2462_v34 = vpop.xlane.xlu0 %2461  ;;  %v2465_v3 = vpop.xlane.xlu1 %2464 }
 0x41b   : > { %v2541_v44 = vmul.f32 0.03125, %v2462_v34  ;;  %v2542_v60 = vmul.f32 0.03125, %v2465_v3  ;;  %v2603_v49 = vmul.f32 %v4977_v16, %v4977_v16  ;;  %v2604_v54 = vmul.f32 %v4980_v21, %v4980_v21 }
 0x41d   : > { %v4989_v9 = vsub.f32 %v4846_v47, %v2541_v44  ;;  %v4992_v7 = vsub.f32 %v4848_v52, %v2542_v60  ;;  %v2647_v18 = vsel %vm557_vm1, %v2603_v49, 0.0  ;;  %v2650_v41 = vsel %vm557_vm1, %v2604_v54, 0.0 }
 0x41e   : > { %2645 = vadd.xlane.f32.xlu1 %v2644_v12  ;;  %2648 = vadd.xlane.f32.xlu0 %v2647_v18  ;;  %v2468_v26 = vpop.xlane.xlu0 %2467  ;;  %v2471_v15 = vpop.xlane.xlu1 %2470 }
 0x41f   : > { %v2543_v19 = vmul.f32 0.03125, %v2468_v26  ;;  %v2544_v24 = vmul.f32 0.03125, %v2471_v15  ;;  %v2605_v46 = vmul.f32 %v4989_v9, %v4989_v9  ;;  %v2606_v47 = vmul.f32 %v4992_v7, %v4992_v7 }
 0x421   : > { %v5001_v48 = vsub.f32 %v4854_v37, %v2543_v19  ;;  %v5004_v52 = vsub.f32 %v4856_v4, %v2544_v24  ;;  %v2653_v28 = vsel %vm557_vm1, %v2605_v46, 0.0  ;;  %v2656_v32 = vsel %vm557_vm1, %v2606_v47, 0.0 }
 0x422   : > { %2651 = vadd.xlane.f32.xlu1 %v2650_v41  ;;  %2654 = vadd.xlane.f32.xlu0 %v2653_v28  ;;  %v2474_v57 = vpop.xlane.xlu0 %2473  ;;  %v2477_v51 = vpop.xlane.xlu1 %2476 }
 0x423   : > { %v2545_v25 = vmul.f32 0.03125, %v2474_v57  ;;  %v2546_v31 = vmul.f32 0.03125, %v2477_v51  ;;  %v2607_v11 = vmul.f32 %v5001_v48, %v5001_v48  ;;  %v2608_v37 = vmul.f32 %v5004_v52, %v5004_v52 }
 0x425   : > { %v5013_v29 = vsub.f32 %v4862_v1, %v2545_v25  ;;  %v5016_v4 = vsub.f32 %v4864_v20, %v2546_v31  ;;  %v2659_v2 = vsel %vm557_vm1, %v2607_v11, 0.0  ;;  %v2662_v30 = vsel %vm557_vm1, %v2608_v37, 0.0 }
 0x426   : > { %2657 = vadd.xlane.f32.xlu1 %v2656_v32  ;;  %2660 = vadd.xlane.f32.xlu0 %v2659_v2  ;;  %v2480_v0 = vpop.xlane.xlu0 %2479  ;;  %v2483_v39 = vpop.xlane.xlu1 %2482 }
 0x427   : > { %v2547_v34 = vmul.f32 0.03125, %v2480_v0  ;;  %v2548_v3 = vmul.f32 0.03125, %v2483_v39  ;;  %v2609_v12 = vmul.f32 %v5013_v29, %v5013_v29  ;;  %v2610_v1 = vmul.f32 %v5016_v4, %v5016_v4 }
 0x429   : > { %v5025_v44 = vsub.f32 %v4870_v58, %v2547_v34  ;;  %v5028_v20 = vsub.f32 %v4872_v45, %v2548_v3  ;;  %v2665_v60 = vsel %vm557_vm1, %v2609_v12, 0.0  ;;  %v2668_v18 = vsel %vm557_vm1, %v2610_v1, 0.0 }
 0x42a   : > { %2663 = vadd.xlane.f32.xlu1 %v2662_v30  ;;  %2666 = vadd.xlane.f32.xlu0 %v2665_v60  ;;  %v2486_v49 = vpop.xlane.xlu0 %2485  ;;  %v2489_v54 = vpop.xlane.xlu1 %2488 }
 0x42b   : > { %v2549_v26 = vmul.f32 0.03125, %v2486_v49  ;;  %v2550_v15 = vmul.f32 0.03125, %v2489_v54  ;;  %v2611_v41 = vmul.f32 %v5025_v44, %v5025_v44  ;;  %v2612_v58 = vmul.f32 %v5028_v20, %v5028_v20 }
 0x42d   : > { %v5037_v19 = vsub.f32 %v4878_v59, %v2549_v26  ;;  %v5040_v45 = vsub.f32 %v4880_v27, %v2550_v15  ;;  %v2671_v24 = vsel %vm557_vm1, %v2611_v41, 0.0  ;;  %v2674_v28 = vsel %vm557_vm1, %v2612_v58, 0.0 }
 0x42e   : > { %2669 = vadd.xlane.f32.xlu1 %v2668_v18  ;;  %2672 = vadd.xlane.f32.xlu0 %v2671_v24  ;;  %v2492_v46 = vpop.xlane.xlu0 %2491  ;;  %v2495_v47 = vpop.xlane.xlu1 %2494 }
 0x42f   : > { %v2551_v57 = vmul.f32 0.03125, %v2492_v46  ;;  %v2552_v51 = vmul.f32 0.03125, %v2495_v47  ;;  %v2613_v32 = vmul.f32 %v5037_v19, %v5037_v19  ;;  %v2614_v59 = vmul.f32 %v5040_v45, %v5040_v45 }
 0x431   : > { %v5049_v25 = vsub.f32 %v4886_v6, %v2551_v57  ;;  %v5052_v27 = vsub.f32 %v4888_v17, %v2552_v51  ;;  %v2677_v31 = vsel %vm557_vm1, %v2613_v32, 0.0  ;;  %v2680_v2 = vsel %vm557_vm1, %v2614_v59, 0.0 }
 0x432   : > { %2675 = vadd.xlane.f32.xlu1 %v2674_v28  ;;  %2678 = vadd.xlane.f32.xlu0 %v2677_v31  ;;  %v2498_v11 = vpop.xlane.xlu0 %2497  ;;  %v2501_v37 = vpop.xlane.xlu1 %2500 }
 0x433   : > { %v2553_v0 = vmul.f32 0.03125, %v2498_v11  ;;  %v2554_v39 = vmul.f32 0.03125, %v2501_v37  ;;  %v2615_v30 = vmul.f32 %v5049_v25, %v5049_v25  ;;  %v2616_v6 = vmul.f32 %v5052_v27, %v5052_v27 }
 0x435   : > { %v5061_v34 = vsub.f32 %v4894_v43, %v2553_v0  ;;  %v5064_v17 = vsub.f32 %v4896_v63, %v2554_v39  ;;  %v2683_v3 = vsel %vm557_vm1, %v2615_v30, 0.0  ;;  %v2686_v60 = vsel %vm557_vm1, %v2616_v6, 0.0 }
 0x436   : > { %2681 = vadd.xlane.f32.xlu1 %v2680_v2  ;;  %2684 = vadd.xlane.f32.xlu0 %v2683_v3  ;;  %v2504_v12 = vpop.xlane.xlu0 %2503  ;;  %v2507_v1 = vpop.xlane.xlu1 %2506 }
 0x437   : > { %v2555_v49 = vmul.f32 0.03125, %v2504_v12  ;;  %v2556_v54 = vmul.f32 0.03125, %v2507_v1  ;;  %v2617_v18 = vmul.f32 %v5061_v34, %v5061_v34  ;;  %v2618_v43 = vmul.f32 %v5064_v17, %v5064_v17 }
 0x439   : > { %v5073_v26 = vsub.f32 %v4902_v23, %v2555_v49  ;;  %v5076_v63 = vsub.f32 %v4904_v35, %v2556_v54  ;;  %v2689_v15 = vsel %vm557_vm1, %v2617_v18, 0.0  ;;  %v2692_v24 = vsel %vm557_vm1, %v2618_v43, 0.0 }
 0x43a   : > { %2687 = vadd.xlane.f32.xlu1 %v2686_v60  ;;  %2690 = vadd.xlane.f32.xlu0 %v2689_v15  ;;  %v2510_v41 = vpop.xlane.xlu0 %2509  ;;  %v2513_v58 = vpop.xlane.xlu1 %2512 }
 0x43b   : > { %v2557_v46 = vmul.f32 0.03125, %v2510_v41  ;;  %v2558_v47 = vmul.f32 0.03125, %v2513_v58  ;;  %v2619_v28 = vmul.f32 %v5073_v26, %v5073_v26  ;;  %v2620_v23 = vmul.f32 %v5076_v63, %v5076_v63 }
 0x43d   : > { %v5085_v57 = vsub.f32 %v4910_v62, %v2557_v46  ;;  %v5088_v35 = vsub.f32 %v4912_v13, %v2558_v47  ;;  %v2695_v51 = vsel %vm557_vm1, %v2619_v28, 0.0  ;;  %v2698_v31 = vsel %vm557_vm1, %v2620_v23, 0.0 }
 0x43e   : > { %2693 = vadd.xlane.f32.xlu1 %v2692_v24  ;;  %2696 = vadd.xlane.f32.xlu0 %v2695_v51  ;;  %v2516_v32 = vpop.xlane.xlu0 %2515  ;;  %v2519_v59 = vpop.xlane.xlu1 %2518 }
 0x43f   : > { %v2559_v11 = vmul.f32 0.03125, %v2516_v32  ;;  %v2560_v37 = vmul.f32 0.03125, %v2519_v59  ;;  %v2621_v2 = vmul.f32 %v5085_v57, %v5085_v57  ;;  %v2622_v62 = vmul.f32 %v5088_v35, %v5088_v35 }
 0x441   : > { %v5097_v0 = vsub.f32 %v4918_v55, %v2559_v11  ;;  %v5100_v13 = vsub.f32 %v4920_v5, %v2560_v37  ;;  %v2701_v39 = vsel %vm557_vm1, %v2621_v2, 0.0  ;;  %v2704_v3 = vsel %vm557_vm1, %v2622_v62, 0.0 }
 0x442   : > { %2699 = vadd.xlane.f32.xlu1 %v2698_v31  ;;  %2702 = vadd.xlane.f32.xlu0 %v2701_v39  ;;  %v2522_v30 = vpop.xlane.xlu0 %2521  ;;  %v2525_v6 = vpop.xlane.xlu1 %2524 }
 0x443   : > { %v2561_v12 = vmul.f32 0.03125, %v2522_v30  ;;  %v2562_v1 = vmul.f32 0.03125, %v2525_v6  ;;  %v2623_v60 = vmul.f32 %v5097_v0, %v5097_v0  ;;  %v2624_v55 = vmul.f32 %v5100_v13, %v5100_v13 }
 0x445   : > { %v5109_v49 = vsub.f32 %v4926_v22, %v2561_v12  ;;  %v5112_v5 = vsub.f32 %v4928_v42, %v2562_v1  ;;  %v2707_v54 = vsel %vm557_vm1, %v2623_v60, 0.0  ;;  %v2710_v15 = vsel %vm557_vm1, %v2624_v55, 0.0 }
 0x446   : > { %2705 = vadd.xlane.f32.xlu1 %v2704_v3  ;;  %2708 = vadd.xlane.f32.xlu0 %v2707_v54  ;;  %v2528_v18 = vpop.xlane.xlu0 %2527  ;;  %v2531_v43 = vpop.xlane.xlu1 %2530 }
 0x447   : > { %v2563_v41 = vmul.f32 0.03125, %v2528_v18  ;;  %v2564_v58 = vmul.f32 0.03125, %v2531_v43  ;;  %v2625_v24 = vmul.f32 %v5109_v49, %v5109_v49  ;;  %v2626_v22 = vmul.f32 %v5112_v5, %v5112_v5 }
 0x449   : > { %v5121_v46 = vsub.f32 %v4934_v8, %v2563_v41  ;;  %v5124_v42 = vsub.f32 %v4936_v61, %v2564_v58  ;;  %v2713_v47 = vsel %vm557_vm1, %v2625_v24, 0.0  ;;  %v2716_v28 = vsel %vm557_vm1, %v2626_v22, 0.0  ;;  %v2435_v41 = vld [vmem:[%s5331_s5] sm:$0x3] }
 0x44a   : > { %2711 = vadd.xlane.f32.xlu1 %v2710_v15  ;;  %2714 = vadd.xlane.f32.xlu0 %v2713_v47 }
 0x44b   : > { %v2627_v23 = vmul.f32 %v5121_v46, %v5121_v46  ;;  %v2628_v51 = vmul.f32 %v5124_v42, %v5124_v42 }
 0x44d   : > { %v2719_v32 = vsel %vm557_vm1, %v2627_v23, 0.0  ;;  %v2722_v8 = vsel %vm557_vm1, %v2628_v51, 0.0 }
 0x44e   : > { %2717 = vadd.xlane.f32.xlu1 %v2716_v28  ;;  %2720 = vadd.xlane.f32.xlu0 %v2719_v32  ;;  %v5139_v28 = vrot.slane %v2435_v41, %v977_v56 }
 0x452   : > { %2723 = vadd.xlane.f32.xlu1 %v2722_v8  ;;  %v5143_v8 = vrot.slane %v2435_v41, %v1013_v36 }
 0x49b   : > { %v2631_v61 = vpop.xlane.xlu0 %2630 }
 0x49c   : > { %v2725_v59 = vmul.f32 0.03125, %v2631_v61 }
 0x49e   : > { %v2757_v31 = vadd.f32 1e-05, %v2725_v59 }
 0x49f   : > { %v2634_v11 = vpop.xlane.xlu1 %2633  ;;  %v2637_v37 = vpop.xlane.xlu0 %2636 }
 0x4a0   : > { %3567 = vrsqrt.f32 %v2757_v31  ;;  %v2726_v2 = vmul.f32 0.03125, %v2634_v11  ;;  %v2727_v62 = vmul.f32 0.03125, %v2637_v37 }
 0x4a2   : > { %v2758_v39 = vadd.f32 1e-05, %v2726_v2  ;;  %v2759_v30 = vadd.f32 1e-05, %v2727_v62 }
 0x4a3   : > { %v2640_v6 = vpop.xlane.xlu1 %2639  ;;  %v2643_v3 = vpop.xlane.xlu0 %2642 }
 0x4a4   : > { %3569 = vrsqrt.f32 %v2758_v39  ;;  %v2728_v12 = vmul.f32 0.03125, %v2640_v6  ;;  %v2729_v1 = vmul.f32 0.03125, %v2643_v3 }
 0x4a5   : > { %3571 = vrsqrt.f32 %v2759_v30 }
 0x4a6   : > { %v2760_v60 = vadd.f32 1e-05, %v2728_v12  ;;  %v2761_v55 = vadd.f32 1e-05, %v2729_v1 }
 0x4a7   : > { %v2646_v54 = vpop.xlane.xlu1 %2645  ;;  %v2649_v18 = vpop.xlane.xlu0 %2648 }
 0x4a8   : > { %3573 = vrsqrt.f32 %v2760_v60  ;;  %v2730_v43 = vmul.f32 0.03125, %v2646_v54  ;;  %v2731_v15 = vmul.f32 0.03125, %v2649_v18 }
 0x4a9   : > { %3575 = vrsqrt.f32 %v2761_v55 }
 0x4aa   : > { %v2762_v58 = vadd.f32 1e-05, %v2730_v43  ;;  %v2763_v24 = vadd.f32 1e-05, %v2731_v15 }
 0x4ab   : > { %v2652_v22 = vpop.xlane.xlu1 %2651  ;;  %v2655_v47 = vpop.xlane.xlu0 %2654 }
 0x4ac   : > { %3577 = vrsqrt.f32 %v2762_v58  ;;  %v2732_v23 = vmul.f32 0.03125, %v2652_v22  ;;  %v2733_v51 = vmul.f32 0.03125, %v2655_v47 }
 0x4ad   : > { %v3568_v32 = vpop.eup %3567  ;;  %3579 = vrsqrt.f32 %v2763_v24 }
 0x4ae   : > { %v2821_v61 = vmul.f32 %v3568_v32, %v4943_v50  ;;  %v2764_v59 = vadd.f32 1e-05, %v2732_v23  ;;  %v2765_v31 = vadd.f32 1e-05, %v2733_v51 }
 0x4af   : > { %v2658_v11 = vpop.xlane.xlu1 %2657  ;;  %v2661_v37 = vpop.xlane.xlu0 %2660 }
 0x4b0   : > { %v2857_v2 = vmul.f32 %v5139_v28, %v2821_v61  ;;  %3581 = vrsqrt.f32 %v2764_v59  ;;  %v2734_v56 = vmul.f32 0.03125, %v2658_v11  ;;  %v2735_v62 = vmul.f32 0.03125, %v2661_v37 }
 0x4b1   : > { %v3570_v39 = vpop.eup %3569  ;;  %3583 = vrsqrt.f32 %v2765_v31 }
 0x4b2   : > { %v3572_v30 = vpop.eup %3571  ;;  %v2893_v6 = vadd.f32 %v5143_v8, %v2857_v2  ;;  %v2822_v14 = vmul.f32 %v3570_v39, %v4953_v10  ;;  %v2766_v36 = vadd.f32 1e-05, %v2734_v56  ;;  %v2767_v3 = vadd.f32 1e-05, %v2735_v62 }
 0x4b3   : > { %v2823_v50 = vmul.f32 %v3572_v30, %v4946_v53  ;;  %v2664_v12 = vpop.xlane.xlu1 %2663  ;;  %v2667_v1 = vpop.xlane.xlu0 %2666 }
 0x4b4   : > { %2925 = vst.msk [vmem:[%s3805_s14] sm:$0xff] %vm557_vm1, %v2893_v6  ;;  %v2858_v60 = vmul.f32 %v5139_v28, %v2822_v14  ;;  %3585 = vrsqrt.f32 %v2766_v36  ;;  %v2736_v55 = vmul.f32 0.03125, %v2664_v12  ;;  %v2737_v54 = vmul.f32 0.03125, %v2667_v1 }
 0x4b5   : > { %v3574_v18 = vpop.eup %3573  ;;  %v2859_v43 = vmul.f32 %v5139_v28, %v2823_v50  ;;  %3587 = vrsqrt.f32 %v2767_v3 }
 0x4b6   : > { %v3576_v10 = vpop.eup %3575  ;;  %v2894_v15 = vadd.f32 %v5143_v8, %v2858_v60  ;;  %v2824_v53 = vmul.f32 %v3574_v18, %v4956_v40  ;;  %v2768_v41 = vadd.f32 1e-05, %v2736_v55  ;;  %v2769_v58 = vadd.f32 1e-05, %v2737_v54 }
 0x4b7   : > { %v2895_v24 = vadd.f32 %v5143_v8, %v2859_v43  ;;  %v2825_v22 = vmul.f32 %v3576_v10, %v4965_v38  ;;  %v2670_v47 = vpop.xlane.xlu1 %2669  ;;  %v2673_v23 = vpop.xlane.xlu0 %2672 }
 0x4b8   : > { %2926 = vst.msk [vmem:[%s3805_s14 + $0x8] sm:$0xff] %vm557_vm1, %v2894_v15  ;;  %v2860_v51 = vmul.f32 %v5139_v28, %v2824_v53  ;;  %3589 = vrsqrt.f32 %v2768_v41  ;;  %v2738_v32 = vmul.f32 0.03125, %v2670_v47  ;;  %v2739_v61 = vmul.f32 0.03125, %v2673_v23 }
 0x4b9   : > { %v3578_v59 = vpop.eup %3577  ;;  %2927 = vst.msk [vmem:[%s3805_s14 + $0x10] sm:$0xff] %vm557_vm1, %v2895_v24  ;;  %v2861_v40 = vmul.f32 %v5139_v28, %v2825_v22  ;;  %3591 = vrsqrt.f32 %v2769_v58 }
 0x4ba   : > { %v3580_v31 = vpop.eup %3579  ;;  %v2896_v38 = vadd.f32 %v5143_v8, %v2860_v51  ;;  %v2826_v11 = vmul.f32 %v3578_v59, %v4968_v33  ;;  %v2770_v37 = vadd.f32 1e-05, %v2738_v32  ;;  %v2771_v2 = vadd.f32 1e-05, %v2739_v61 }
 0x4bb   : > { %v2897_v56 = vadd.f32 %v5143_v8, %v2861_v40  ;;  %v2827_v62 = vmul.f32 %v3580_v31, %v4977_v16  ;;  %v2676_v39 = vpop.xlane.xlu1 %2675  ;;  %v2679_v30 = vpop.xlane.xlu0 %2678 }
 0x4bc   : > { %2928 = vst.msk [vmem:[%s3805_s14 + $0x18] sm:$0xff] %vm557_vm1, %v2896_v38  ;;  %v2862_v6 = vmul.f32 %v5139_v28, %v2826_v11  ;;  %3593 = vrsqrt.f32 %v2770_v37  ;;  %v2740_v14 = vmul.f32 0.03125, %v2676_v39  ;;  %v2741_v36 = vmul.f32 0.03125, %v2679_v30 }
 0x4bd   : > { %v3582_v3 = vpop.eup %3581  ;;  %2929 = vst.msk [vmem:[%s3805_s14 + $0x20] sm:$0xff] %vm557_vm1, %v2897_v56  ;;  %v2863_v33 = vmul.f32 %v5139_v28, %v2827_v62  ;;  %3595 = vrsqrt.f32 %v2771_v2 }
 0x4be   : > { %v3584_v50 = vpop.eup %3583  ;;  %v2898_v16 = vadd.f32 %v5143_v8, %v2862_v6  ;;  %v2828_v12 = vmul.f32 %v3582_v3, %v4980_v21  ;;  %v2772_v1 = vadd.f32 1e-05, %v2740_v14  ;;  %v2773_v60 = vadd.f32 1e-05, %v2741_v36 }
 0x4bf   : > { %v2899_v55 = vadd.f32 %v5143_v8, %v2863_v33  ;;  %v2829_v54 = vmul.f32 %v3584_v50, %v4989_v9  ;;  %v2682_v18 = vpop.xlane.xlu1 %2681  ;;  %v2685_v43 = vpop.xlane.xlu0 %2684 }
 0x4c0   : > { %2930 = vst.msk [vmem:[%s3805_s14 + $0x28] sm:$0xff] %vm557_vm1, %v2898_v16  ;;  %v2864_v10 = vmul.f32 %v5139_v28, %v2828_v12  ;;  %3597 = vrsqrt.f32 %v2772_v1  ;;  %v2742_v15 = vmul.f32 0.03125, %v2682_v18  ;;  %v2743_v53 = vmul.f32 0.03125, %v2685_v43 }
 0x4c1   : > { %v3586_v41 = vpop.eup %3585  ;;  %2931 = vst.msk [vmem:[%s3805_s14 + $0x30] sm:$0xff] %vm557_vm1, %v2899_v55  ;;  %v2865_v21 = vmul.f32 %v5139_v28, %v2829_v54  ;;  %3599 = vrsqrt.f32 %v2773_v60 }
 0x4c2   : > { %v3588_v58 = vpop.eup %3587  ;;  %v2900_v9 = vadd.f32 %v5143_v8, %v2864_v10  ;;  %v2830_v24 = vmul.f32 %v3586_v41, %v4992_v7  ;;  %v2774_v22 = vadd.f32 1e-05, %v2742_v15  ;;  %v2775_v47 = vadd.f32 1e-05, %v2743_v53 }
 0x4c3   : > { %v2901_v23 = vadd.f32 %v5143_v8, %v2865_v21  ;;  %v2831_v51 = vmul.f32 %v3588_v58, %v5001_v48  ;;  %v2688_v32 = vpop.xlane.xlu1 %2687  ;;  %v2691_v61 = vpop.xlane.xlu0 %2690 }
 0x4c4   : > { %2932 = vst.msk [vmem:[%s3805_s14 + $0x38] sm:$0xff] %vm557_vm1, %v2900_v9  ;;  %v2866_v59 = vmul.f32 %v5139_v28, %v2830_v24  ;;  %3601 = vrsqrt.f32 %v2774_v22  ;;  %v2744_v40 = vmul.f32 0.03125, %v2688_v32  ;;  %v2745_v31 = vmul.f32 0.03125, %v2691_v61 }
 0x4c5   : > { %v3590_v38 = vpop.eup %3589  ;;  %2933 = vst.msk [vmem:[%s3805_s14 + $0x40] sm:$0xff] %vm557_vm1, %v2901_v23  ;;  %v2867_v7 = vmul.f32 %v5139_v28, %v2831_v51  ;;  %3603 = vrsqrt.f32 %v2775_v47 }
 0x4c6   : > { %v3592_v11 = vpop.eup %3591  ;;  %v2902_v48 = vadd.f32 %v5143_v8, %v2866_v59  ;;  %v2832_v37 = vmul.f32 %v3590_v38, %v5004_v52  ;;  %v2776_v2 = vadd.f32 1e-05, %v2744_v40  ;;  %v2777_v56 = vadd.f32 1e-05, %v2745_v31 }
 0x4c7   : > { %v2903_v62 = vadd.f32 %v5143_v8, %v2867_v7  ;;  %v2833_v39 = vmul.f32 %v3592_v11, %v5013_v29  ;;  %v2694_v30 = vpop.xlane.xlu1 %2693  ;;  %v2697_v6 = vpop.xlane.xlu0 %2696 }
 0x4c8   : > { %2934 = vst.msk [vmem:[%s3805_s14 + $0x48] sm:$0xff] %vm557_vm1, %v2902_v48  ;;  %v2868_v14 = vmul.f32 %v5139_v28, %v2832_v37  ;;  %3605 = vrsqrt.f32 %v2776_v2  ;;  %v2746_v36 = vmul.f32 0.03125, %v2694_v30  ;;  %v2747_v3 = vmul.f32 0.03125, %v2697_v6 }
 0x4c9   : > { %v3594_v33 = vpop.eup %3593  ;;  %2935 = vst.msk [vmem:[%s3805_s14 + $0x50] sm:$0xff] %vm557_vm1, %v2903_v62  ;;  %v2869_v52 = vmul.f32 %v5139_v28, %v2833_v39  ;;  %3607 = vrsqrt.f32 %v2777_v56 }
 0x4ca   : > { %v3596_v50 = vpop.eup %3595  ;;  %v2904_v29 = vadd.f32 %v5143_v8, %v2868_v14  ;;  %v2834_v16 = vmul.f32 %v3594_v33, %v5016_v4  ;;  %v2778_v12 = vadd.f32 1e-05, %v2746_v36  ;;  %v2779_v1 = vadd.f32 1e-05, %v2747_v3 }
 0x4cb   : > { %v2905_v60 = vadd.f32 %v5143_v8, %v2869_v52  ;;  %v2835_v55 = vmul.f32 %v3596_v50, %v5025_v44  ;;  %v2700_v54 = vpop.xlane.xlu1 %2699  ;;  %v2703_v18 = vpop.xlane.xlu0 %2702 }
 0x4cc   : > { %2936 = vst.msk [vmem:[%s3805_s14 + $0x58] sm:$0xff] %vm557_vm1, %v2904_v29  ;;  %v2870_v43 = vmul.f32 %v5139_v28, %v2834_v16  ;;  %3609 = vrsqrt.f32 %v2778_v12  ;;  %v2748_v10 = vmul.f32 0.03125, %v2700_v54  ;;  %v2749_v15 = vmul.f32 0.03125, %v2703_v18 }
 0x4cd   : > { %v3598_v53 = vpop.eup %3597  ;;  %2937 = vst.msk [vmem:[%s3805_s14 + $0x60] sm:$0xff] %vm557_vm1, %v2905_v60  ;;  %v2871_v4 = vmul.f32 %v5139_v28, %v2835_v55  ;;  %3611 = vrsqrt.f32 %v2779_v1 }
 0x4ce   : > { %v3600_v41 = vpop.eup %3599  ;;  %v2906_v44 = vadd.f32 %v5143_v8, %v2870_v43  ;;  %v2836_v21 = vmul.f32 %v3598_v53, %v5028_v20  ;;  %v2780_v58 = vadd.f32 1e-05, %v2748_v10  ;;  %v2781_v9 = vadd.f32 1e-05, %v2749_v15 }
 0x4cf   : > { %v2907_v24 = vadd.f32 %v5143_v8, %v2871_v4  ;;  %v2837_v22 = vmul.f32 %v3600_v41, %v5037_v19  ;;  %v2706_v47 = vpop.xlane.xlu1 %2705  ;;  %v2709_v23 = vpop.xlane.xlu0 %2708 }
 0x4d0   : > { %2938 = vst.msk [vmem:[%s3805_s14 + $0x68] sm:$0xff] %vm557_vm1, %v2906_v44  ;;  %v2872_v51 = vmul.f32 %v5139_v28, %v2836_v21  ;;  %3613 = vrsqrt.f32 %v2780_v58  ;;  %v2750_v32 = vmul.f32 0.03125, %v2706_v47  ;;  %v2751_v61 = vmul.f32 0.03125, %v2709_v23 }
 0x4d1   : > { %v3602_v59 = vpop.eup %3601  ;;  %2939 = vst.msk [vmem:[%s3805_s14 + $0x70] sm:$0xff] %vm557_vm1, %v2907_v24  ;;  %v2873_v20 = vmul.f32 %v5139_v28, %v2837_v22  ;;  %3615 = vrsqrt.f32 %v2781_v9 }
 0x4d2   : > { %v3604_v40 = vpop.eup %3603  ;;  %v2908_v19 = vadd.f32 %v5143_v8, %v2872_v51  ;;  %v2838_v31 = vmul.f32 %v3602_v59, %v5040_v45  ;;  %v2782_v38 = vadd.f32 1e-05, %v2750_v32  ;;  %v2783_v7 = vadd.f32 1e-05, %v2751_v61 }
 0x4d3   : > { %v2909_v11 = vadd.f32 %v5143_v8, %v2873_v20  ;;  %v2839_v48 = vmul.f32 %v3604_v40, %v5049_v25  ;;  %v2712_v37 = vpop.xlane.xlu1 %2711  ;;  %v2715_v2 = vpop.xlane.xlu0 %2714 }
 0x4d4   : > { %2940 = vst.msk [vmem:[%s3805_s14 + $0x78] sm:$0xff] %vm557_vm1, %v2908_v19  ;;  %v2874_v56 = vmul.f32 %v5139_v28, %v2838_v31  ;;  %3617 = vrsqrt.f32 %v2782_v38  ;;  %v2752_v62 = vmul.f32 0.03125, %v2712_v37  ;;  %v2753_v39 = vmul.f32 0.03125, %v2715_v2 }
 0x4d5   : > { %v3606_v30 = vpop.eup %3605  ;;  %2941 = vst.msk [vmem:[%s3805_s14 + $0x80] sm:$0xff] %vm557_vm1, %v2909_v11  ;;  %v2875_v45 = vmul.f32 %v5139_v28, %v2839_v48  ;;  %3619 = vrsqrt.f32 %v2783_v7 }
 0x4d6   : > { %v3608_v6 = vpop.eup %3607  ;;  %v2910_v25 = vadd.f32 %v5143_v8, %v2874_v56  ;;  %v2840_v14 = vmul.f32 %v3606_v30, %v5052_v27  ;;  %v2784_v36 = vadd.f32 1e-05, %v2752_v62  ;;  %v2785_v3 = vadd.f32 1e-05, %v2753_v39 }
 0x4d7   : > { %v2911_v33 = vadd.f32 %v5143_v8, %v2875_v45  ;;  %v2841_v52 = vmul.f32 %v3608_v6, %v5061_v34  ;;  %v2718_v50 = vpop.xlane.xlu1 %2717  ;;  %v2721_v29 = vpop.xlane.xlu0 %2720 }
 0x4d8   : > { %2942 = vst.msk [vmem:[%s3805_s14 + $0x88] sm:$0xff] %vm557_vm1, %v2910_v25  ;;  %v2876_v16 = vmul.f32 %v5139_v28, %v2840_v14  ;;  %3621 = vrsqrt.f32 %v2784_v36  ;;  %v2754_v12 = vmul.f32 0.03125, %v2718_v50  ;;  %v2755_v1 = vmul.f32 0.03125, %v2721_v29 }
 0x4d9   : > { %v3610_v60 = vpop.eup %3609  ;;  %2943 = vst.msk [vmem:[%s3805_s14 + $0x90] sm:$0xff] %vm557_vm1, %v2911_v33  ;;  %v2877_v27 = vmul.f32 %v5139_v28, %v2841_v52  ;;  %3623 = vrsqrt.f32 %v2785_v3 }
 0x4da   : > { %v3612_v55 = vpop.eup %3611  ;;  %v2912_v34 = vadd.f32 %v5143_v8, %v2876_v16  ;;  %v2842_v54 = vmul.f32 %v3610_v60, %v5064_v17  ;;  %v2786_v18 = vadd.f32 1e-05, %v2754_v12  ;;  %v2787_v43 = vadd.f32 1e-05, %v2755_v1 }
 0x4db   : > { %v2913_v10 = vadd.f32 %v5143_v8, %v2877_v27  ;;  %v2843_v15 = vmul.f32 %v3612_v55, %v5073_v26  ;;  %v2724_v53 = vpop.xlane.xlu1 %2723 }
 0x4dc   : > { %2944 = vst.msk [vmem:[%s3805_s14 + $0x98] sm:$0xff] %vm557_vm1, %v2912_v34  ;;  %v2878_v4 = vmul.f32 %v5139_v28, %v2842_v54  ;;  %3625 = vrsqrt.f32 %v2786_v18  ;;  %v2756_v41 = vmul.f32 0.03125, %v2724_v53 }
 0x4dd   : > { %v3614_v44 = vpop.eup %3613  ;;  %2945 = vst.msk [vmem:[%s3805_s14 + $0xa0] sm:$0xff] %vm557_vm1, %v2913_v10  ;;  %v2879_v17 = vmul.f32 %v5139_v28, %v2843_v15  ;;  %3627 = vrsqrt.f32 %v2787_v43 }
 0x4de   : > { %v3616_v21 = vpop.eup %3615  ;;  %v2914_v58 = vadd.f32 %v5143_v8, %v2878_v4  ;;  %v2844_v26 = vmul.f32 %v3614_v44, %v5076_v63  ;;  %v2788_v9 = vadd.f32 1e-05, %v2756_v41 }
 0x4df   : > { %v2915_v24 = vadd.f32 %v5143_v8, %v2879_v17  ;;  %v2845_v22 = vmul.f32 %v3616_v21, %v5085_v57 }
 0x4e0   : > { %2946 = vst.msk [vmem:[%s3805_s14 + $0xa8] sm:$0xff] %vm557_vm1, %v2914_v58  ;;  %v2880_v47 = vmul.f32 %v5139_v28, %v2844_v26  ;;  %3629 = vrsqrt.f32 %v2788_v9 }
 0x4e1   : > { %v3618_v23 = vpop.eup %3617  ;;  %2947 = vst.msk [vmem:[%s3805_s14 + $0xb0] sm:$0xff] %vm557_vm1, %v2915_v24  ;;  %v2881_v51 = vmul.f32 %v5139_v28, %v2845_v22 }
 0x4e2   : > { %v3620_v32 = vpop.eup %3619  ;;  %v2916_v63 = vadd.f32 %v5143_v8, %v2880_v47  ;;  %v2846_v61 = vmul.f32 %v3618_v23, %v5088_v35 }
 0x4e3   : > { %v2917_v59 = vadd.f32 %v5143_v8, %v2881_v51  ;;  %v2847_v57 = vmul.f32 %v3620_v32, %v5097_v0 }
 0x4e4   : > { %2948 = vst.msk [vmem:[%s3805_s14 + $0xb8] sm:$0xff] %vm557_vm1, %v2916_v63  ;;  %v2882_v20 = vmul.f32 %v5139_v28, %v2846_v61 }
 0x4e5   : > { %v3622_v40 = vpop.eup %3621  ;;  %2949 = vst.msk [vmem:[%s3805_s14 + $0xc0] sm:$0xff] %vm557_vm1, %v2917_v59  ;;  %v2883_v19 = vmul.f32 %v5139_v28, %v2847_v57 }
 0x4e6   : > { %v3624_v31 = vpop.eup %3623  ;;  %v2918_v38 = vadd.f32 %v5143_v8, %v2882_v20  ;;  %v2848_v35 = vmul.f32 %v3622_v40, %v5100_v13 }
 0x4e7   : > { %v2919_v7 = vadd.f32 %v5143_v8, %v2883_v19  ;;  %v2849_v0 = vmul.f32 %v3624_v31, %v5109_v49 }
 0x4e8   : > { %2950 = vst.msk [vmem:[%s3805_s14 + $0xc8] sm:$0xff] %vm557_vm1, %v2918_v38  ;;  %v2884_v11 = vmul.f32 %v5139_v28, %v2848_v35 }
 0x4e9   : > { %v3626_v48 = vpop.eup %3625  ;;  %2951 = vst.msk [vmem:[%s3805_s14 + $0xd0] sm:$0xff] %vm557_vm1, %v2919_v7  ;;  %v2885_v37 = vmul.f32 %v5139_v28, %v2849_v0 }
 0x4ea   : > { %v3628_v2 = vpop.eup %3627  ;;  %v2920_v56 = vadd.f32 %v5143_v8, %v2884_v11  ;;  %v2850_v13 = vmul.f32 %v3626_v48, %v5112_v5 }
 0x4eb   : > { %v2921_v62 = vadd.f32 %v5143_v8, %v2885_v37  ;;  %v2851_v49 = vmul.f32 %v3628_v2, %v5121_v46 }
 0x4ec   : > { %2952 = vst.msk [vmem:[%s3805_s14 + $0xd8] sm:$0xff] %vm557_vm1, %v2920_v56  ;;  %v2886_v39 = vmul.f32 %v5139_v28, %v2850_v13 }
 0x4ed   : > { %v3630_v30 = vpop.eup %3629  ;;  %2953 = vst.msk [vmem:[%s3805_s14 + $0xe0] sm:$0xff] %vm557_vm1, %v2921_v62  ;;  %v2887_v45 = vmul.f32 %v5139_v28, %v2851_v49 }
 0x4ee   : > { %v2922_v6 = vadd.f32 %v5143_v8, %v2886_v39  ;;  %v2852_v25 = vmul.f32 %v3630_v30, %v5124_v42 }
 0x4ef   : > { %v2923_v14 = vadd.f32 %v5143_v8, %v2887_v45 }
 0x4f0   : > { %2954 = vst.msk [vmem:[%s3805_s14 + $0xe8] sm:$0xff] %vm557_vm1, %v2922_v6  ;;  %v2888_v5 = vmul.f32 %v5139_v28, %v2852_v25 }
 0x4f1   : > { %2955 = vst.msk [vmem:[%s3805_s14 + $0xf0] sm:$0xff] %vm557_vm1, %v2923_v14 }
 0x4f2   : > { %v2924_v46 = vadd.f32 %v5143_v8, %v2888_v5 }
 0x4f4   : > { %2956 = vst.msk [vmem:[%s3805_s14 + $0xf8] sm:$0xff] %vm557_vm1, %v2924_v46 }
 0x4f5 PF: > { %s16_s27 = sadd.s32 1, %s3685_s27   ;;  %s5339_s30 = sld [smem:[#allocation5_spill]] }
 0x4f6   : > { %p13_p0 = scmp.ge.s32.totalorder %s16_s27, 10   ;;  %s5340_s9 = sld [smem:[#allocation6_spill]] }
 0x4f7   : > { %s5341_s10 = sld [smem:[#allocation7_spill]]  ;;  %s5342_s21 = smov %s3673_s24 }
 0x4f8   : > { %s5343_s22 = smov %s3677_s25  ;;  %s5344_s23 = smov %s3681_s26 }
 0x4f9   :  { %15 = sbr.rel (!%p13_p0) target bundleno = 4 (0x4), region = 102 }
 0x4fb   : > { %s5345_s24 = smov %s5339_s30 }
 0x4fc   : > { %s5346_s25 = smov %s5340_s9 }
 0x4fd   : > { %s5347_s26 = smov %s5341_s10 }

</bundles_post_ra>
